<compile_context>
chip_gen: v5e
topology: v5e:2x2
jax: 0.10.0
libtpu: 0.0.40
codegen_flags: <defaults>
</compile_context>

<pallas_src>
import jax
import jax.numpy as jnp
from jax.experimental import pallas as pl
from jax.experimental.pallas import tpu as pltpu

EPS = 1e-5
CH = (8, 8, 16, 32)        # conv1-out, stage1, stage2, stage3 channels
STRIDES = (1, 2, 2)
NUM_CLASSES = 10


# ---------------------------------------------------------------------------
# Tiling helper
# ---------------------------------------------------------------------------
def _pick_tm(M):
    """Pick the lane-axis tile. Prefer >=2 grid steps (v7x has 2 TCs) with big tiles."""
    assert M % 128 == 0
    cap = 2048
    if M <= cap:
        if M >= 512 and (M // 2) % 128 == 0:
            return M // 2
        return M
    for tm in range(cap, 127, -128):
        if M % tm == 0:
            return tm
    return 128


# ---------------------------------------------------------------------------
# Pallas kernels
# ---------------------------------------------------------------------------
def _make_mm_kernel(use_bias, use_relu, use_res, use_post):
    def kernel(*refs):
        i = 0
        w_ref = refs[i]; i += 1
        x_ref = refs[i]; i += 1
        bias_ref = res_ref = scale_ref = shift_ref = None
        if use_bias:
            bias_ref = refs[i]; i += 1
        if use_res:
            res_ref = refs[i]; i += 1
        if use_post:
            scale_ref = refs[i]; i += 1
            shift_ref = refs[i]; i += 1
        out_ref = refs[i]; i += 1
        act_ref = refs[i] if use_post else None

        # bf16 x bf16 -> f32 accumulation on the MXU; output block [Cout, tm] is
        # lane-dense (tm on the 128-lane axis).
        y = jnp.dot(w_ref[...], x_ref[...], preferred_element_type=jnp.float32)
        if use_bias:
            y = y + bias_ref[...]
        if use_relu:
            y = jnp.maximum(y, 0.0)
        if use_res:
            y = y + res_ref[...].astype(jnp.float32)
        out_ref[...] = y.astype(out_ref.dtype)
        if use_post:
            act_ref[...] = jnp.maximum(
                y * scale_ref[...] + shift_ref[...], 0.0).astype(act_ref.dtype)
    return kernel


def conv_matmul(w_T, patches_T, *, bias=None, relu=False, res=None,
                post=None, out_dtype=jnp.float32):
    """Transposed conv-as-matmul with fused epilogue.

        y   = (w_T @ patches_T) [+ bias] ; [relu] ; [+ res]           -> raw output (f32)
        act = relu(y * post_scale + post_shift)                        -> optional 2nd output (bf16)

    w_T: [Cout, K], patches_T: [K, M]; outputs are [Cout, M] (M on the lane axis).
    """
    Cout, K = w_T.shape
    K2, M = patches_T.shape
    assert K == K2
    # Epilogue order guard: relu is applied before the residual add in the kernel.
    assert not (relu and res is not None)

    tm = _pick_tm(M)
    grid = (M // tm,)

    in_specs = [pl.BlockSpec((Cout, K), lambda i: (0, 0)),
                pl.BlockSpec((K, tm), lambda i: (0, i))]
    args = [w_T.astype(jnp.bfloat16), patches_T.astype(jnp.bfloat16)]
    if bias is not None:
        in_specs.append(pl.BlockSpec((Cout, 1), lambda i: (0, 0)))
        args.append(bias.reshape(Cout, 1).astype(jnp.float32))
    if res is not None:
        in_specs.append(pl.BlockSpec((Cout, tm), lambda i: (0, i)))
        args.append(res)
    if post is not None:
        scale, shift = post
        in_specs.append(pl.BlockSpec((Cout, 1), lambda i: (0, 0)))
        args.append(scale.reshape(Cout, 1).astype(jnp.float32))
        in_specs.append(pl.BlockSpec((Cout, 1), lambda i: (0, 0)))
        args.append(shift.reshape(Cout, 1).astype(jnp.float32))

    if post is not None:
        out_shape = (jax.ShapeDtypeStruct((Cout, M), jnp.float32),
                     jax.ShapeDtypeStruct((Cout, M), jnp.bfloat16))
        out_specs = (pl.BlockSpec((Cout, tm), lambda i: (0, i)),
                     pl.BlockSpec((Cout, tm), lambda i: (0, i)))
    else:
        out_shape = jax.ShapeDtypeStruct((Cout, M), out_dtype)
        out_specs = pl.BlockSpec((Cout, tm), lambda i: (0, i))

    kernel = _make_mm_kernel(bias is not None, relu, res is not None, post is not None)
    return pl.pallas_call(
        kernel,
        out_shape=out_shape,
        grid=grid,
        in_specs=in_specs,
        out_specs=out_specs,
        compiler_params=pltpu.CompilerParams(dimension_semantics=("parallel",)),
    )(*args)


def _pool_head_kernel(x_ref, w_ref, b_ref, o_ref):
    x = x_ref[...].astype(jnp.float32)                 # [C, N, S]
    pooled = jnp.sum(x, axis=2) * (1.0 / x.shape[2])   # avg_pool2d(8) -> [C, N]
    o_ref[...] = jnp.dot(w_ref[...], pooled,
                         preferred_element_type=jnp.float32) + b_ref[...]


def pool_head(feat, w, b):
    """feat: [C, N, S] (already relu(bn_last(.))) -> mean over S -> W @ pooled + b -> [ncls, N]."""
    C, N, S = feat.shape
    ncls = w.shape[0]
    return pl.pallas_call(
        _pool_head_kernel,
        out_shape=jax.ShapeDtypeStruct((ncls, N), jnp.float32),
        grid=(1,),
        in_specs=[pl.BlockSpec((C, N, S), lambda i: (0, 0, 0)),
                  pl.BlockSpec((ncls, C), lambda i: (0, 0)),
                  pl.BlockSpec((ncls, 1), lambda i: (0, 0))],
        out_specs=pl.BlockSpec((ncls, N), lambda i: (0, 0)),
    )(feat, w.astype(jnp.float32), b.reshape(ncls, 1).astype(jnp.float32))


# ---------------------------------------------------------------------------
# JAX glue: transposed im2col, parameter fusion
# ---------------------------------------------------------------------------
def im2col_T(x4, k, stride, pad):
    """x4: [C, N, H, W] -> transposed patches [k*k*C, N*Ho*Wo] (tap-major, cin-minor)."""
    C, N, H, W = x4.shape
    xp = jnp.pad(x4, ((0, 0), (0, 0), (pad, pad), (pad, pad)))
    Ho = (H + 2 * pad - k) // stride + 1
    Wo = (W + 2 * pad - k) // stride + 1
    cols = []
    for dy in range(k):
        for dx in range(k):
            cols.append(xp[:, :, dy:dy + stride * Ho:stride,
                           dx:dx + stride * Wo:stride])
    patches = jnp.concatenate(cols, axis=0)            # [k*k*C, N, Ho, Wo]
    return patches.reshape(k * k * C, N * Ho * Wo), (Ho, Wo)


def w_to_mat_T(w):
    """PyTorch conv weight [Cout,Cin,kh,kw] -> transposed matmul matrix [Cout, kh*kw*Cin]."""
    cout, cin, kh, kw = w.shape
    return jnp.transpose(w, (0, 2, 3, 1)).reshape(cout, kh * kw * cin)


def bn_affine(bn):
    inv = 1.0 / jnp.sqrt(bn['running_var'] + EPS)
    scale = bn['weight'] * inv
    shift = bn['bias'] - bn['weight'] * bn['running_mean'] * inv
    return scale, shift


def fuse_bn(bn_s, bn_t, a_s, a_t):
    ss, hs = bn_affine(bn_s)
    st, ht = bn_affine(bn_t)
    return a_s * ss + a_t * st, a_s * hs + a_t * ht


def fuse_conv(w_s, w_t, a_s, a_t):
    return w_s * a_s[:, None, None, None] + w_t * a_t[:, None, None, None]


def fuse_conv_bn(w_s, bn_s, w_t, bn_t, a_s, a_t):
    gs, cs = bn_affine(bn_s)
    gt, ct = bn_affine(bn_t)
    w = (w_s * (a_s * gs)[:, None, None, None]
         + w_t * (a_t * gt)[:, None, None, None])
    b = a_s * cs + a_t * ct
    return w, b


# ---------------------------------------------------------------------------
# CombinedResNet forward (channel-major [C, M] activations)
# ---------------------------------------------------------------------------
def forward_block(x_raw_T, act_T, N, H, W, sb, tb, alfa_s, alfa_t, key, post_affine):
    """x_raw_T: pre-bn1 block input [Cin, M] (f32); act_T: relu(bn1(x)) [Cin, M] (bf16)."""
    Cin = act_T.shape[0]
    stride = sb['stride']
    act4 = act_T.reshape(Cin, N, H, W)

    # shortcut path
    if sb['shortcut'] is not None:
        a_s = alfa_s[key + '-shortcut-0'] + 1.0
        a_t = alfa_t[key + '-shortcut-0']
        wsc = fuse_conv(sb['shortcut'], tb['shortcut'], a_s, a_t)
        sc_in = act4[:, :, ::stride, ::stride].reshape(Cin, -1)
        shortcut_T = conv_matmul(w_to_mat_T(wsc), sc_in)                 # [Cout, Mo] f32
    else:
        shortcut_T = x_raw_T

    # conv1 -> bn2 (fused into weights+bias) -> relu
    a_s = alfa_s[key + '-bn2'] + 1.0
    a_t = alfa_t[key + '-bn2']
    wf, bias = fuse_conv_bn(sb['conv1'], sb['bn2'], tb['conv1'], tb['bn2'], a_s, a_t)
    p1, (Ho, Wo) = im2col_T(act4, 3, stride, 1)
    mid_T = conv_matmul(w_to_mat_T(wf), p1, bias=bias, relu=True,
                        out_dtype=jnp.bfloat16)                          # [Cout, Mo] bf16
    Cout = mid_T.shape[0]

    # conv2 (combined) + residual, fused with the NEXT bn+relu (next bn1 or bn_last)
    a_s = alfa_s[key + '-conv2'] + 1.0
    a_t = alfa_t[key + '-conv2']
    w2 = fuse_conv(sb['conv2'], tb['conv2'], a_s, a_t)
    p2, _ = im2col_T(mid_T.reshape(Cout, N, Ho, Wo), 3, 1, 1)
    raw_T, act_next_T = conv_matmul(w_to_mat_T(w2), p2,
                                    res=shortcut_T, post=post_affine)
    return raw_T, act_next_T, (Ho, Wo)


def combined_forward(x_nchw, src, tgt, alfa_s, alfa_t):
    N, _, H, W = x_nchw.shape
    x_T = jnp.transpose(x_nchw, (1, 0, 2, 3)).astype(jnp.float32)        # [C, N, H, W]

    # flatten blocks and precompute the "post" affine that follows each producer
    blocks = []
    for skey in ('stage1', 'stage2', 'stage3'):
        for i in range(len(src[skey])):
            blocks.append((src[skey][i], tgt[skey][i], f'{skey}-{i}'))

    post_affines = []
    for sb, tb, key in blocks:
        a_s = alfa_s[key + '-bn1'] + 1.0
        a_t = alfa_t[key + '-bn1']
        post_affines.append(fuse_bn(sb['bn1'], tb['bn1'], a_s, a_t))
    a_s = alfa_s['bn_last'] + 1.0
    a_t = alfa_t['bn_last']
    post_affines.append(fuse_bn(src['bn_last'], tgt['bn_last'], a_s, a_t))

    # network conv1 (combined), fused with stage1-0's bn1+relu
    a_s = alfa_s['conv1'] + 1.0
    a_t = alfa_t['conv1']
    w1 = fuse_conv(src['conv1'], tgt['conv1'], a_s, a_t)
    p, (Ho, Wo) = im2col_T(x_T.astype(jnp.bfloat16), 3, 1, 1)
    raw_T, act_T = conv_matmul(w_to_mat_T(w1), p, post=post_affines[0])
    H, W = Ho, Wo

    # residual blocks
    for bi, (sb, tb, key) in enumerate(blocks):
        raw_T, act_T, (H, W) = forward_block(raw_T, act_T, N, H, W, sb, tb,
                                             alfa_s, alfa_t, key,
                                             post_affines[bi + 1])

    # act_T is already relu(bn_last(out)); avg_pool2d(8) + logits per task head
    C_last = act_T.shape[0]
    feat = act_T.reshape(C_last, N, H * W)
    outputs = {}
    for task, head in tgt['last'].items():
        logits_T = pool_head(feat, head['weight'], head['bias'])         # [ncls, N]
        outputs[task] = jnp.transpose(logits_T, (1, 0))                  # [N, ncls]
    return outputs


# ---------------------------------------------------------------------------
# Deterministic parameter construction (synthetic PreActResNet_cifar pair)
# ---------------------------------------------------------------------------
def make_bn(key, c):
    k1, k2, k3, k4 = jax.random.split(key, 4)
    return dict(weight=1.0 + 0.1 * jax.random.normal(k1, (c,), jnp.float32),
                bias=0.1 * jax.random.normal(k2, (c,), jnp.float32),
                running_mean=0.1 * jax.random.normal(k3, (c,), jnp.float32),
                running_var=1.0 + 0.2 * jax.random.uniform(k4, (c,), jnp.float32))


def make_block(key, cin, cout, stride):
    ks = jax.random.split(key, 5)
    blk = dict(
        bn1=make_bn(ks[0], cin),
        conv1=0.1 * jax.random.normal(ks[1], (cout, cin, 3, 3), jnp.float32),
        bn2=make_bn(ks[2], cout),
        conv2=0.1 * jax.random.normal(ks[3], (cout, cout, 3, 3), jnp.float32),
        stride=stride,
        shortcut=None,
    )
    if stride != 1 or cin != cout:
        blk['shortcut'] = 0.1 * jax.random.normal(ks[4], (cout, cin, 1, 1), jnp.float32)
    return blk


def make_model(key):
    ks = jax.random.split(key, 7)
    return dict(
        conv1=0.1 * jax.random.normal(ks[0], (CH[0], 3, 3, 3), jnp.float32),
        stage1=[make_block(ks[1], CH[0], CH[1], STRIDES[0])],
        stage2=[make_block(ks[2], CH[1], CH[2], STRIDES[1])],
        stage3=[make_block(ks[3], CH[2], CH[3], STRIDES[2])],
        bn_last=make_bn(ks[4], CH[3]),
        last={'All': dict(
            weight=0.1 * jax.random.normal(ks[5], (NUM_CLASSES, CH[3]), jnp.float32),
            bias=0.1 * jax.random.normal(ks[6], (NUM_CLASSES,), jnp.float32))},
    )


def make_alfas(model, value):
    alfas = {'conv1': value * jnp.ones((model['conv1'].shape[0],), jnp.float32),
             'bn_last': value * jnp.ones((model['bn_last']['weight'].shape[0],), jnp.float32)}
    for skey in ('stage1', 'stage2', 'stage3'):
        for i, blk in enumerate(model[skey]):
            pre = f'{skey}-{i}'
            alfas[f'{pre}-bn1'] = value * jnp.ones((blk['bn1']['weight'].shape[0],), jnp.float32)
            alfas[f'{pre}-bn2'] = value * jnp.ones((blk['bn2']['weight'].shape[0],), jnp.float32)
            alfas[f'{pre}-conv2'] = value * jnp.ones((blk['conv2'].shape[0],), jnp.float32)
            if blk['shortcut'] is not None:
                alfas[f'{pre}-shortcut-0'] = value * jnp.ones((blk['shortcut'].shape[0],), jnp.float32)
    return alfas


if __name__ == "__main__":
    key = jax.random.PRNGKey(0)
    kx, ksrc, ktgt = jax.random.split(key, 3)

    # CIFAR-style input (spatial must reach 8x8 before avg_pool2d(8)).
    x = jax.random.normal(kx, (2, 3, 32, 32), jnp.float32)

    source_model = make_model(ksrc)
    target_model = make_model(ktgt)
    alfa_source = make_alfas(source_model, -0.5)
    alfa_target = make_alfas(target_model, 0.5)

    fwd = jax.jit(lambda xx: combined_forward(xx, source_model, target_model,
                                              alfa_source, alfa_target))
    out = fwd(x)
    out = jax.block_until_ready(out)

    assert out['All'].shape == (2, NUM_CLASSES)
    assert bool(jnp.all(jnp.isfinite(out['All'])))
    print("KERNEL_OK")
</pallas_src>

<mosaic_0001>
module attributes {stable_mosaic.version = 11 : i64} {
  func.func @kernel(%arg0: i32, %arg1: memref<8x27xbf16, #tpu.memory_space<vmem>>, %arg2: memref<27x1024xbf16, #tpu.memory_space<vmem>>, %arg3: memref<8x1xf32, #tpu.memory_space<vmem>>, %arg4: memref<8x1xf32, #tpu.memory_space<vmem>>, %arg5: memref<8x1024xf32, #tpu.memory_space<vmem>>, %arg6: memref<8x1024xbf16, #tpu.memory_space<vmem>>) attributes {dimension_semantics = [#tpu.dimension_semantics<parallel>], iteration_bounds = array<i64: 2>, scalar_prefetch = 0 : i64, scratch_operands = 0 : i64, tpu.core_type = #tpu.core_type<tc>, window_params = [{pipeline_mode = #tpu.pipeline_mode<synchronous>, transform_indices = @transform_0, window_bounds = array<i64: 8, 27>}, {transform_indices = @transform_1, window_bounds = array<i64: 27, 1024>}, {pipeline_mode = #tpu.pipeline_mode<synchronous>, transform_indices = @transform_2, window_bounds = array<i64: 8, 1>}, {pipeline_mode = #tpu.pipeline_mode<synchronous>, transform_indices = @transform_3, window_bounds = array<i64: 8, 1>}, {transform_indices = @transform_4, window_bounds = array<i64: 8, 1024>}, {transform_indices = @transform_5, window_bounds = array<i64: 8, 1024>}]} {
    %c0 = arith.constant 0 : index
    %c0_0 = arith.constant 0 : index
    %0 = vector.load %arg1[%c0, %c0_0] : memref<8x27xbf16, #tpu.memory_space<vmem>>, vector<8x27xbf16>
    %c0_1 = arith.constant 0 : index
    %c0_2 = arith.constant 0 : index
    %1 = vector.load %arg2[%c0_1, %c0_2] : memref<27x1024xbf16, #tpu.memory_space<vmem>>, vector<27x1024xbf16>
    %cst = arith.constant dense<0.000000e+00> : vector<8x1024xf32>
    %2 = tpu.matmul %0, %1, %cst {dimension_numbers = #tpu.dot_dimension_numbers<[1], [0], [0], [1], [0, 0, 1, 1], [], []>} : vector<8x27xbf16>, vector<27x1024xbf16>, vector<8x1024xf32> -> vector<8x1024xf32>
    %c0_3 = arith.constant 0 : index
    %c0_4 = arith.constant 0 : index
    %3 = vector.load %arg5[%c0_3, %c0_4] : memref<8x1024xf32, #tpu.memory_space<vmem>>, vector<8x1024xf32>
    tpu.vector_store %arg5[%c0_3, %c0_4], %2 {strides = array<i32>} : memref<8x1024xf32, #tpu.memory_space<vmem>>, vector<8x1024xf32>,
    %c0_5 = arith.constant 0 : index
    %c0_6 = arith.constant 0 : index
    %4 = vector.load %arg3[%c0_5, %c0_6] : memref<8x1xf32, #tpu.memory_space<vmem>>, vector<8x1xf32>
    %5 = vector.broadcast %4 : vector<8x1xf32> to vector<8x1024xf32>
    %6 = arith.mulf %2, %5 : vector<8x1024xf32>
    %c0_7 = arith.constant 0 : index
    %c0_8 = arith.constant 0 : index
    %7 = vector.load %arg4[%c0_7, %c0_8] : memref<8x1xf32, #tpu.memory_space<vmem>>, vector<8x1xf32>
    %8 = vector.broadcast %7 : vector<8x1xf32> to vector<8x1024xf32>
    %9 = arith.addf %6, %8 : vector<8x1024xf32>
    %cst_9 = arith.constant 0.000000e+00 : f32
    %10 = vector.broadcast %cst_9 : f32 to vector<8x1024xf32>
    %11 = arith.maximumf %9, %10 : vector<8x1024xf32>
    %12 = arith.truncf %11 : vector<8x1024xf32> to vector<8x1024xbf16>
    %c0_10 = arith.constant 0 : index
    %c0_11 = arith.constant 0 : index
    %13 = vector.load %arg6[%c0_10, %c0_11] : memref<8x1024xbf16, #tpu.memory_space<vmem>>, vector<8x1024xbf16>
    tpu.vector_store %arg6[%c0_10, %c0_11], %12 {strides = array<i32>} : memref<8x1024xbf16, #tpu.memory_space<vmem>>, vector<8x1024xbf16>,
    return
  }
  func.func @transform_0(%arg0: i32) -> (i32, i32) {
    %c0_i32 = arith.constant 0 : i32
    %c0_i32_0 = arith.constant 0 : i32
    %c0_i32_1 = arith.constant 0 : i32
    return %c0_i32, %c0_i32_0 : i32, i32
  }
  func.func @transform_1(%arg0: i32) -> (i32, i32) {
    %c0_i32 = arith.constant 0 : i32
    %c0_i32_0 = arith.constant 0 : i32
    return %c0_i32, %arg0 : i32, i32
  }
  func.func @transform_2(%arg0: i32) -> (i32, i32) {
    %c0_i32 = arith.constant 0 : i32
    %c0_i32_0 = arith.constant 0 : i32
    %c0_i32_1 = arith.constant 0 : i32
    return %c0_i32, %c0_i32_0 : i32, i32
  }
  func.func @transform_3(%arg0: i32) -> (i32, i32) {
    %c0_i32 = arith.constant 0 : i32
    %c0_i32_0 = arith.constant 0 : i32
    %c0_i32_1 = arith.constant 0 : i32
    return %c0_i32, %c0_i32_0 : i32, i32
  }
  func.func @transform_4(%arg0: i32) -> (i32, i32) {
    %c0_i32 = arith.constant 0 : i32
    %c0_i32_0 = arith.constant 0 : i32
    return %c0_i32, %arg0 : i32, i32
  }
  func.func @transform_5(%arg0: i32) -> (i32, i32) {
    %c0_i32 = arith.constant 0 : i32
    %c0_i32_0 = arith.constant 0 : i32
    return %c0_i32, %arg0 : i32, i32
  }
}

module attributes {stable_mosaic.version = 11 : i64} {
  func.func @kernel(%arg0: i32, %arg1: memref<8x72xbf16, #tpu.memory_space<vmem>>, %arg2: memref<72x1024xbf16, #tpu.memory_space<vmem>>, %arg3: memref<8x1xf32, #tpu.memory_space<vmem>>, %arg4: memref<8x1024xbf16, #tpu.memory_space<vmem>>) attributes {dimension_semantics = [#tpu.dimension_semantics<parallel>], iteration_bounds = array<i64: 2>, scalar_prefetch = 0 : i64, scratch_operands = 0 : i64, tpu.core_type = #tpu.core_type<tc>, window_params = [{pipeline_mode = #tpu.pipeline_mode<synchronous>, transform_indices = @transform_0, window_bounds = array<i64: 8, 72>}, {transform_indices = @transform_1, window_bounds = array<i64: 72, 1024>}, {pipeline_mode = #tpu.pipeline_mode<synchronous>, transform_indices = @transform_2, window_bounds = array<i64: 8, 1>}, {transform_indices = @transform_3, window_bounds = array<i64: 8, 1024>}]} {
    %c0 = arith.constant 0 : index
    %c0_0 = arith.constant 0 : index
    %0 = vector.load %arg1[%c0, %c0_0] : memref<8x72xbf16, #tpu.memory_space<vmem>>, vector<8x72xbf16>
    %c0_1 = arith.constant 0 : index
    %c0_2 = arith.constant 0 : index
    %1 = vector.load %arg2[%c0_1, %c0_2] : memref<72x1024xbf16, #tpu.memory_space<vmem>>, vector<72x1024xbf16>
    %cst = arith.constant dense<0.000000e+00> : vector<8x1024xf32>
    %2 = tpu.matmul %0, %1, %cst {dimension_numbers = #tpu.dot_dimension_numbers<[1], [0], [0], [1], [0, 0, 1, 1], [], []>} : vector<8x72xbf16>, vector<72x1024xbf16>, vector<8x1024xf32> -> vector<8x1024xf32>
    %c0_3 = arith.constant 0 : index
    %c0_4 = arith.constant 0 : index
    %3 = vector.load %arg3[%c0_3, %c0_4] : memref<8x1xf32, #tpu.memory_space<vmem>>, vector<8x1xf32>
    %4 = vector.broadcast %3 : vector<8x1xf32> to vector<8x1024xf32>
    %5 = arith.addf %2, %4 : vector<8x1024xf32>
    %cst_5 = arith.constant 0.000000e+00 : f32
    %6 = vector.broadcast %cst_5 : f32 to vector<8x1024xf32>
    %7 = arith.maximumf %5, %6 : vector<8x1024xf32>
    %8 = arith.truncf %7 : vector<8x1024xf32> to vector<8x1024xbf16>
    %c0_6 = arith.constant 0 : index
    %c0_7 = arith.constant 0 : index
    %9 = vector.load %arg4[%c0_6, %c0_7] : memref<8x1024xbf16, #tpu.memory_space<vmem>>, vector<8x1024xbf16>
    tpu.vector_store %arg4[%c0_6, %c0_7], %8 {strides = array<i32>} : memref<8x1024xbf16, #tpu.memory_space<vmem>>, vector<8x1024xbf16>,
    return
  }
  func.func @transform_0(%arg0: i32) -> (i32, i32) {
    %c0_i32 = arith.constant 0 : i32
    %c0_i32_0 = arith.constant 0 : i32
    %c0_i32_1 = arith.constant 0 : i32
    return %c0_i32, %c0_i32_0 : i32, i32
  }
  func.func @transform_1(%arg0: i32) -> (i32, i32) {
    %c0_i32 = arith.constant 0 : i32
    %c0_i32_0 = arith.constant 0 : i32
    return %c0_i32, %arg0 : i32, i32
  }
  func.func @transform_2(%arg0: i32) -> (i32, i32) {
    %c0_i32 = arith.constant 0 : i32
    %c0_i32_0 = arith.constant 0 : i32
    %c0_i32_1 = arith.constant 0 : i32
    return %c0_i32, %c0_i32_0 : i32, i32
  }
  func.func @transform_3(%arg0: i32) -> (i32, i32) {
    %c0_i32 = arith.constant 0 : i32
    %c0_i32_0 = arith.constant 0 : i32
    return %c0_i32, %arg0 : i32, i32
  }
}

module attributes {stable_mosaic.version = 11 : i64} {
  func.func @kernel(%arg0: i32, %arg1: memref<8x72xbf16, #tpu.memory_space<vmem>>, %arg2: memref<72x1024xbf16, #tpu.memory_space<vmem>>, %arg3: memref<8x1024xf32, #tpu.memory_space<vmem>>, %arg4: memref<8x1xf32, #tpu.memory_space<vmem>>, %arg5: memref<8x1xf32, #tpu.memory_space<vmem>>, %arg6: memref<8x1024xf32, #tpu.memory_space<vmem>>, %arg7: memref<8x1024xbf16, #tpu.memory_space<vmem>>) attributes {dimension_semantics = [#tpu.dimension_semantics<parallel>], iteration_bounds = array<i64: 2>, scalar_prefetch = 0 : i64, scratch_operands = 0 : i64, tpu.core_type = #tpu.core_type<tc>, window_params = [{pipeline_mode = #tpu.pipeline_mode<synchronous>, transform_indices = @transform_0, window_bounds = array<i64: 8, 72>}, {transform_indices = @transform_1, window_bounds = array<i64: 72, 1024>}, {transform_indices = @transform_2, window_bounds = array<i64: 8, 1024>}, {pipeline_mode = #tpu.pipeline_mode<synchronous>, transform_indices = @transform_3, window_bounds = array<i64: 8, 1>}, {pipeline_mode = #tpu.pipeline_mode<synchronous>, transform_indices = @transform_4, window_bounds = array<i64: 8, 1>}, {transform_indices = @transform_5, window_bounds = array<i64: 8, 1024>}, {transform_indices = @transform_6, window_bounds = array<i64: 8, 1024>}]} {
    %c0 = arith.constant 0 : index
    %c0_0 = arith.constant 0 : index
    %0 = vector.load %arg1[%c0, %c0_0] : memref<8x72xbf16, #tpu.memory_space<vmem>>, vector<8x72xbf16>
    %c0_1 = arith.constant 0 : index
    %c0_2 = arith.constant 0 : index
    %1 = vector.load %arg2[%c0_1, %c0_2] : memref<72x1024xbf16, #tpu.memory_space<vmem>>, vector<72x1024xbf16>
    %cst = arith.constant dense<0.000000e+00> : vector<8x1024xf32>
    %2 = tpu.matmul %0, %1, %cst {dimension_numbers = #tpu.dot_dimension_numbers<[1], [0], [0], [1], [0, 0, 1, 1], [], []>} : vector<8x72xbf16>, vector<72x1024xbf16>, vector<8x1024xf32> -> vector<8x1024xf32>
    %c0_3 = arith.constant 0 : index
    %c0_4 = arith.constant 0 : index
    %3 = vector.load %arg3[%c0_3, %c0_4] : memref<8x1024xf32, #tpu.memory_space<vmem>>, vector<8x1024xf32>
    %4 = arith.addf %2, %3 : vector<8x1024xf32>
    %c0_5 = arith.constant 0 : index
    %c0_6 = arith.constant 0 : index
    %5 = vector.load %arg6[%c0_5, %c0_6] : memref<8x1024xf32, #tpu.memory_space<vmem>>, vector<8x1024xf32>
    tpu.vector_store %arg6[%c0_5, %c0_6], %4 {strides = array<i32>} : memref<8x1024xf32, #tpu.memory_space<vmem>>, vector<8x1024xf32>,
    %c0_7 = arith.constant 0 : index
    %c0_8 = arith.constant 0 : index
    %6 = vector.load %arg4[%c0_7, %c0_8] : memref<8x1xf32, #tpu.memory_space<vmem>>, vector<8x1xf32>
    %7 = vector.broadcast %6 : vector<8x1xf32> to vector<8x1024xf32>
    %8 = arith.mulf %4, %7 : vector<8x1024xf32>
    %c0_9 = arith.constant 0 : index
    %c0_10 = arith.constant 0 : index
    %9 = vector.load %arg5[%c0_9, %c0_10] : memref<8x1xf32, #tpu.memory_space<vmem>>, vector<8x1xf32>
    %10 = vector.broadcast %9 : vector<8x1xf32> to vector<8x1024xf32>
    %11 = arith.addf %8, %10 : vector<8x1024xf32>
    %cst_11 = arith.constant 0.000000e+00 : f32
    %12 = vector.broadcast %cst_11 : f32 to vector<8x1024xf32>
    %13 = arith.maximumf %11, %12 : vector<8x1024xf32>
    %14 = arith.truncf %13 : vector<8x1024xf32> to vector<8x1024xbf16>
    %c0_12 = arith.constant 0 : index
    %c0_13 = arith.constant 0 : index
    %15 = vector.load %arg7[%c0_12, %c0_13] : memref<8x1024xbf16, #tpu.memory_space<vmem>>, vector<8x1024xbf16>
    tpu.vector_store %arg7[%c0_12, %c0_13], %14 {strides = array<i32>} : memref<8x1024xbf16, #tpu.memory_space<vmem>>, vector<8x1024xbf16>,
    return
  }
  func.func @transform_0(%arg0: i32) -> (i32, i32) {
    %c0_i32 = arith.constant 0 : i32
    %c0_i32_0 = arith.constant 0 : i32
    %c0_i32_1 = arith.constant 0 : i32
    return %c0_i32, %c0_i32_0 : i32, i32
  }
  func.func @transform_1(%arg0: i32) -> (i32, i32) {
    %c0_i32 = arith.constant 0 : i32
    %c0_i32_0 = arith.constant 0 : i32
    return %c0_i32, %arg0 : i32, i32
  }
  func.func @transform_2(%arg0: i32) -> (i32, i32) {
    %c0_i32 = arith.constant 0 : i32
    %c0_i32_0 = arith.constant 0 : i32
    return %c0_i32, %arg0 : i32, i32
  }
  func.func @transform_3(%arg0: i32) -> (i32, i32) {
    %c0_i32 = arith.constant 0 : i32
    %c0_i32_0 = arith.constant 0 : i32
    %c0_i32_1 = arith.constant 0 : i32
    return %c0_i32, %c0_i32_0 : i32, i32
  }
  func.func @transform_4(%arg0: i32) -> (i32, i32) {
    %c0_i32 = arith.constant 0 : i32
    %c0_i32_0 = arith.constant 0 : i32
    %c0_i32_1 = arith.constant 0 : i32
    return %c0_i32, %c0_i32_0 : i32, i32
  }
  func.func @transform_5(%arg0: i32) -> (i32, i32) {
    %c0_i32 = arith.constant 0 : i32
    %c0_i32_0 = arith.constant 0 : i32
    return %c0_i32, %arg0 : i32, i32
  }
  func.func @transform_6(%arg0: i32) -> (i32, i32) {
    %c0_i32 = arith.constant 0 : i32
    %c0_i32_0 = arith.constant 0 : i32
    return %c0_i32, %arg0 : i32, i32
  }
}

module attributes {stable_mosaic.version = 11 : i64} {
  func.func @kernel(%arg0: i32, %arg1: memref<16x8xbf16, #tpu.memory_space<vmem>>, %arg2: memref<8x256xbf16, #tpu.memory_space<vmem>>, %arg3: memref<16x256xf32, #tpu.memory_space<vmem>>) attributes {dimension_semantics = [#tpu.dimension_semantics<parallel>], iteration_bounds = array<i64: 2>, scalar_prefetch = 0 : i64, scratch_operands = 0 : i64, tpu.core_type = #tpu.core_type<tc>, window_params = [{pipeline_mode = #tpu.pipeline_mode<synchronous>, transform_indices = @transform_0, window_bounds = array<i64: 16, 8>}, {transform_indices = @transform_1, window_bounds = array<i64: 8, 256>}, {transform_indices = @transform_2, window_bounds = array<i64: 16, 256>}]} {
    %c0 = arith.constant 0 : index
    %c0_0 = arith.constant 0 : index
    %0 = vector.load %arg1[%c0, %c0_0] : memref<16x8xbf16, #tpu.memory_space<vmem>>, vector<16x8xbf16>
    %c0_1 = arith.constant 0 : index
    %c0_2 = arith.constant 0 : index
    %1 = vector.load %arg2[%c0_1, %c0_2] : memref<8x256xbf16, #tpu.memory_space<vmem>>, vector<8x256xbf16>
    %cst = arith.constant dense<0.000000e+00> : vector<16x256xf32>
    %2 = tpu.matmul %0, %1, %cst {dimension_numbers = #tpu.dot_dimension_numbers<[1], [0], [0], [1], [0, 0, 1, 1], [], []>} : vector<16x8xbf16>, vector<8x256xbf16>, vector<16x256xf32> -> vector<16x256xf32>
    %c0_3 = arith.constant 0 : index
    %c0_4 = arith.constant 0 : index
    %3 = vector.load %arg3[%c0_3, %c0_4] : memref<16x256xf32, #tpu.memory_space<vmem>>, vector<16x256xf32>
    tpu.vector_store %arg3[%c0_3, %c0_4], %2 {strides = array<i32>} : memref<16x256xf32, #tpu.memory_space<vmem>>, vector<16x256xf32>,
    return
  }
  func.func @transform_0(%arg0: i32) -> (i32, i32) {
    %c0_i32 = arith.constant 0 : i32
    %c0_i32_0 = arith.constant 0 : i32
    %c0_i32_1 = arith.constant 0 : i32
    return %c0_i32, %c0_i32_0 : i32, i32
  }
  func.func @transform_1(%arg0: i32) -> (i32, i32) {
    %c0_i32 = arith.constant 0 : i32
    %c0_i32_0 = arith.constant 0 : i32
    return %c0_i32, %arg0 : i32, i32
  }
  func.func @transform_2(%arg0: i32) -> (i32, i32) {
    %c0_i32 = arith.constant 0 : i32
    %c0_i32_0 = arith.constant 0 : i32
    return %c0_i32, %arg0 : i32, i32
  }
}

module attributes {stable_mosaic.version = 11 : i64} {
  func.func @kernel(%arg0: i32, %arg1: memref<16x72xbf16, #tpu.memory_space<vmem>>, %arg2: memref<72x256xbf16, #tpu.memory_space<vmem>>, %arg3: memref<16x1xf32, #tpu.memory_space<vmem>>, %arg4: memref<16x256xbf16, #tpu.memory_space<vmem>>) attributes {dimension_semantics = [#tpu.dimension_semantics<parallel>], iteration_bounds = array<i64: 2>, scalar_prefetch = 0 : i64, scratch_operands = 0 : i64, tpu.core_type = #tpu.core_type<tc>, window_params = [{pipeline_mode = #tpu.pipeline_mode<synchronous>, transform_indices = @transform_0, window_bounds = array<i64: 16, 72>}, {transform_indices = @transform_1, window_bounds = array<i64: 72, 256>}, {pipeline_mode = #tpu.pipeline_mode<synchronous>, transform_indices = @transform_2, window_bounds = array<i64: 16, 1>}, {transform_indices = @transform_3, window_bounds = array<i64: 16, 256>}]} {
    %c0 = arith.constant 0 : index
    %c0_0 = arith.constant 0 : index
    %0 = vector.load %arg1[%c0, %c0_0] : memref<16x72xbf16, #tpu.memory_space<vmem>>, vector<16x72xbf16>
    %c0_1 = arith.constant 0 : index
    %c0_2 = arith.constant 0 : index
    %1 = vector.load %arg2[%c0_1, %c0_2] : memref<72x256xbf16, #tpu.memory_space<vmem>>, vector<72x256xbf16>
    %cst = arith.constant dense<0.000000e+00> : vector<16x256xf32>
    %2 = tpu.matmul %0, %1, %cst {dimension_numbers = #tpu.dot_dimension_numbers<[1], [0], [0], [1], [0, 0, 1, 1], [], []>} : vector<16x72xbf16>, vector<72x256xbf16>, vector<16x256xf32> -> vector<16x256xf32>
    %c0_3 = arith.constant 0 : index
    %c0_4 = arith.constant 0 : index
    %3 = vector.load %arg3[%c0_3, %c0_4] : memref<16x1xf32, #tpu.memory_space<vmem>>, vector<16x1xf32>
    %4 = vector.broadcast %3 : vector<16x1xf32> to vector<16x256xf32>
    %5 = arith.addf %2, %4 : vector<16x256xf32>
    %cst_5 = arith.constant 0.000000e+00 : f32
    %6 = vector.broadcast %cst_5 : f32 to vector<16x256xf32>
    %7 = arith.maximumf %5, %6 : vector<16x256xf32>
    %8 = arith.truncf %7 : vector<16x256xf32> to vector<16x256xbf16>
    %c0_6 = arith.constant 0 : index
    %c0_7 = arith.constant 0 : index
    %9 = vector.load %arg4[%c0_6, %c0_7] : memref<16x256xbf16, #tpu.memory_space<vmem>>, vector<16x256xbf16>
    tpu.vector_store %arg4[%c0_6, %c0_7], %8 {strides = array<i32>} : memref<16x256xbf16, #tpu.memory_space<vmem>>, vector<16x256xbf16>,
    return
  }
  func.func @transform_0(%arg0: i32) -> (i32, i32) {
    %c0_i32 = arith.constant 0 : i32
    %c0_i32_0 = arith.constant 0 : i32
    %c0_i32_1 = arith.constant 0 : i32
    return %c0_i32, %c0_i32_0 : i32, i32
  }
  func.func @transform_1(%arg0: i32) -> (i32, i32) {
    %c0_i32 = arith.constant 0 : i32
    %c0_i32_0 = arith.constant 0 : i32
    return %c0_i32, %arg0 : i32, i32
  }
  func.func @transform_2(%arg0: i32) -> (i32, i32) {
    %c0_i32 = arith.constant 0 : i32
    %c0_i32_0 = arith.constant 0 : i32
    %c0_i32_1 = arith.constant 0 : i32
    return %c0_i32, %c0_i32_0 : i32, i32
  }
  func.func @transform_3(%arg0: i32) -> (i32, i32) {
    %c0_i32 = arith.constant 0 : i32
    %c0_i32_0 = arith.constant 0 : i32
    return %c0_i32, %arg0 : i32, i32
  }
}

module attributes {stable_mosaic.version = 11 : i64} {
  func.func @kernel(%arg0: i32, %arg1: memref<16x144xbf16, #tpu.memory_space<vmem>>, %arg2: memref<144x256xbf16, #tpu.memory_space<vmem>>, %arg3: memref<16x256xf32, #tpu.memory_space<vmem>>, %arg4: memref<16x1xf32, #tpu.memory_space<vmem>>, %arg5: memref<16x1xf32, #tpu.memory_space<vmem>>, %arg6: memref<16x256xf32, #tpu.memory_space<vmem>>, %arg7: memref<16x256xbf16, #tpu.memory_space<vmem>>) attributes {dimension_semantics = [#tpu.dimension_semantics<parallel>], iteration_bounds = array<i64: 2>, scalar_prefetch = 0 : i64, scratch_operands = 0 : i64, tpu.core_type = #tpu.core_type<tc>, window_params = [{pipeline_mode = #tpu.pipeline_mode<synchronous>, transform_indices = @transform_0, window_bounds = array<i64: 16, 144>}, {transform_indices = @transform_1, window_bounds = array<i64: 144, 256>}, {transform_indices = @transform_2, window_bounds = array<i64: 16, 256>}, {pipeline_mode = #tpu.pipeline_mode<synchronous>, transform_indices = @transform_3, window_bounds = array<i64: 16, 1>}, {pipeline_mode = #tpu.pipeline_mode<synchronous>, transform_indices = @transform_4, window_bounds = array<i64: 16, 1>}, {transform_indices = @transform_5, window_bounds = array<i64: 16, 256>}, {transform_indices = @transform_6, window_bounds = array<i64: 16, 256>}]} {
    %c0 = arith.constant 0 : index
    %c0_0 = arith.constant 0 : index
    %0 = vector.load %arg1[%c0, %c0_0] : memref<16x144xbf16, #tpu.memory_space<vmem>>, vector<16x144xbf16>
    %c0_1 = arith.constant 0 : index
    %c0_2 = arith.constant 0 : index
    %1 = vector.load %arg2[%c0_1, %c0_2] : memref<144x256xbf16, #tpu.memory_space<vmem>>, vector<144x256xbf16>
    %cst = arith.constant dense<0.000000e+00> : vector<16x256xf32>
    %2 = tpu.matmul %0, %1, %cst {dimension_numbers = #tpu.dot_dimension_numbers<[1], [0], [0], [1], [0, 0, 1, 1], [], []>} : vector<16x144xbf16>, vector<144x256xbf16>, vector<16x256xf32> -> vector<16x256xf32>
    %c0_3 = arith.constant 0 : index
    %c0_4 = arith.constant 0 : index
    %3 = vector.load %arg3[%c0_3, %c0_4] : memref<16x256xf32, #tpu.memory_space<vmem>>, vector<16x256xf32>
    %4 = arith.addf %2, %3 : vector<16x256xf32>
    %c0_5 = arith.constant 0 : index
    %c0_6 = arith.constant 0 : index
    %5 = vector.load %arg6[%c0_5, %c0_6] : memref<16x256xf32, #tpu.memory_space<vmem>>, vector<16x256xf32>
    tpu.vector_store %arg6[%c0_5, %c0_6], %4 {strides = array<i32>} : memref<16x256xf32, #tpu.memory_space<vmem>>, vector<16x256xf32>,
    %c0_7 = arith.constant 0 : index
    %c0_8 = arith.constant 0 : index
    %6 = vector.load %arg4[%c0_7, %c0_8] : memref<16x1xf32, #tpu.memory_space<vmem>>, vector<16x1xf32>
    %7 = vector.broadcast %6 : vector<16x1xf32> to vector<16x256xf32>
    %8 = arith.mulf %4, %7 : vector<16x256xf32>
    %c0_9 = arith.constant 0 : index
    %c0_10 = arith.constant 0 : index
    %9 = vector.load %arg5[%c0_9, %c0_10] : memref<16x1xf32, #tpu.memory_space<vmem>>, vector<16x1xf32>
    %10 = vector.broadcast %9 : vector<16x1xf32> to vector<16x256xf32>
    %11 = arith.addf %8, %10 : vector<16x256xf32>
    %cst_11 = arith.constant 0.000000e+00 : f32
    %12 = vector.broadcast %cst_11 : f32 to vector<16x256xf32>
    %13 = arith.maximumf %11, %12 : vector<16x256xf32>
    %14 = arith.truncf %13 : vector<16x256xf32> to vector<16x256xbf16>
    %c0_12 = arith.constant 0 : index
    %c0_13 = arith.constant 0 : index
    %15 = vector.load %arg7[%c0_12, %c0_13] : memref<16x256xbf16, #tpu.memory_space<vmem>>, vector<16x256xbf16>
    tpu.vector_store %arg7[%c0_12, %c0_13], %14 {strides = array<i32>} : memref<16x256xbf16, #tpu.memory_space<vmem>>, vector<16x256xbf16>,
    return
  }
  func.func @transform_0(%arg0: i32) -> (i32, i32) {
    %c0_i32 = arith.constant 0 : i32
    %c0_i32_0 = arith.constant 0 : i32
    %c0_i32_1 = arith.constant 0 : i32
    return %c0_i32, %c0_i32_0 : i32, i32
  }
  func.func @transform_1(%arg0: i32) -> (i32, i32) {
    %c0_i32 = arith.constant 0 : i32
    %c0_i32_0 = arith.constant 0 : i32
    return %c0_i32, %arg0 : i32, i32
  }
  func.func @transform_2(%arg0: i32) -> (i32, i32) {
    %c0_i32 = arith.constant 0 : i32
    %c0_i32_0 = arith.constant 0 : i32
    return %c0_i32, %arg0 : i32, i32
  }
  func.func @transform_3(%arg0: i32) -> (i32, i32) {
    %c0_i32 = arith.constant 0 : i32
    %c0_i32_0 = arith.constant 0 : i32
    %c0_i32_1 = arith.constant 0 : i32
    return %c0_i32, %c0_i32_0 : i32, i32
  }
  func.func @transform_4(%arg0: i32) -> (i32, i32) {
    %c0_i32 = arith.constant 0 : i32
    %c0_i32_0 = arith.constant 0 : i32
    %c0_i32_1 = arith.constant 0 : i32
    return %c0_i32, %c0_i32_0 : i32, i32
  }
  func.func @transform_5(%arg0: i32) -> (i32, i32) {
    %c0_i32 = arith.constant 0 : i32
    %c0_i32_0 = arith.constant 0 : i32
    return %c0_i32, %arg0 : i32, i32
  }
  func.func @transform_6(%arg0: i32) -> (i32, i32) {
    %c0_i32 = arith.constant 0 : i32
    %c0_i32_0 = arith.constant 0 : i32
    return %c0_i32, %arg0 : i32, i32
  }
}

module attributes {stable_mosaic.version = 11 : i64} {
  func.func @kernel(%arg0: i32, %arg1: memref<32x16xbf16, #tpu.memory_space<vmem>>, %arg2: memref<16x128xbf16, #tpu.memory_space<vmem>>, %arg3: memref<32x128xf32, #tpu.memory_space<vmem>>) attributes {dimension_semantics = [#tpu.dimension_semantics<parallel>], iteration_bounds = array<i64: 1>, scalar_prefetch = 0 : i64, scratch_operands = 0 : i64, tpu.core_type = #tpu.core_type<tc>, window_params = [{pipeline_mode = #tpu.pipeline_mode<synchronous>, transform_indices = @transform_0, window_bounds = array<i64: 32, 16>}, {transform_indices = @transform_1, window_bounds = array<i64: 16, 128>}, {transform_indices = @transform_2, window_bounds = array<i64: 32, 128>}]} {
    %c0 = arith.constant 0 : index
    %c0_0 = arith.constant 0 : index
    %0 = vector.load %arg1[%c0, %c0_0] : memref<32x16xbf16, #tpu.memory_space<vmem>>, vector<32x16xbf16>
    %c0_1 = arith.constant 0 : index
    %c0_2 = arith.constant 0 : index
    %1 = vector.load %arg2[%c0_1, %c0_2] : memref<16x128xbf16, #tpu.memory_space<vmem>>, vector<16x128xbf16>
    %cst = arith.constant dense<0.000000e+00> : vector<32x128xf32>
    %2 = tpu.matmul %0, %1, %cst {dimension_numbers = #tpu.dot_dimension_numbers<[1], [0], [0], [1], [0, 0, 1, 1], [], []>} : vector<32x16xbf16>, vector<16x128xbf16>, vector<32x128xf32> -> vector<32x128xf32>
    %c0_3 = arith.constant 0 : index
    %c0_4 = arith.constant 0 : index
    %3 = vector.load %arg3[%c0_3, %c0_4] : memref<32x128xf32, #tpu.memory_space<vmem>>, vector<32x128xf32>
    tpu.vector_store %arg3[%c0_3, %c0_4], %2 {strides = array<i32>} : memref<32x128xf32, #tpu.memory_space<vmem>>, vector<32x128xf32>,
    return
  }
  func.func @transform_0(%arg0: i32) -> (i32, i32) {
    %c0_i32 = arith.constant 0 : i32
    %c0_i32_0 = arith.constant 0 : i32
    %c0_i32_1 = arith.constant 0 : i32
    return %c0_i32, %c0_i32_0 : i32, i32
  }
  func.func @transform_1(%arg0: i32) -> (i32, i32) {
    %c0_i32 = arith.constant 0 : i32
    %c0_i32_0 = arith.constant 0 : i32
    return %c0_i32, %arg0 : i32, i32
  }
  func.func @transform_2(%arg0: i32) -> (i32, i32) {
    %c0_i32 = arith.constant 0 : i32
    %c0_i32_0 = arith.constant 0 : i32
    return %c0_i32, %arg0 : i32, i32
  }
}

module attributes {stable_mosaic.version = 11 : i64} {
  func.func @kernel(%arg0: i32, %arg1: memref<32x144xbf16, #tpu.memory_space<vmem>>, %arg2: memref<144x128xbf16, #tpu.memory_space<vmem>>, %arg3: memref<32x1xf32, #tpu.memory_space<vmem>>, %arg4: memref<32x128xbf16, #tpu.memory_space<vmem>>) attributes {dimension_semantics = [#tpu.dimension_semantics<parallel>], iteration_bounds = array<i64: 1>, scalar_prefetch = 0 : i64, scratch_operands = 0 : i64, tpu.core_type = #tpu.core_type<tc>, window_params = [{pipeline_mode = #tpu.pipeline_mode<synchronous>, transform_indices = @transform_0, window_bounds = array<i64: 32, 144>}, {transform_indices = @transform_1, window_bounds = array<i64: 144, 128>}, {pipeline_mode = #tpu.pipeline_mode<synchronous>, transform_indices = @transform_2, window_bounds = array<i64: 32, 1>}, {transform_indices = @transform_3, window_bounds = array<i64: 32, 128>}]} {
    %c0 = arith.constant 0 : index
    %c0_0 = arith.constant 0 : index
    %0 = vector.load %arg1[%c0, %c0_0] : memref<32x144xbf16, #tpu.memory_space<vmem>>, vector<32x144xbf16>
    %c0_1 = arith.constant 0 : index
    %c0_2 = arith.constant 0 : index
    %1 = vector.load %arg2[%c0_1, %c0_2] : memref<144x128xbf16, #tpu.memory_space<vmem>>, vector<144x128xbf16>
    %cst = arith.constant dense<0.000000e+00> : vector<32x128xf32>
    %2 = tpu.matmul %0, %1, %cst {dimension_numbers = #tpu.dot_dimension_numbers<[1], [0], [0], [1], [0, 0, 1, 1], [], []>} : vector<32x144xbf16>, vector<144x128xbf16>, vector<32x128xf32> -> vector<32x128xf32>
    %c0_3 = arith.constant 0 : index
    %c0_4 = arith.constant 0 : index
    %3 = vector.load %arg3[%c0_3, %c0_4] : memref<32x1xf32, #tpu.memory_space<vmem>>, vector<32x1xf32>
    %4 = vector.broadcast %3 : vector<32x1xf32> to vector<32x128xf32>
    %5 = arith.addf %2, %4 : vector<32x128xf32>
    %cst_5 = arith.constant 0.000000e+00 : f32
    %6 = vector.broadcast %cst_5 : f32 to vector<32x128xf32>
    %7 = arith.maximumf %5, %6 : vector<32x128xf32>
    %8 = arith.truncf %7 : vector<32x128xf32> to vector<32x128xbf16>
    %c0_6 = arith.constant 0 : index
    %c0_7 = arith.constant 0 : index
    %9 = vector.load %arg4[%c0_6, %c0_7] : memref<32x128xbf16, #tpu.memory_space<vmem>>, vector<32x128xbf16>
    tpu.vector_store %arg4[%c0_6, %c0_7], %8 {strides = array<i32>} : memref<32x128xbf16, #tpu.memory_space<vmem>>, vector<32x128xbf16>,
    return
  }
  func.func @transform_0(%arg0: i32) -> (i32, i32) {
    %c0_i32 = arith.constant 0 : i32
    %c0_i32_0 = arith.constant 0 : i32
    %c0_i32_1 = arith.constant 0 : i32
    return %c0_i32, %c0_i32_0 : i32, i32
  }
  func.func @transform_1(%arg0: i32) -> (i32, i32) {
    %c0_i32 = arith.constant 0 : i32
    %c0_i32_0 = arith.constant 0 : i32
    return %c0_i32, %arg0 : i32, i32
  }
  func.func @transform_2(%arg0: i32) -> (i32, i32) {
    %c0_i32 = arith.constant 0 : i32
    %c0_i32_0 = arith.constant 0 : i32
    %c0_i32_1 = arith.constant 0 : i32
    return %c0_i32, %c0_i32_0 : i32, i32
  }
  func.func @transform_3(%arg0: i32) -> (i32, i32) {
    %c0_i32 = arith.constant 0 : i32
    %c0_i32_0 = arith.constant 0 : i32
    return %c0_i32, %arg0 : i32, i32
  }
}

module attributes {stable_mosaic.version = 11 : i64} {
  func.func @kernel(%arg0: i32, %arg1: memref<32x288xbf16, #tpu.memory_space<vmem>>, %arg2: memref<288x128xbf16, #tpu.memory_space<vmem>>, %arg3: memref<32x128xf32, #tpu.memory_space<vmem>>, %arg4: memref<32x1xf32, #tpu.memory_space<vmem>>, %arg5: memref<32x1xf32, #tpu.memory_space<vmem>>, %arg6: memref<32x128xf32, #tpu.memory_space<vmem>>, %arg7: memref<32x128xbf16, #tpu.memory_space<vmem>>) attributes {dimension_semantics = [#tpu.dimension_semantics<parallel>], iteration_bounds = array<i64: 1>, scalar_prefetch = 0 : i64, scratch_operands = 0 : i64, tpu.core_type = #tpu.core_type<tc>, window_params = [{pipeline_mode = #tpu.pipeline_mode<synchronous>, transform_indices = @transform_0, window_bounds = array<i64: 32, 288>}, {transform_indices = @transform_1, window_bounds = array<i64: 288, 128>}, {transform_indices = @transform_2, window_bounds = array<i64: 32, 128>}, {pipeline_mode = #tpu.pipeline_mode<synchronous>, transform_indices = @transform_3, window_bounds = array<i64: 32, 1>}, {pipeline_mode = #tpu.pipeline_mode<synchronous>, transform_indices = @transform_4, window_bounds = array<i64: 32, 1>}, {transform_indices = @transform_5, window_bounds = array<i64: 32, 128>}, {transform_indices = @transform_6, window_bounds = array<i64: 32, 128>}]} {
    %c0 = arith.constant 0 : index
    %c0_0 = arith.constant 0 : index
    %0 = vector.load %arg1[%c0, %c0_0] : memref<32x288xbf16, #tpu.memory_space<vmem>>, vector<32x288xbf16>
    %c0_1 = arith.constant 0 : index
    %c0_2 = arith.constant 0 : index
    %1 = vector.load %arg2[%c0_1, %c0_2] : memref<288x128xbf16, #tpu.memory_space<vmem>>, vector<288x128xbf16>
    %cst = arith.constant dense<0.000000e+00> : vector<32x128xf32>
    %2 = tpu.matmul %0, %1, %cst {dimension_numbers = #tpu.dot_dimension_numbers<[1], [0], [0], [1], [0, 0, 1, 1], [], []>} : vector<32x288xbf16>, vector<288x128xbf16>, vector<32x128xf32> -> vector<32x128xf32>
    %c0_3 = arith.constant 0 : index
    %c0_4 = arith.constant 0 : index
    %3 = vector.load %arg3[%c0_3, %c0_4] : memref<32x128xf32, #tpu.memory_space<vmem>>, vector<32x128xf32>
    %4 = arith.addf %2, %3 : vector<32x128xf32>
    %c0_5 = arith.constant 0 : index
    %c0_6 = arith.constant 0 : index
    %5 = vector.load %arg6[%c0_5, %c0_6] : memref<32x128xf32, #tpu.memory_space<vmem>>, vector<32x128xf32>
    tpu.vector_store %arg6[%c0_5, %c0_6], %4 {strides = array<i32>} : memref<32x128xf32, #tpu.memory_space<vmem>>, vector<32x128xf32>,
    %c0_7 = arith.constant 0 : index
    %c0_8 = arith.constant 0 : index
    %6 = vector.load %arg4[%c0_7, %c0_8] : memref<32x1xf32, #tpu.memory_space<vmem>>, vector<32x1xf32>
    %7 = vector.broadcast %6 : vector<32x1xf32> to vector<32x128xf32>
    %8 = arith.mulf %4, %7 : vector<32x128xf32>
    %c0_9 = arith.constant 0 : index
    %c0_10 = arith.constant 0 : index
    %9 = vector.load %arg5[%c0_9, %c0_10] : memref<32x1xf32, #tpu.memory_space<vmem>>, vector<32x1xf32>
    %10 = vector.broadcast %9 : vector<32x1xf32> to vector<32x128xf32>
    %11 = arith.addf %8, %10 : vector<32x128xf32>
    %cst_11 = arith.constant 0.000000e+00 : f32
    %12 = vector.broadcast %cst_11 : f32 to vector<32x128xf32>
    %13 = arith.maximumf %11, %12 : vector<32x128xf32>
    %14 = arith.truncf %13 : vector<32x128xf32> to vector<32x128xbf16>
    %c0_12 = arith.constant 0 : index
    %c0_13 = arith.constant 0 : index
    %15 = vector.load %arg7[%c0_12, %c0_13] : memref<32x128xbf16, #tpu.memory_space<vmem>>, vector<32x128xbf16>
    tpu.vector_store %arg7[%c0_12, %c0_13], %14 {strides = array<i32>} : memref<32x128xbf16, #tpu.memory_space<vmem>>, vector<32x128xbf16>,
    return
  }
  func.func @transform_0(%arg0: i32) -> (i32, i32) {
    %c0_i32 = arith.constant 0 : i32
    %c0_i32_0 = arith.constant 0 : i32
    %c0_i32_1 = arith.constant 0 : i32
    return %c0_i32, %c0_i32_0 : i32, i32
  }
  func.func @transform_1(%arg0: i32) -> (i32, i32) {
    %c0_i32 = arith.constant 0 : i32
    %c0_i32_0 = arith.constant 0 : i32
    return %c0_i32, %arg0 : i32, i32
  }
  func.func @transform_2(%arg0: i32) -> (i32, i32) {
    %c0_i32 = arith.constant 0 : i32
    %c0_i32_0 = arith.constant 0 : i32
    return %c0_i32, %arg0 : i32, i32
  }
  func.func @transform_3(%arg0: i32) -> (i32, i32) {
    %c0_i32 = arith.constant 0 : i32
    %c0_i32_0 = arith.constant 0 : i32
    %c0_i32_1 = arith.constant 0 : i32
    return %c0_i32, %c0_i32_0 : i32, i32
  }
  func.func @transform_4(%arg0: i32) -> (i32, i32) {
    %c0_i32 = arith.constant 0 : i32
    %c0_i32_0 = arith.constant 0 : i32
    %c0_i32_1 = arith.constant 0 : i32
    return %c0_i32, %c0_i32_0 : i32, i32
  }
  func.func @transform_5(%arg0: i32) -> (i32, i32) {
    %c0_i32 = arith.constant 0 : i32
    %c0_i32_0 = arith.constant 0 : i32
    return %c0_i32, %arg0 : i32, i32
  }
  func.func @transform_6(%arg0: i32) -> (i32, i32) {
    %c0_i32 = arith.constant 0 : i32
    %c0_i32_0 = arith.constant 0 : i32
    return %c0_i32, %arg0 : i32, i32
  }
}

module attributes {stable_mosaic.version = 11 : i64} {
  func.func @_pool_head_kernel(%arg0: i32, %arg1: memref<32x2x64xbf16, #tpu.memory_space<vmem>>, %arg2: memref<10x32xf32, #tpu.memory_space<vmem>>, %arg3: memref<10x1xf32, #tpu.memory_space<vmem>>, %arg4: memref<10x2xf32, #tpu.memory_space<vmem>>) attributes {dimension_semantics = [#tpu.dimension_semantics<arbitrary>], iteration_bounds = array<i64: 1>, scalar_prefetch = 0 : i64, scratch_operands = 0 : i64, tpu.core_type = #tpu.core_type<tc>, window_params = [{pipeline_mode = #tpu.pipeline_mode<synchronous>, transform_indices = @transform_0, window_bounds = array<i64: 32, 2, 64>}, {pipeline_mode = #tpu.pipeline_mode<synchronous>, transform_indices = @transform_1, window_bounds = array<i64: 10, 32>}, {pipeline_mode = #tpu.pipeline_mode<synchronous>, transform_indices = @transform_2, window_bounds = array<i64: 10, 1>}, {pipeline_mode = #tpu.pipeline_mode<synchronous>, transform_indices = @transform_3, window_bounds = array<i64: 10, 2>}]} {
    %c0 = arith.constant 0 : index
    %c0_0 = arith.constant 0 : index
    %c0_1 = arith.constant 0 : index
    %0 = vector.load %arg1[%c0, %c0_0, %c0_1] : memref<32x2x64xbf16, #tpu.memory_space<vmem>>, vector<32x2x64xbf16>
    %1 = arith.extf %0 : vector<32x2x64xbf16> to vector<32x2x64xf32>
    %cst = arith.constant dense<0.000000e+00> : vector<32x2xf32>
    %2 = vector.multi_reduction <add>, %1, %cst [2] : vector<32x2x64xf32> to vector<32x2xf32>
    %cst_2 = arith.constant 1.562500e-02 : f32
    %3 = vector.broadcast %cst_2 : f32 to vector<32x2xf32>
    %4 = arith.mulf %2, %3 : vector<32x2xf32>
    %c0_3 = arith.constant 0 : index
    %c0_4 = arith.constant 0 : index
    %5 = vector.load %arg2[%c0_3, %c0_4] : memref<10x32xf32, #tpu.memory_space<vmem>>, vector<10x32xf32>
    %cst_5 = arith.constant dense<0.000000e+00> : vector<10x2xf32>
    %6 = tpu.matmul %5, %4, %cst_5 {dimension_numbers = #tpu.dot_dimension_numbers<[1], [0], [0], [1], [0, 0, 1, 1], [], []>} : vector<10x32xf32>, vector<32x2xf32>, vector<10x2xf32> -> vector<10x2xf32>
    %c0_6 = arith.constant 0 : index
    %c0_7 = arith.constant 0 : index
    %7 = vector.load %arg3[%c0_6, %c0_7] : memref<10x1xf32, #tpu.memory_space<vmem>>, vector<10x1xf32>
    %8 = vector.broadcast %7 : vector<10x1xf32> to vector<10x2xf32>
    %9 = arith.addf %6, %8 : vector<10x2xf32>
    %c0_8 = arith.constant 0 : index
    %c0_9 = arith.constant 0 : index
    %10 = vector.load %arg4[%c0_8, %c0_9] : memref<10x2xf32, #tpu.memory_space<vmem>>, vector<10x2xf32>
    tpu.vector_store %arg4[%c0_8, %c0_9], %9 {strides = array<i32>} : memref<10x2xf32, #tpu.memory_space<vmem>>, vector<10x2xf32>,
    return
  }
  func.func @transform_0(%arg0: i32) -> (i32, i32, i32) {
    %c0_i32 = arith.constant 0 : i32
    %c0_i32_0 = arith.constant 0 : i32
    %c0_i32_1 = arith.constant 0 : i32
    %c0_i32_2 = arith.constant 0 : i32
    return %c0_i32, %c0_i32_0, %c0_i32_1 : i32, i32, i32
  }
  func.func @transform_1(%arg0: i32) -> (i32, i32) {
    %c0_i32 = arith.constant 0 : i32
    %c0_i32_0 = arith.constant 0 : i32
    %c0_i32_1 = arith.constant 0 : i32
    return %c0_i32, %c0_i32_0 : i32, i32
  }
  func.func @transform_2(%arg0: i32) -> (i32, i32) {
    %c0_i32 = arith.constant 0 : i32
    %c0_i32_0 = arith.constant 0 : i32
    %c0_i32_1 = arith.constant 0 : i32
    return %c0_i32, %c0_i32_0 : i32, i32
  }
  func.func @transform_3(%arg0: i32) -> (i32, i32) {
    %c0_i32 = arith.constant 0 : i32
    %c0_i32_0 = arith.constant 0 : i32
    %c0_i32_1 = arith.constant 0 : i32
    return %c0_i32, %c0_i32_0 : i32, i32
  }
}

</mosaic_0001>

<bundles_post_ra>
// kernel: _lambda_.10
= control target key start
LH: loop header
LB: loop body
LE: loop exit
PB: predicated region body
PF: predicated region fallthrough
CT: control target
= control target key end

     0   :  { %s852_s18 = smov 0   ;;  %s854_s19 = smov 0   ;;  %s1002_s0 = inlined_call_operand.vmem [shape: bf16[8,27], index: 0, kind: input, shape index: {}]   ;;  %s1003_s1 = inlined_call_operand.vmem [shape: bf16[27,2048], index: 1, kind: input, shape index: {}]   ;;  %s1004_s2 = inlined_call_operand.vmem [shape: f32[8,1], index: 2, kind: input, shape index: {}]   ;;  %s1005_s3 = inlined_call_operand.vmem [shape: f32[8,1], index: 3, kind: input, shape index: {}]   ;;  %s1006_s4 = inlined_call_operand.vmem [shape: f32[8,2048], index: 4, kind: output, shape index: {0}]   ;;  %s1007_s5 = inlined_call_operand.vmem [shape: bf16[8,2048], index: 5, kind: output, shape index: {1}]  }
   0x1   :  { %s856_s20 = smov 0  }
   0x2 LB: > { %s665_s21 = sadd.s32 4294967295, %s818_s20   ;;  %s869_s22 = sadd.s32 1, %s818_s20   ;;  %s818_s20 = sphi %s856_s20, %s1010_s20   ;;  %s814_s19 = sphi %s854_s19, %s1009_s19   ;;  %s810_s18 = sphi %s852_s18, %s1008_s18  }
   0x3   : > { %s41_s23 = ssub.s32 %s818_s20, %s869_s22  ;;  %s44_s24 = sadd.s32 1, %s814_s19 }
   0x4   : > { %p42_p0 = scmp.eq.s32.totalorder %s41_s23, 0  ;;  %p51_p1 = scmp.ne.s32.totalorder %s814_s19, %s810_s18 }
   0x5   : > { %p52_p2 = scmp.eq.s32.totalorder %s818_s20, 0  ;;  %p668_p4 = scmp.ge.s32.totalorder %s818_s20, 2 }
   0x6   : > { %s878_s25 = scalar_select %p42_p0, %s814_s19, %s44_s24  }
   0x7   : > { %p53_p3 = por %p52_p2, %p51_p1  ;;  %180 = sbr.rel (%p668_p4) target bundleno = 32 (0x20), region = 28 }
   0xc   : > { %183 = sbr.rel (!%p53_p3) target bundleno = 32 (0x20), region = 32  ;;  %s185_s26 = sand.u32 (%p53_p3), 1, %s814_s19  }
   0xd   : > { %s752_s27 = sshll.u32 (%p53_p3), %s818_s20, 5  ;;  %s669_s28 = sshll.u32 (%p53_p3), %s185_s26, 7 }
   0xe   : > { %s886_s6 = scalar_lea.vmem (%p53_p3), %s1003_s1, %s752_s27  ;;  %s187_s7 = scalar_lea.vmem (%p53_p3), [#allocation2], %s669_s28 }
   0xf   : > { %v203_v0 = vld [vmem:[%s886_s6] sm:$0xff] (%p53_p3)  ;;  %v205_v1 = vld [vmem:[%s886_s6 + $0x8] sm:$0xff] (%p53_p3)  ;;  %v207_v2 = vld [vmem:[%s886_s6 + $0x10] sm:$0xff] (%p53_p3) }
  0x10   : > { %204 = vst [vmem:[%s187_s7] sm:$0xff] (%p53_p3), %v203_v0  ;;  %v209_v3 = vld [vmem:[%s886_s6 + $0x18] sm:$0xff] (%p53_p3)  ;;  %v211_v4 = vld [vmem:[%s886_s6 + $0x40] sm:$0xff] (%p53_p3)  ;;  %v213_v5 = vld [vmem:[%s886_s6 + $0x48] sm:$0xff] (%p53_p3) }
  0x11   : > { %206 = vst [vmem:[%s187_s7 + $0x8] sm:$0xff] %v205_v1  ;;  %v215_v6 = vld [vmem:[%s886_s6 + $0x50] sm:$0xff]  ;;  %v217_v7 = vld [vmem:[%s886_s6 + $0x58] sm:$0xff]  ;;  %v219_v8 = vld [vmem:[%s886_s6 + $0x80] sm:$0xff] }
  0x12   : > { %208 = vst [vmem:[%s187_s7 + $0x10] sm:$0xff] %v207_v2  ;;  %v221_v9 = vld [vmem:[%s886_s6 + $0x88] sm:$0xff]  ;;  %v223_v10 = vld [vmem:[%s886_s6 + $0x90] sm:$0xff]  ;;  %v225_v11 = vld [vmem:[%s886_s6 + $0x98] sm:$0xff] }
  0x13   : > { %210 = vst [vmem:[%s187_s7 + $0x18] sm:$0xff] %v209_v3  ;;  %v227_v12 = vld [vmem:[%s886_s6 + $0xc0] sm:$0xff]  ;;  %v229_v13 = vld [vmem:[%s886_s6 + $0xc8] sm:$0xff]  ;;  %v231_v14 = vld [vmem:[%s886_s6 + $0xd0] sm:$0xff] }
  0x14   : > { %212 = vst [vmem:[%s187_s7 + $0x20] sm:$0xff] %v211_v4  ;;  %v233_v15 = vld [vmem:[%s886_s6 + $0xd8] sm:$0xff] }
  0x15   : > { %214 = vst [vmem:[%s187_s7 + $0x28] sm:$0xff] %v213_v5 }
  0x16   : > { %216 = vst [vmem:[%s187_s7 + $0x30] sm:$0xff] %v215_v6 }
  0x17   : > { %218 = vst [vmem:[%s187_s7 + $0x38] sm:$0xff] %v217_v7 }
  0x18   : > { %220 = vst [vmem:[%s187_s7 + $0x40] sm:$0xff] %v219_v8 }
  0x19   : > { %222 = vst [vmem:[%s187_s7 + $0x48] sm:$0xff] %v221_v9 }
  0x1a   : > { %224 = vst [vmem:[%s187_s7 + $0x50] sm:$0xff] %v223_v10 }
  0x1b   : > { %226 = vst [vmem:[%s187_s7 + $0x58] sm:$0xff] %v225_v11 }
  0x1c   : > { %228 = vst [vmem:[%s187_s7 + $0x60] sm:$0xff] %v227_v12 }
  0x1d   : > { %230 = vst [vmem:[%s187_s7 + $0x68] sm:$0xff] %v229_v13 }
  0x1e   : > { %232 = vst [vmem:[%s187_s7 + $0x70] sm:$0xff] %v231_v14 }
  0x1f   : > { %234 = vst [vmem:[%s187_s7 + $0x78] sm:$0xff] %v233_v15 }
  0x20 PF: > { %p672_p5 = scmp.ge.s32.totalorder %s818_s20, 1  ;;  %p239_p6 = scmp.lt.s32.totalorder %s818_s20, 3 }
  0x22   : > { %p240_p7 = pnand %p672_p5, %p239_p6 }
  0x23   : > { %s246_s8 = sand.u32 (!%p240_p7), 1, %s810_s18   ;;  %s674_s17 = sshll.u32 (!%p240_p7), %s665_s21, 3 }
  0x24   : > { %243 = sbr.rel (%p240_p7) target bundleno = 214 (0xd6), region = 55  ;;  %s673_s9 = sshll.u32 (!%p240_p7), %s246_s8, 7 }
  0x25   : > { %s912_s12 = scalar_lea.vmem (!%p240_p7), [#allocation2], %s673_s9  ;;  %p280_p8 = scmp.lt.s32.totalorder (!%p240_p7), %s674_s17, 15 }
  0x29   : > { %vm385_vm0 = vcmask 1044480   ;;  %vm386_vm1 = vcmask 1045504   ;;  %v820_v16 = vmov 65535   ;;  %v525_v18 = vld [vmem:[%s1004_s2] sm:$0xff]  ;;  %v821_v20 = vmov 0   ;;  %s1012_s17 = smov (!%p280_p8, %s674_s17), 15 }
  0x2a   : > { %v387_v17 = vsel %vm385_vm0, 4294967295, %v820_v16  ;;  %795 = vset.pattern.permute.xlu0 %v821_v20  ;;  %v712_v21 = vld [vmem:[%s912_s12 + $0x40] sm:$0xf]  ;;  %v761_v23 = vld [vmem:[%s912_s12 + $0x44] sm:$0xf]  ;;  %vm381_vm2 = vcmask 220160  }
  0x2b   : > { %v910_v19 = vsel %vm386_vm1, %v387_v17, 0  ;;  %v765_v22 = vld [vmem:[%s912_s12 + $0x5c] sm:$0x30]  ;;  %528 = vperm.xlu0 %795, %v525_v18   ;;  %v714_v25 = vld [vmem:[%s912_s12 + $0x60] sm:$0x30]  ;;  %s675_s18 = sshll.u32 %s1012_s17, 3 }
  0x2c   : > { %v713_v24 = vor.u32 %v765_v22, %v712_v21  ;;  %v720_v26 = vld [vmem:[%s912_s12 + $0x48] sm:$0xf]  ;;  %v717_v28 = vor.u32 %v761_v23, %v714_v25  ;;  %v762_v30 = vld [vmem:[%s912_s12 + $0x4c] sm:$0xf]  ;;  %v680_v32 = vld [vmem:[%s912_s12] sm:$0xf]  ;;  %s973_s26 = scalar_lea.vmem %s1006_s4, %s675_s18 }
  0x2d   : > { %v766_v27 = vld [vmem:[%s912_s12 + $0x64] sm:$0x30]  ;;  %v722_v31 = vld [vmem:[%s912_s12 + $0x68] sm:$0x30]  ;;  %v757_v35 = vld [vmem:[%s912_s12 + $0x1c] sm:$0xf0] }
  0x2e   : > { %v721_v29 = vor.u32 %v766_v27, %v720_v26  ;;  %v390_v33 = vand.u32 %v713_v24, %v910_v19  ;;  %v725_v34 = vor.u32 %v762_v30, %v722_v31  ;;  %v753_v36 = vld [vmem:[%s912_s12 + $0x4] sm:$0xf]  ;;  %v393_v39 = vand.u32 %v717_v28, %v910_v19  ;;  %v688_v41 = vld [vmem:[%s912_s12 + $0x8] sm:$0xf]  ;;  %v754_v43 = vld [vmem:[%s912_s12 + $0xc] sm:$0xf] }
  0x2f   : > { %v682_v37 = vld [vmem:[%s912_s12 + $0x20] sm:$0xf0]  ;;  %v758_v42 = vld [vmem:[%s912_s12 + $0x24] sm:$0xf0]  ;;  %v681_v45 = vor.u32 %v757_v35, %v680_v32  ;;  %v690_v46 = vld [vmem:[%s912_s12 + $0x28] sm:$0xf0] }
  0x30   : > { %v539_v38 = vld [vmem:[%s1005_s3] sm:$0xff]  ;;  %v396_v40 = vand.u32 %v721_v29, %v910_v19  ;;  %419 = vmatpush.bf16.msra.mxu0 %v390_v33  ;;  %v399_v44 = vand.u32 %v725_v34, %v910_v19  ;;  %v736_v47 = vld [vmem:[%s912_s12 + $0x58] sm:$0xf]  ;;  %432 = vmatpush.bf16.msra.mxu1 %v393_v39  ;;  %v685_v49 = vor.u32 %v753_v36, %v682_v37  ;;  %v764_v52 = vld [vmem:[%s912_s12 + $0x5c] sm:$0xf]  ;;  %s677_s20 = sshll.u32 %s1012_s17, 2 }
  0x31   : > { %v768_v48 = vld [vmem:[%s912_s12 + $0x74] sm:$0x30]  ;;  %v689_v50 = vor.u32 %v758_v42, %v688_v41  ;;  %v738_v53 = vld [vmem:[%s912_s12 + $0x78] sm:$0x30]  ;;  %v728_v54 = vld [vmem:[%s912_s12 + $0x50] sm:$0xf]  ;;  %v693_v55 = vor.u32 %v754_v43, %v690_v46  ;;  %s980_s28 = scalar_lea.vmem %s1007_s5, %s677_s20 }
  0x32   : > { %445 = vmatpush.bf16.msra.mxu2 %v396_v40  ;;  %v737_v51 = vor.u32 %v768_v48, %v736_v47  ;;  %458 = vmatpush.bf16.msra.mxu3 %v399_v44  ;;  %v741_v56 = vor.u32 %v764_v52, %v738_v53  ;;  %v767_v57 = vld [vmem:[%s912_s12 + $0x6c] sm:$0x30]  ;;  %v763_v58 = vld [vmem:[%s912_s12 + $0x54] sm:$0xf]  ;;  %v292_v60 = vld [vmem:[%s1002_s0] sm:$0xf] }
  0x33   : > { %v730_v59 = vld [vmem:[%s912_s12 + $0x70] sm:$0x30]  ;;  %v729_v62 = vor.u32 %v767_v57, %v728_v54  ;;  %v704_v0 = vld [vmem:[%s912_s12 + $0x18] sm:$0xf]  ;;  %542 = vperm.xlu0 %795, %v539_v38   ;;  %v756_v3 = vld [vmem:[%s912_s12 + $0x1c] sm:$0xf] }
  0x34   : > { %v408_v61 = vand.u32 %v737_v51, %v910_v19  ;;  %v733_v63 = vor.u32 %v763_v58, %v730_v59  ;;  %v760_v1 = vld [vmem:[%s912_s12 + $0x34] sm:$0xf0]  ;;  %420 = vmatpush.bf16.msra.mxu0 %v681_v45  ;;  %v411_v2 = vand.u32 %v741_v56, %v910_v19  ;;  %v706_v4 = vld [vmem:[%s912_s12 + $0x38] sm:$0xf0]  ;;  %433 = vmatpush.bf16.msra.mxu1 %v685_v49  ;;  %v696_v8 = vld [vmem:[%s912_s12 + $0x10] sm:$0xf] }
  0x35   : > { %v402_v5 = vand.u32 %v729_v62, %v910_v19  ;;  %v705_v7 = vor.u32 %v760_v1, %v704_v0  ;;  %v759_v9 = vld [vmem:[%s912_s12 + $0x2c] sm:$0xf0]  ;;  %v709_v10 = vor.u32 %v756_v3, %v706_v4  ;;  %v755_v11 = vld [vmem:[%s912_s12 + $0x14] sm:$0xf] }
  0x36   : > { %446 = vmatpush.bf16.msra.mxu2 %v689_v50  ;;  %459 = vmatpush.bf16.msra.mxu3 %v693_v55  ;;  %v405_v6 = vand.u32 %v733_v63, %v910_v19  ;;  %v698_v12 = vld [vmem:[%s912_s12 + $0x30] sm:$0xf0]  ;;  %v697_v13 = vor.u32 %v759_v9, %v696_v8 }
  0x37   : > { %742 = vmatmul.msk.bf16.vlgmr.msra.gmra.mxu0 %vm381_vm2, %v292_v60  ;;  %743 = vmatmul.msk.bf16.vlgmr.msra.gmra.mxu1 %vm381_vm2, %v292_v60  ;;  %v701_v14 = vor.u32 %v755_v11, %v698_v12 }
  0x38   : > { %471 = vmatpush.bf16.msrb.mxu0 %v402_v5  ;;  %484 = vmatpush.bf16.msrb.mxu1 %v405_v6 }
  0x39   : > { %744 = vmatmul.msk.bf16.vlgmr.msra.gmra.mxu2 %vm381_vm2, %v292_v60  ;;  %745 = vmatmul.msk.bf16.vlgmr.msra.gmra.mxu3 %vm381_vm2, %v292_v60 }
  0x3a   : > { %497 = vmatpush.bf16.msrb.mxu2 %v408_v61  ;;  %510 = vmatpush.bf16.msrb.mxu3 %v411_v2 }
  0x3c   : > { %472 = vmatpush.bf16.msrb.mxu0 %v697_v13  ;;  %485 = vmatpush.bf16.msrb.mxu1 %v701_v14 }
  0x3e   : > { %498 = vmatpush.bf16.msrb.mxu2 %v705_v7  ;;  %511 = vmatpush.bf16.msrb.mxu3 %v709_v10 }
  0x47   : > { %746 = vmatmul.msk.bf16.vlgmr.msrb.gmra.mxu0 %vm381_vm2, %v292_v60  ;;  %747 = vmatmul.msk.bf16.vlgmr.msrb.gmra.mxu1 %vm381_vm2, %v292_v60 }
  0x49   : > { %748 = vmatmul.msk.bf16.vlgmr.msrb.gmra.mxu2 %vm381_vm2, %v292_v60  ;;  %749 = vmatmul.msk.bf16.vlgmr.msrb.gmra.mxu3 %vm381_vm2, %v292_v60 }
  0x9d   : > { %v529_v15 = vpop.permute.xlu0 %528 }
  0xa5   : > { %v543_v17 = vpop.permute.xlu0 %542 }
  0xb4   : > { %v422_v16 = vpop.f32.mrf.mxu0  ;;  %v435_v19 = vpop.f32.mrf.mxu1 }
  0xb5   : > { %517 = vst [vmem:[%s973_s26] sm:$0xff] %v422_v16  ;;  %v531_v18 = vmul.f32 %v529_v15, %v422_v16  ;;  %v532_v20 = vmul.f32 %v529_v15, %v435_v19 }
  0xb6   : > { %518 = vst [vmem:[%s973_s26 + $0x8] sm:$0xff] %v435_v19 }
  0xb7   : > { %v545_v21 = vadd.f32 %v543_v17, %v531_v18  ;;  %v546_v22 = vadd.f32 %v543_v17, %v532_v20 }
  0xb9   : > { %v553_v23 = vmax.f32 %v545_v21, 0.0  ;;  %v554_v24 = vmax.f32 %v546_v22, 0.0 }
  0xbb   : > { %v561_v28 = vpack.c.bf16 %v554_v24, %v553_v23 }
  0xbc   : > { %v448_v25 = vpop.f32.mrf.mxu2  ;;  %v461_v27 = vpop.f32.mrf.mxu3 }
  0xbd   : > { %519 = vst [vmem:[%s973_s26 + $0x10] sm:$0xff] %v448_v25  ;;  %v533_v26 = vmul.f32 %v529_v15, %v448_v25  ;;  %v424_v29 = vpop.f32.mrf.mxu0  ;;  %v534_v30 = vmul.f32 %v529_v15, %v461_v27  ;;  %v437_v31 = vpop.f32.mrf.mxu1 }
  0xbe   : > { %520 = vst [vmem:[%s973_s26 + $0x18] sm:$0xff] %v461_v27 }
  0xbf   : > { %v547_v32 = vadd.f32 %v543_v17, %v533_v26  ;;  %565 = vst [vmem:[%s980_s28] sm:$0xff] %v561_v28  ;;  %v548_v33 = vadd.f32 %v543_v17, %v534_v30 }
  0xc1   : > { %v555_v34 = vmax.f32 %v547_v32, 0.0  ;;  %v556_v35 = vmax.f32 %v548_v33, 0.0 }
  0xc3   : > { %v562_v36 = vpack.c.bf16 %v556_v35, %v555_v34 }
  0xc4   : > { %v450_v37 = vpop.f32.mrf.mxu2  ;;  %v463_v38 = vpop.f32.mrf.mxu3 }
  0xc5   : > { %v474_v39 = vpop.f32.mrf.mxu0  ;;  %v487_v41 = vpop.f32.mrf.mxu1  ;;  %566 = vst [vmem:[%s980_s28 + $0x8] sm:$0xff] %v562_v36 }
  0xc6   : > { %521 = vst [vmem:[%s973_s26 + $0x20] sm:$0xff] %v474_v39  ;;  %v535_v40 = vmul.f32 %v529_v15, %v474_v39  ;;  %v536_v42 = vmul.f32 %v529_v15, %v487_v41 }
  0xc7   : > { %522 = vst [vmem:[%s973_s26 + $0x28] sm:$0xff] %v487_v41 }
  0xc8   : > { %v549_v43 = vadd.f32 %v543_v17, %v535_v40  ;;  %v550_v44 = vadd.f32 %v543_v17, %v536_v42 }
  0xca   : > { %v557_v45 = vmax.f32 %v549_v43, 0.0  ;;  %v558_v46 = vmax.f32 %v550_v44, 0.0 }
  0xcc   : > { %v500_v47 = vpop.f32.mrf.mxu2  ;;  %v563_v48 = vpack.c.bf16 %v558_v46, %v557_v45  ;;  %v513_v50 = vpop.f32.mrf.mxu3 }
  0xcd   : > { %523 = vst [vmem:[%s973_s26 + $0x30] sm:$0xff] %v500_v47  ;;  %v537_v49 = vmul.f32 %v529_v15, %v500_v47  ;;  %v476_v51 = vpop.f32.mrf.mxu0  ;;  %v538_v52 = vmul.f32 %v529_v15, %v513_v50  ;;  %v489_v53 = vpop.f32.mrf.mxu1 }
  0xce   : > { %524 = vst [vmem:[%s973_s26 + $0x38] sm:$0xff] %v513_v50 }
  0xcf   : > { %567 = vst [vmem:[%s980_s28 + $0x10] sm:$0xff] %v563_v48  ;;  %v551_v54 = vadd.f32 %v543_v17, %v537_v49  ;;  %v552_v55 = vadd.f32 %v543_v17, %v538_v52 }
  0xd1   : > { %v559_v56 = vmax.f32 %v551_v54, 0.0  ;;  %v560_v57 = vmax.f32 %v552_v55, 0.0 }
  0xd3   : > { %v564_v58 = vpack.c.bf16 %v560_v57, %v559_v56 }
  0xd4   : > { %v502_v59 = vpop.f32.mrf.mxu2  ;;  %v515_v60 = vpop.f32.mrf.mxu3 }
  0xd5   : > { %568 = vst [vmem:[%s980_s28 + $0x18] sm:$0xff] %v564_v58 }
  0xd6 PF: > { %p13_p9 = scmp.ge.s32.totalorder %s869_s22, 4   ;;  %s1008_s18 = smov %s814_s19 }
  0xd7   : > { %s1009_s19 = smov %s878_s25  ;;  %s1010_s20 = smov %s869_s22 }
  0xd8   :  { %15 = sbr.rel (!%p13_p9) target bundleno = 2 (0x2), region = 106 }

// kernel: _lambda_.11
= control target key start
LH: loop header
LB: loop body
LE: loop exit
PB: predicated region body
PF: predicated region fallthrough
CT: control target
= control target key end

     0   :  { %s951_s12 = smov 0   ;;  %s953_s13 = smov 0   ;;  %s1187_s0 = inlined_call_operand.vmem [shape: bf16[8,72], index: 0, kind: input, shape index: {}]   ;;  %s1188_s1 = inlined_call_operand.vmem [shape: bf16[72,2048], index: 1, kind: input, shape index: {}]   ;;  %s1189_s2 = inlined_call_operand.vmem [shape: f32[8,1], index: 2, kind: input, shape index: {}]   ;;  %s1190_s3 = inlined_call_operand.vmem [shape: bf16[8,2048], index: 3, kind: output, shape index: {}]  }
   0x1   :  { %s955_s14 = smov 0  }
   0x2 LB: > { %s698_s15 = sadd.s32 4294967295, %s928_s14   ;;  %s968_s16 = sadd.s32 1, %s928_s14   ;;  %s928_s14 = sphi %s955_s14, %s1193_s14   ;;  %s924_s13 = sphi %s953_s13, %s1192_s13   ;;  %s920_s12 = sphi %s951_s12, %s1191_s12  }
   0x3   : > { %s38_s17 = ssub.s32 %s928_s14, %s968_s16  ;;  %s41_s18 = sadd.s32 1, %s924_s13 }
   0x4   : > { %p39_p0 = scmp.eq.s32.totalorder %s38_s17, 0  ;;  %p48_p1 = scmp.ne.s32.totalorder %s924_s13, %s920_s12 }
   0x5   : > { %p49_p2 = scmp.eq.s32.totalorder %s928_s14, 0  ;;  %p701_p4 = scmp.ge.s32.totalorder %s928_s14, 2 }
   0x6   : > { %s977_s19 = scalar_select %p39_p0, %s924_s13, %s41_s18  }
   0x7   : > { %p50_p3 = por %p49_p2, %p48_p1  ;;  %127 = sbr.rel (%p701_p4) target bundleno = 52 (0x34), region = 24 }
   0xc   : > { %130 = sbr.rel (!%p50_p3) target bundleno = 52 (0x34), region = 28  ;;  %s132_s20 = sand.u32 (%p50_p3), 1, %s924_s13  }
   0xd   : > { %s845_s21 = sshll.u32 (%p50_p3), %s928_s14, 5  ;;  %s878_s22 = smul.u32 (%p50_p3), 288, %s132_s20 }
   0xe   : > { %s985_s25 = scalar_lea.vmem (%p50_p3), %s1188_s1, %s845_s21 }
   0xf   : > { %v150_v0 = vld [vmem:[%s985_s25] sm:$0xff] (%p50_p3)  ;;  %v152_v1 = vld [vmem:[%s985_s25 + $0x8] sm:$0xff] (%p50_p3)  ;;  %v154_v2 = vld [vmem:[%s985_s25 + $0x10] sm:$0xff] (%p50_p3)  ;;  %s990_s26 = scalar_lea.vmem (%p50_p3), [#allocation2], %s878_s22 }
  0x10   : > { %151 = vst [vmem:[%s990_s26] sm:$0xff] (%p50_p3), %v150_v0  ;;  %v156_v3 = vld [vmem:[%s985_s25 + $0x18] sm:$0xff] (%p50_p3)  ;;  %v158_v4 = vld [vmem:[%s985_s25 + $0x40] sm:$0xff] (%p50_p3)  ;;  %v160_v5 = vld [vmem:[%s985_s25 + $0x48] sm:$0xff] (%p50_p3) }
  0x11   : > { %153 = vst [vmem:[%s990_s26 + $0x8] sm:$0xff] %v152_v1  ;;  %v162_v6 = vld [vmem:[%s985_s25 + $0x50] sm:$0xff]  ;;  %v164_v7 = vld [vmem:[%s985_s25 + $0x58] sm:$0xff]  ;;  %v166_v8 = vld [vmem:[%s985_s25 + $0x80] sm:$0xff] }
  0x12   : > { %155 = vst [vmem:[%s990_s26 + $0x10] sm:$0xff] %v154_v2  ;;  %v168_v9 = vld [vmem:[%s985_s25 + $0x88] sm:$0xff]  ;;  %v170_v10 = vld [vmem:[%s985_s25 + $0x90] sm:$0xff]  ;;  %v172_v11 = vld [vmem:[%s985_s25 + $0x98] sm:$0xff] }
  0x13   : > { %157 = vst [vmem:[%s990_s26 + $0x18] sm:$0xff] %v156_v3  ;;  %v174_v12 = vld [vmem:[%s985_s25 + $0xc0] sm:$0xff]  ;;  %v176_v13 = vld [vmem:[%s985_s25 + $0xc8] sm:$0xff]  ;;  %v178_v14 = vld [vmem:[%s985_s25 + $0xd0] sm:$0xff] }
  0x14   : > { %159 = vst [vmem:[%s990_s26 + $0x20] sm:$0xff] %v158_v4  ;;  %v180_v15 = vld [vmem:[%s985_s25 + $0xd8] sm:$0xff]  ;;  %v182_v16 = vld [vmem:[%s985_s25 + $0x100] sm:$0xff]  ;;  %v184_v17 = vld [vmem:[%s985_s25 + $0x108] sm:$0xff] }
  0x15   : > { %161 = vst [vmem:[%s990_s26 + $0x28] sm:$0xff] %v160_v5  ;;  %v186_v18 = vld [vmem:[%s985_s25 + $0x110] sm:$0xff]  ;;  %v188_v19 = vld [vmem:[%s985_s25 + $0x118] sm:$0xff]  ;;  %v190_v20 = vld [vmem:[%s985_s25 + $0x140] sm:$0xff] }
  0x16   : > { %163 = vst [vmem:[%s990_s26 + $0x30] sm:$0xff] %v162_v6  ;;  %v192_v21 = vld [vmem:[%s985_s25 + $0x148] sm:$0xff]  ;;  %v194_v22 = vld [vmem:[%s985_s25 + $0x150] sm:$0xff]  ;;  %v196_v23 = vld [vmem:[%s985_s25 + $0x158] sm:$0xff] }
  0x17   : > { %165 = vst [vmem:[%s990_s26 + $0x38] sm:$0xff] %v164_v7  ;;  %v198_v24 = vld [vmem:[%s985_s25 + $0x180] sm:$0xff]  ;;  %v200_v25 = vld [vmem:[%s985_s25 + $0x188] sm:$0xff]  ;;  %v202_v26 = vld [vmem:[%s985_s25 + $0x190] sm:$0xff] }
  0x18   : > { %167 = vst [vmem:[%s990_s26 + $0x40] sm:$0xff] %v166_v8  ;;  %v204_v27 = vld [vmem:[%s985_s25 + $0x198] sm:$0xff]  ;;  %v206_v28 = vld [vmem:[%s985_s25 + $0x1c0] sm:$0xff]  ;;  %v208_v29 = vld [vmem:[%s985_s25 + $0x1c8] sm:$0xff] }
  0x19   : > { %169 = vst [vmem:[%s990_s26 + $0x48] sm:$0xff] %v168_v9  ;;  %v210_v30 = vld [vmem:[%s985_s25 + $0x1d0] sm:$0xff]  ;;  %v212_v31 = vld [vmem:[%s985_s25 + $0x1d8] sm:$0xff]  ;;  %v214_v32 = vld [vmem:[%s985_s25 + $0x200] sm:$0xff] }
  0x1a   : > { %171 = vst [vmem:[%s990_s26 + $0x50] sm:$0xff] %v170_v10  ;;  %v216_v33 = vld [vmem:[%s985_s25 + $0x208] sm:$0xff]  ;;  %v218_v34 = vld [vmem:[%s985_s25 + $0x210] sm:$0xff]  ;;  %v220_v35 = vld [vmem:[%s985_s25 + $0x218] sm:$0xff] }
  0x1b   : > { %173 = vst [vmem:[%s990_s26 + $0x58] sm:$0xff] %v172_v11 }
  0x1c   : > { %175 = vst [vmem:[%s990_s26 + $0x60] sm:$0xff] %v174_v12 }
  0x1d   : > { %177 = vst [vmem:[%s990_s26 + $0x68] sm:$0xff] %v176_v13 }
  0x1e   : > { %179 = vst [vmem:[%s990_s26 + $0x70] sm:$0xff] %v178_v14 }
  0x1f   : > { %181 = vst [vmem:[%s990_s26 + $0x78] sm:$0xff] %v180_v15 }
  0x20   : > { %183 = vst [vmem:[%s990_s26 + $0x80] sm:$0xff] %v182_v16 }
  0x21   : > { %185 = vst [vmem:[%s990_s26 + $0x88] sm:$0xff] %v184_v17 }
  0x22   : > { %187 = vst [vmem:[%s990_s26 + $0x90] sm:$0xff] %v186_v18 }
  0x23   : > { %189 = vst [vmem:[%s990_s26 + $0x98] sm:$0xff] %v188_v19 }
  0x24   : > { %191 = vst [vmem:[%s990_s26 + $0xa0] sm:$0xff] %v190_v20 }
  0x25   : > { %193 = vst [vmem:[%s990_s26 + $0xa8] sm:$0xff] %v192_v21 }
  0x26   : > { %195 = vst [vmem:[%s990_s26 + $0xb0] sm:$0xff] %v194_v22 }
  0x27   : > { %197 = vst [vmem:[%s990_s26 + $0xb8] sm:$0xff] %v196_v23 }
  0x28   : > { %199 = vst [vmem:[%s990_s26 + $0xc0] sm:$0xff] %v198_v24 }
  0x29   : > { %201 = vst [vmem:[%s990_s26 + $0xc8] sm:$0xff] %v200_v25 }
  0x2a   : > { %203 = vst [vmem:[%s990_s26 + $0xd0] sm:$0xff] %v202_v26 }
  0x2b   : > { %205 = vst [vmem:[%s990_s26 + $0xd8] sm:$0xff] %v204_v27 }
  0x2c   : > { %207 = vst [vmem:[%s990_s26 + $0xe0] sm:$0xff] %v206_v28 }
  0x2d   : > { %209 = vst [vmem:[%s990_s26 + $0xe8] sm:$0xff] %v208_v29 }
  0x2e   : > { %211 = vst [vmem:[%s990_s26 + $0xf0] sm:$0xff] %v210_v30 }
  0x2f   : > { %213 = vst [vmem:[%s990_s26 + $0xf8] sm:$0xff] %v212_v31 }
  0x30   : > { %215 = vst [vmem:[%s990_s26 + $0x100] sm:$0xff] %v214_v32 }
  0x31   : > { %217 = vst [vmem:[%s990_s26 + $0x108] sm:$0xff] %v216_v33 }
  0x32   : > { %219 = vst [vmem:[%s990_s26 + $0x110] sm:$0xff] %v218_v34 }
  0x33   : > { %221 = vst [vmem:[%s990_s26 + $0x118] sm:$0xff] %v220_v35 }
  0x34 PF: > { %p704_p5 = scmp.ge.s32.totalorder %s928_s14, 1  ;;  %p226_p6 = scmp.lt.s32.totalorder %s928_s14, 3 }
  0x36   : > { %p227_p7 = pnand %p704_p5, %p226_p6 }
  0x37   : > { %s233_s27 = sand.u32 (!%p227_p7), 1, %s920_s12   ;;  %s705_s7 = sshll.u32 (!%p227_p7), %s698_s15, 3 }
  0x38   : > { %230 = sbr.rel (%p227_p7) target bundleno = 247 (0xf7), region = 51  ;;  %p258_p8 = scmp.lt.s32.totalorder (!%p227_p7), %s705_s7, 15 }
  0x39   : > { %s879_s28 = smul.u32 (!%p227_p7), 288, %s233_s27 }
  0x3b   : > { %s1064_s29 = scalar_lea.vmem (!%p227_p7), [#allocation2], %s879_s28 }
  0x3d   : > { %v297_v36 = vld [vmem:[%s1064_s29 + $0x100] sm:$0xff]  ;;  %v298_v37 = vld [vmem:[%s1064_s29 + $0x108] sm:$0xff]  ;;  %vm491_vm0 = vcmask 1043456   ;;  %v299_v18 = vld [vmem:[%s1064_s29 + $0x110] sm:$0xff]  ;;  %v930_v22 = vmov 0   ;;  %vm487_vm1 = vcmask 588800  }
  0x3e   : > { %v407_v38 = vunpack.c.l.b16 %v297_v36  ;;  %v408_v39 = vunpack.c.h.b16 %v297_v36  ;;  %v409_v40 = vunpack.c.l.b16 %v298_v37  ;;  %v410_v41 = vunpack.c.h.b16 %v298_v37  ;;  %v805_v42 = vld [vmem:[%s1064_s29 + $0xc0] sm:$0xf]  ;;  %v870_v48 = vld [vmem:[%s1064_s29 + $0xc4] sm:$0xf]  ;;  %v813_v50 = vld [vmem:[%s1064_s29 + $0xc8] sm:$0xf]  ;;  %905 = vset.pattern.permute.xlu0 %v930_v22 }
  0x3f   : > { %v874_v43 = vld [vmem:[%s1064_s29 + $0xdc] sm:$0xf0]  ;;  %v807_v49 = vld [vmem:[%s1064_s29 + $0xe0] sm:$0xf0]  ;;  %v875_v51 = vld [vmem:[%s1064_s29 + $0xe4] sm:$0xf0]  ;;  %v411_v20 = vunpack.c.l.b16 %v299_v18  ;;  %v412_v21 = vunpack.c.h.b16 %v299_v18 }
  0x40   : > { %v447_v44 = vpack.c.b16 %v407_v38, %v407_v38  ;;  %v448_v45 = vpack.c.b16 %v408_v39, %v408_v39  ;;  %v449_v46 = vpack.c.b16 %v409_v40, %v409_v40  ;;  %v450_v47 = vpack.c.b16 %v410_v41, %v410_v41  ;;  %v871_v52 = vld [vmem:[%s1064_s29 + $0xcc] sm:$0xf]  ;;  %v773_v60 = vld [vmem:[%s1064_s29 + $0x80] sm:$0xf]  ;;  %v862_v0 = vld [vmem:[%s1064_s29 + $0x84] sm:$0xf] }
  0x41   : > { %v815_v53 = vld [vmem:[%s1064_s29 + $0xe8] sm:$0xf0]  ;;  %v806_v58 = vor.u32 %v874_v43, %v805_v42  ;;  %v810_v59 = vor.u32 %v870_v48, %v807_v49  ;;  %v866_v61 = vld [vmem:[%s1064_s29 + $0x9c] sm:$0xf0]  ;;  %v814_v62 = vor.u32 %v875_v51, %v813_v50  ;;  %v775_v1 = vld [vmem:[%s1064_s29 + $0xa0] sm:$0xf0]  ;;  %v451_v38 = vpack.c.b16 %v411_v20, %v411_v20 }
  0x42   : > { %v493_v54 = vsel %vm491_vm0, %v447_v44, 0  ;;  %v496_v55 = vsel %vm491_vm0, %v448_v45, 0  ;;  %v499_v56 = vsel %vm491_vm0, %v449_v46, 0  ;;  %v502_v57 = vsel %vm491_vm0, %v450_v47, 0  ;;  %v781_v2 = vld [vmem:[%s1064_s29 + $0x88] sm:$0xf] }
  0x43   : > { %519 = vmatpush.bf16.msra.mxu0 %v493_v54  ;;  %532 = vmatpush.bf16.msra.mxu1 %v496_v55  ;;  %v818_v63 = vor.u32 %v871_v52, %v815_v53  ;;  %v867_v3 = vld [vmem:[%s1064_s29 + $0xa4] sm:$0xf0]  ;;  %v863_v4 = vld [vmem:[%s1064_s29 + $0x8c] sm:$0xf]  ;;  %v741_v6 = vld [vmem:[%s1064_s29 + $0x40] sm:$0xf]  ;;  %v774_v7 = vor.u32 %v866_v61, %v773_v60  ;;  %v778_v8 = vor.u32 %v862_v0, %v775_v1 }
  0x44   : > { %545 = vmatpush.bf16.msra.mxu2 %v499_v56  ;;  %558 = vmatpush.bf16.msra.mxu3 %v502_v57  ;;  %v783_v5 = vld [vmem:[%s1064_s29 + $0xa8] sm:$0xf0]  ;;  %v858_v9 = vld [vmem:[%s1064_s29 + $0x5c] sm:$0xf0]  ;;  %v854_v10 = vld [vmem:[%s1064_s29 + $0x44] sm:$0xf]  ;;  %v782_v12 = vor.u32 %v867_v3, %v781_v2  ;;  %v452_v39 = vpack.c.b16 %v412_v21, %v412_v21 }
  0x45   : > { %v743_v11 = vld [vmem:[%s1064_s29 + $0x60] sm:$0xf0]  ;;  %v786_v13 = vor.u32 %v863_v4, %v783_v5  ;;  %v749_v14 = vld [vmem:[%s1064_s29 + $0x48] sm:$0xf]  ;;  %v855_v16 = vld [vmem:[%s1064_s29 + $0x4c] sm:$0xf]  ;;  %v742_v23 = vor.u32 %v858_v9, %v741_v6 }
  0x46   : > { %v859_v15 = vld [vmem:[%s1064_s29 + $0x64] sm:$0xf0]  ;;  %v751_v17 = vld [vmem:[%s1064_s29 + $0x68] sm:$0xf0]  ;;  %v300_v19 = vld [vmem:[%s1064_s29 + $0x118] sm:$0xff]  ;;  %v746_v24 = vor.u32 %v854_v10, %v743_v11  ;;  %v505_v50 = vsel %vm491_vm0, %v451_v38, 0 }
  0x47   : > { %520 = vmatpush.bf16.msra.mxu0 %v806_v58  ;;  %533 = vmatpush.bf16.msra.mxu1 %v810_v59  ;;  %v709_v25 = vld [vmem:[%s1064_s29] sm:$0xf]  ;;  %v413_v27 = vunpack.c.l.b16 %v300_v19  ;;  %v414_v28 = vunpack.c.h.b16 %v300_v19  ;;  %v750_v29 = vor.u32 %v859_v15, %v749_v14  ;;  %v754_v30 = vor.u32 %v855_v16, %v751_v17  ;;  %v846_v31 = vld [vmem:[%s1064_s29 + $0x4] sm:$0xf]  ;;  %v717_v33 = vld [vmem:[%s1064_s29 + $0x8] sm:$0xf] }
  0x48   : > { %546 = vmatpush.bf16.msra.mxu2 %v814_v62  ;;  %559 = vmatpush.bf16.msra.mxu3 %v818_v63  ;;  %v850_v26 = vld [vmem:[%s1064_s29 + $0x1c] sm:$0xf0]  ;;  %v711_v32 = vld [vmem:[%s1064_s29 + $0x20] sm:$0xf0]  ;;  %v851_v34 = vld [vmem:[%s1064_s29 + $0x24] sm:$0xf0] }
  0x49   : > { %v847_v35 = vld [vmem:[%s1064_s29 + $0xc] sm:$0xf]  ;;  %v710_v37 = vor.u32 %v850_v26, %v709_v25  ;;  %v301_v40 = vld [vmem:[%s1189_s2] sm:$0xff]  ;;  %v714_v41 = vor.u32 %v846_v31, %v711_v32  ;;  %v453_v42 = vpack.c.b16 %v413_v27, %v413_v27  ;;  %v454_v43 = vpack.c.b16 %v414_v28, %v414_v28  ;;  %v821_v46 = vld [vmem:[%s1064_s29 + $0xd0] sm:$0xf]  ;;  %s1195_s7 = smov (!%p258_p8, %s705_s7), 15 }
  0x4a   : > { %v719_v36 = vld [vmem:[%s1064_s29 + $0x28] sm:$0xf0]  ;;  %v718_v44 = vor.u32 %v851_v34, %v717_v33  ;;  %v876_v47 = vld [vmem:[%s1064_s29 + $0xec] sm:$0xf0]  ;;  %v872_v48 = vld [vmem:[%s1064_s29 + $0xd4] sm:$0xf]  ;;  %304 = vperm.xlu0 %905, %v301_v40  }
  0x4b   : > { %521 = vmatpush.bf16.msra.mxu0 %v774_v7  ;;  %534 = vmatpush.bf16.msra.mxu1 %v778_v8  ;;  %v722_v45 = vor.u32 %v847_v35, %v719_v36  ;;  %v823_v49 = vld [vmem:[%s1064_s29 + $0xf0] sm:$0xf0]  ;;  %v508_v51 = vsel %vm491_vm0, %v452_v39, 0  ;;  %v829_v52 = vld [vmem:[%s1064_s29 + $0xd8] sm:$0xf]  ;;  %v511_v54 = vsel %vm491_vm0, %v453_v42, 0  ;;  %v822_v59 = vor.u32 %v876_v47, %v821_v46 }
  0x4c   : > { %547 = vmatpush.bf16.msra.mxu2 %v782_v12  ;;  %560 = vmatpush.bf16.msra.mxu3 %v786_v13  ;;  %v877_v53 = vld [vmem:[%s1064_s29 + $0xf4] sm:$0xf0]  ;;  %v514_v55 = vsel %vm491_vm0, %v454_v43, 0  ;;  %v873_v56 = vld [vmem:[%s1064_s29 + $0xdc] sm:$0xf]  ;;  %v826_v60 = vor.u32 %v872_v48, %v823_v49  ;;  %s706_s8 = sshll.u32 %s1195_s7, 2 }
  0x4d   : > { %v831_v57 = vld [vmem:[%s1064_s29 + $0xf8] sm:$0xf0]  ;;  %v1124_v58 = vld [vmem:[%s1187_s0] sm:$0xf]  ;;  %v789_v61 = vld [vmem:[%s1064_s29 + $0x90] sm:$0xf]  ;;  %v830_v63 = vor.u32 %v877_v53, %v829_v52  ;;  %s1171_s11 = scalar_lea.vmem %s1190_s3, %s706_s8 }
  0x4e   : > { %v868_v62 = vld [vmem:[%s1064_s29 + $0xac] sm:$0xf0]  ;;  %v834_v0 = vor.u32 %v873_v56, %v831_v57  ;;  %v864_v1 = vld [vmem:[%s1064_s29 + $0x94] sm:$0xf]  ;;  %v797_v3 = vld [vmem:[%s1064_s29 + $0x98] sm:$0xf] }
  0x4f   : > { %522 = vmatpush.bf16.msra.mxu0 %v742_v23  ;;  %535 = vmatpush.bf16.msra.mxu1 %v746_v24  ;;  %v791_v2 = vld [vmem:[%s1064_s29 + $0xb0] sm:$0xf0]  ;;  %v869_v4 = vld [vmem:[%s1064_s29 + $0xb4] sm:$0xf0]  ;;  %v865_v5 = vld [vmem:[%s1064_s29 + $0x9c] sm:$0xf]  ;;  %v790_v7 = vor.u32 %v868_v62, %v789_v61 }
  0x50   : > { %548 = vmatpush.bf16.msra.mxu2 %v750_v29  ;;  %561 = vmatpush.bf16.msra.mxu3 %v754_v30  ;;  %v799_v6 = vld [vmem:[%s1064_s29 + $0xb8] sm:$0xf0]  ;;  %v794_v8 = vor.u32 %v864_v1, %v791_v2  ;;  %v757_v9 = vld [vmem:[%s1064_s29 + $0x50] sm:$0xf]  ;;  %v798_v11 = vor.u32 %v869_v4, %v797_v3  ;;  %v856_v13 = vld [vmem:[%s1064_s29 + $0x54] sm:$0xf] }
  0x51   : > { %v860_v10 = vld [vmem:[%s1064_s29 + $0x6c] sm:$0xf0]  ;;  %v802_v12 = vor.u32 %v865_v5, %v799_v6  ;;  %v759_v14 = vld [vmem:[%s1064_s29 + $0x70] sm:$0xf0]  ;;  %v765_v15 = vld [vmem:[%s1064_s29 + $0x58] sm:$0xf] }
  0x52   : > { %v861_v16 = vld [vmem:[%s1064_s29 + $0x74] sm:$0xf0]  ;;  %v857_v17 = vld [vmem:[%s1064_s29 + $0x5c] sm:$0xf]  ;;  %v758_v19 = vor.u32 %v860_v10, %v757_v9  ;;  %v762_v20 = vor.u32 %v856_v13, %v759_v14  ;;  %v725_v21 = vld [vmem:[%s1064_s29 + $0x10] sm:$0xf] }
  0x53   : > { %523 = vmatpush.bf16.msra.mxu0 %v710_v37  ;;  %536 = vmatpush.bf16.msra.mxu1 %v714_v41  ;;  %v767_v18 = vld [vmem:[%s1064_s29 + $0x78] sm:$0xf0]  ;;  %v852_v22 = vld [vmem:[%s1064_s29 + $0x2c] sm:$0xf0]  ;;  %v766_v23 = vor.u32 %v861_v16, %v765_v15  ;;  %v848_v25 = vld [vmem:[%s1064_s29 + $0x14] sm:$0xf] }
  0x54   : > { %549 = vmatpush.bf16.msra.mxu2 %v718_v44  ;;  %562 = vmatpush.bf16.msra.mxu3 %v722_v45  ;;  %v770_v24 = vor.u32 %v857_v17, %v767_v18  ;;  %v727_v26 = vld [vmem:[%s1064_s29 + $0x30] sm:$0xf0]  ;;  %v733_v27 = vld [vmem:[%s1064_s29 + $0x18] sm:$0xf]  ;;  %v849_v29 = vld [vmem:[%s1064_s29 + $0x1c] sm:$0xf]  ;;  %v726_v31 = vor.u32 %v852_v22, %v725_v21 }
  0x55   : > { %v853_v28 = vld [vmem:[%s1064_s29 + $0x34] sm:$0xf0]  ;;  %v735_v30 = vld [vmem:[%s1064_s29 + $0x38] sm:$0xf0]  ;;  %v730_v32 = vor.u32 %v848_v25, %v727_v26 }
  0x56   : > { %835 = vmatmul.msk.bf16.vlgmr.msra.gmra.mxu0 %vm487_vm1, %v1124_v58  ;;  %836 = vmatmul.msk.bf16.vlgmr.msra.gmra.mxu1 %vm487_vm1, %v1124_v58  ;;  %v734_v33 = vor.u32 %v853_v28, %v733_v27  ;;  %v738_v34 = vor.u32 %v849_v29, %v735_v30 }
  0x57   : > { %571 = vmatpush.bf16.msrb.mxu0 %v505_v50  ;;  %584 = vmatpush.bf16.msrb.mxu1 %v508_v51 }
  0x58   : > { %597 = vmatpush.bf16.msrb.mxu2 %v511_v54  ;;  %610 = vmatpush.bf16.msrb.mxu3 %v514_v55 }
  0x59   : > { %837 = vmatmul.msk.bf16.vlgmr.msra.gmra.mxu2 %vm487_vm1, %v1124_v58  ;;  %838 = vmatmul.msk.bf16.vlgmr.msra.gmra.mxu3 %vm487_vm1, %v1124_v58 }
  0x5b   : > { %572 = vmatpush.bf16.msrb.mxu0 %v822_v59  ;;  %585 = vmatpush.bf16.msrb.mxu1 %v826_v60 }
  0x5c   : > { %598 = vmatpush.bf16.msrb.mxu2 %v830_v63  ;;  %611 = vmatpush.bf16.msrb.mxu3 %v834_v0 }
  0x5f   : > { %573 = vmatpush.bf16.msrb.mxu0 %v790_v7  ;;  %586 = vmatpush.bf16.msrb.mxu1 %v794_v8 }
  0x60   : > { %599 = vmatpush.bf16.msrb.mxu2 %v798_v11  ;;  %612 = vmatpush.bf16.msrb.mxu3 %v802_v12 }
  0x63   : > { %574 = vmatpush.bf16.msrb.mxu0 %v758_v19  ;;  %587 = vmatpush.bf16.msrb.mxu1 %v762_v20 }
  0x64   : > { %600 = vmatpush.bf16.msrb.mxu2 %v766_v23  ;;  %613 = vmatpush.bf16.msrb.mxu3 %v770_v24 }
  0x67   : > { %575 = vmatpush.bf16.msrb.mxu0 %v726_v31  ;;  %588 = vmatpush.bf16.msrb.mxu1 %v730_v32 }
  0x68   : > { %601 = vmatpush.bf16.msrb.mxu2 %v734_v33  ;;  %614 = vmatpush.bf16.msrb.mxu3 %v738_v34 }
  0x6a   : > { %839 = vmatmul.msk.bf16.vlgmr.msrb.gmra.mxu0 %vm487_vm1, %v1124_v58  ;;  %840 = vmatmul.msk.bf16.vlgmr.msrb.gmra.mxu1 %vm487_vm1, %v1124_v58 }
  0x6b   : > { %841 = vmatmul.msk.bf16.vlgmr.msrb.gmra.mxu2 %vm487_vm1, %v1124_v58  ;;  %842 = vmatmul.msk.bf16.vlgmr.msrb.gmra.mxu3 %vm487_vm1, %v1124_v58 }
  0xbc   : > { %v305_v35 = vpop.permute.xlu0 %304 }
  0xd3   : > { %v525_v36 = vpop.f32.mrf.mxu0  ;;  %v538_v37 = vpop.f32.mrf.mxu1 }
  0xd4   : > { %v526_v38 = vadd.f32 %v525_v36, %v305_v35  ;;  %v539_v39 = vadd.f32 %v538_v37, %v305_v35 }
  0xd6   : > { %v620_v40 = vmax.f32 %v526_v38, 0.0  ;;  %v621_v41 = vmax.f32 %v539_v39, 0.0 }
  0xd8   : > { %v628_v42 = vpack.c.bf16 %v621_v41, %v620_v40 }
  0xda   : > { %632 = vst [vmem:[%s1171_s11] sm:$0xff] %v628_v42 }
  0xdb   : > { %v527_v47 = vpop.f32.mrf.mxu0  ;;  %v540_v48 = vpop.f32.mrf.mxu1 }
  0xdc   : > { %v551_v43 = vpop.f32.mrf.mxu2  ;;  %v564_v44 = vpop.f32.mrf.mxu3 }
  0xdd   : > { %v552_v45 = vadd.f32 %v551_v43, %v305_v35  ;;  %v565_v46 = vadd.f32 %v564_v44, %v305_v35 }
  0xdf   : > { %v622_v49 = vmax.f32 %v552_v45, 0.0  ;;  %v623_v50 = vmax.f32 %v565_v46, 0.0 }
  0xe1   : > { %v629_v51 = vpack.c.bf16 %v623_v50, %v622_v49 }
  0xe3   : > { %633 = vst [vmem:[%s1171_s11 + $0x8] sm:$0xff] %v629_v51 }
  0xe4   : > { %v553_v52 = vpop.f32.mrf.mxu2  ;;  %v566_v53 = vpop.f32.mrf.mxu3 }
  0xe7   : > { %v577_v54 = vpop.f32.mrf.mxu0  ;;  %v590_v55 = vpop.f32.mrf.mxu1 }
  0xe8   : > { %v578_v56 = vadd.f32 %v577_v54, %v305_v35  ;;  %v591_v57 = vadd.f32 %v590_v55, %v305_v35 }
  0xea   : > { %v624_v58 = vmax.f32 %v578_v56, 0.0  ;;  %v625_v59 = vmax.f32 %v591_v57, 0.0 }
  0xec   : > { %v630_v60 = vpack.c.bf16 %v625_v59, %v624_v58 }
  0xee   : > { %634 = vst [vmem:[%s1171_s11 + $0x10] sm:$0xff] %v630_v60  ;;  %v603_v61 = vpop.f32.mrf.mxu2  ;;  %v616_v62 = vpop.f32.mrf.mxu3 }
  0xef   : > { %v604_v63 = vadd.f32 %v603_v61, %v305_v35  ;;  %v617_v0 = vadd.f32 %v616_v62, %v305_v35  ;;  %v579_v1 = vpop.f32.mrf.mxu0  ;;  %v592_v2 = vpop.f32.mrf.mxu1 }
  0xf1   : > { %v626_v3 = vmax.f32 %v604_v63, 0.0  ;;  %v627_v4 = vmax.f32 %v617_v0, 0.0 }
  0xf3   : > { %v631_v5 = vpack.c.bf16 %v627_v4, %v626_v3 }
  0xf5   : > { %635 = vst [vmem:[%s1171_s11 + $0x18] sm:$0xff] %v631_v5 }
  0xf6   : > { %v605_v6 = vpop.f32.mrf.mxu2  ;;  %v618_v7 = vpop.f32.mrf.mxu3 }
  0xf7 PF: > { %p10_p9 = scmp.ge.s32.totalorder %s968_s16, 4   ;;  %s1191_s12 = smov %s924_s13 }
  0xf8   : > { %s1192_s13 = smov %s977_s19  ;;  %s1193_s14 = smov %s968_s16 }
  0xf9   :  { %12 = sbr.rel (!%p10_p9) target bundleno = 2 (0x2), region = 90 }

// kernel: _lambda_.12
= control target key start
LH: loop header
LB: loop body
LE: loop exit
PB: predicated region body
PF: predicated region fallthrough
CT: control target
= control target key end

     0   :  { %12 = vsyncpa [#allocation4], 0  ;;  %s1580_s0 = inlined_call_operand.vmem [shape: bf16[8,72], index: 0, kind: input, shape index: {}]   ;;  %s1581_s1 = inlined_call_operand.vmem [shape: bf16[72,2048], index: 1, kind: input, shape index: {}]   ;;  %s1582_s2 = inlined_call_operand.vmem [shape: f32[8,2048], index: 2, kind: input, shape index: {}]   ;;  %s1583_s3 = inlined_call_operand.vmem [shape: f32[8,1], index: 3, kind: input, shape index: {}]   ;;  %s1584_s4 = inlined_call_operand.vmem [shape: f32[8,1], index: 4, kind: input, shape index: {}]   ;;  %s1585_s5 = inlined_call_operand.hbm [shape: f32[8,2048], index: 5, kind: output, shape index: {0}]   ;;  %s1586_s6 = inlined_call_operand.vmem [shape: bf16[8,2048], index: 6, kind: output, shape index: {1}]  }
   0x1   :  { %14 = vsyncpa [#allocation4 + $0x1], 0  ;;  %s1246_s21 = smov 0   ;;  %s1248_s22 = smov 0  }
   0x2   :  { %s1250_s23 = smov 0   ;;  %s1252_s24 = smov 0  }
   0x3 LB: > { %s1267_s25 = sadd.s32 4294967295, %s1208_s24   ;;  %s917_s26 = sadd.s32 4294967294, %s1208_s24   ;;  %s1208_s24 = sphi %s1252_s24, %s1592_s24   ;;  %s1204_s23 = sphi %s1250_s23, %s1591_s23   ;;  %s1200_s22 = sphi %s1248_s22, %s1590_s22   ;;  %s1196_s21 = sphi %s1246_s21, %s1589_s21  }
   0x4   : > { %s1271_s27 = sadd.s32 1, %s1208_s24   ;;  %s48_s28 = sadd.s32 1, %s1204_s23 }
   0x5   : > { %s45_s29 = ssub.s32 %s1208_s24, %s1271_s27  ;;  %p55_p0 = scmp.ne.s32.totalorder %s1204_s23, %s1200_s22 }
   0x6   : > { %p46_p1 = scmp.eq.s32.totalorder %s45_s29, 0  ;;  %p56_p2 = scmp.eq.s32.totalorder %s1208_s24, 0 }
   0x7   : > { %p153_p3 = scmp.eq.s32.totalorder %s1267_s25, 1  ;;  %p158_p4 = scmp.ne.s32.totalorder %s1200_s22, %s1196_s21 }
   0x8   : > { %s1283_s30 = scalar_select %p46_p1, %s1204_s23, %s48_s28  }
   0x9   : > { %p57_p5 = por %p56_p2, %p55_p0  ;;  %p1285_p6 = por %p153_p3, %p55_p0 }
   0xa   : > { %p159_p7 = scmp.eq.s32.totalorder %s917_s26, 1  ;;  %p919_p9 = scmp.ge.s32.totalorder %s1208_s24, 2 }
   0xc   : > { %p1289_p8 = por %p159_p7, %p158_p4  ;;  %210 = sbr.rel (%p919_p9) target bundleno = 57 (0x39), region = 28 }
  0x11   : > { %213 = sbr.rel (!%p57_p5) target bundleno = 57 (0x39), region = 32  ;;  %s215_s9 = sand.u32 (%p57_p5), 1, %s1204_s23  }
  0x12   : > { %s1069_s10 = sshll.u32 (%p57_p5), %s1208_s24, 5  ;;  %s1103_s11 = smul.u32 (%p57_p5), 288, %s215_s9 }
  0x13   : > { %s1301_s14 = scalar_lea.vmem (%p57_p5), %s1581_s1, %s1069_s10 }
  0x14   : > { %v233_v0 = vld [vmem:[%s1301_s14] sm:$0xff] (%p57_p5)  ;;  %v235_v1 = vld [vmem:[%s1301_s14 + $0x8] sm:$0xff] (%p57_p5)  ;;  %v237_v2 = vld [vmem:[%s1301_s14 + $0x10] sm:$0xff] (%p57_p5)  ;;  %s1306_s15 = scalar_lea.vmem (%p57_p5), [#allocation2], %s1103_s11 }
  0x15   : > { %234 = vst [vmem:[%s1306_s15] sm:$0xff] (%p57_p5), %v233_v0  ;;  %v239_v3 = vld [vmem:[%s1301_s14 + $0x18] sm:$0xff] (%p57_p5)  ;;  %v241_v4 = vld [vmem:[%s1301_s14 + $0x40] sm:$0xff] (%p57_p5)  ;;  %v243_v5 = vld [vmem:[%s1301_s14 + $0x48] sm:$0xff] (%p57_p5) }
  0x16   : > { %236 = vst [vmem:[%s1306_s15 + $0x8] sm:$0xff] %v235_v1  ;;  %v245_v6 = vld [vmem:[%s1301_s14 + $0x50] sm:$0xff]  ;;  %v247_v7 = vld [vmem:[%s1301_s14 + $0x58] sm:$0xff]  ;;  %v249_v8 = vld [vmem:[%s1301_s14 + $0x80] sm:$0xff] }
  0x17   : > { %238 = vst [vmem:[%s1306_s15 + $0x10] sm:$0xff] %v237_v2  ;;  %v251_v9 = vld [vmem:[%s1301_s14 + $0x88] sm:$0xff]  ;;  %v253_v10 = vld [vmem:[%s1301_s14 + $0x90] sm:$0xff]  ;;  %v255_v11 = vld [vmem:[%s1301_s14 + $0x98] sm:$0xff] }
  0x18   : > { %240 = vst [vmem:[%s1306_s15 + $0x18] sm:$0xff] %v239_v3  ;;  %v257_v12 = vld [vmem:[%s1301_s14 + $0xc0] sm:$0xff]  ;;  %v259_v13 = vld [vmem:[%s1301_s14 + $0xc8] sm:$0xff]  ;;  %v261_v14 = vld [vmem:[%s1301_s14 + $0xd0] sm:$0xff] }
  0x19   : > { %242 = vst [vmem:[%s1306_s15 + $0x20] sm:$0xff] %v241_v4  ;;  %v263_v15 = vld [vmem:[%s1301_s14 + $0xd8] sm:$0xff]  ;;  %v265_v16 = vld [vmem:[%s1301_s14 + $0x100] sm:$0xff]  ;;  %v267_v17 = vld [vmem:[%s1301_s14 + $0x108] sm:$0xff] }
  0x1a   : > { %244 = vst [vmem:[%s1306_s15 + $0x28] sm:$0xff] %v243_v5  ;;  %v269_v18 = vld [vmem:[%s1301_s14 + $0x110] sm:$0xff]  ;;  %v271_v19 = vld [vmem:[%s1301_s14 + $0x118] sm:$0xff]  ;;  %v273_v20 = vld [vmem:[%s1301_s14 + $0x140] sm:$0xff] }
  0x1b   : > { %246 = vst [vmem:[%s1306_s15 + $0x30] sm:$0xff] %v245_v6  ;;  %v275_v21 = vld [vmem:[%s1301_s14 + $0x148] sm:$0xff]  ;;  %v277_v22 = vld [vmem:[%s1301_s14 + $0x150] sm:$0xff]  ;;  %v279_v23 = vld [vmem:[%s1301_s14 + $0x158] sm:$0xff] }
  0x1c   : > { %248 = vst [vmem:[%s1306_s15 + $0x38] sm:$0xff] %v247_v7  ;;  %v281_v24 = vld [vmem:[%s1301_s14 + $0x180] sm:$0xff]  ;;  %v283_v25 = vld [vmem:[%s1301_s14 + $0x188] sm:$0xff]  ;;  %v285_v26 = vld [vmem:[%s1301_s14 + $0x190] sm:$0xff] }
  0x1d   : > { %250 = vst [vmem:[%s1306_s15 + $0x40] sm:$0xff] %v249_v8  ;;  %v287_v27 = vld [vmem:[%s1301_s14 + $0x198] sm:$0xff]  ;;  %v289_v28 = vld [vmem:[%s1301_s14 + $0x1c0] sm:$0xff]  ;;  %v291_v29 = vld [vmem:[%s1301_s14 + $0x1c8] sm:$0xff] }
  0x1e   : > { %252 = vst [vmem:[%s1306_s15 + $0x48] sm:$0xff] %v251_v9  ;;  %v293_v30 = vld [vmem:[%s1301_s14 + $0x1d0] sm:$0xff]  ;;  %v295_v31 = vld [vmem:[%s1301_s14 + $0x1d8] sm:$0xff]  ;;  %v297_v32 = vld [vmem:[%s1301_s14 + $0x200] sm:$0xff] }
  0x1f   : > { %254 = vst [vmem:[%s1306_s15 + $0x50] sm:$0xff] %v253_v10  ;;  %v299_v33 = vld [vmem:[%s1301_s14 + $0x208] sm:$0xff]  ;;  %v301_v34 = vld [vmem:[%s1301_s14 + $0x210] sm:$0xff]  ;;  %v303_v35 = vld [vmem:[%s1301_s14 + $0x218] sm:$0xff] }
  0x20   : > { %256 = vst [vmem:[%s1306_s15 + $0x58] sm:$0xff] %v255_v11 }
  0x21   : > { %258 = vst [vmem:[%s1306_s15 + $0x60] sm:$0xff] %v257_v12 }
  0x22   : > { %260 = vst [vmem:[%s1306_s15 + $0x68] sm:$0xff] %v259_v13 }
  0x23   : > { %262 = vst [vmem:[%s1306_s15 + $0x70] sm:$0xff] %v261_v14 }
  0x24   : > { %264 = vst [vmem:[%s1306_s15 + $0x78] sm:$0xff] %v263_v15 }
  0x25   : > { %266 = vst [vmem:[%s1306_s15 + $0x80] sm:$0xff] %v265_v16 }
  0x26   : > { %268 = vst [vmem:[%s1306_s15 + $0x88] sm:$0xff] %v267_v17 }
  0x27   : > { %270 = vst [vmem:[%s1306_s15 + $0x90] sm:$0xff] %v269_v18 }
  0x28   : > { %272 = vst [vmem:[%s1306_s15 + $0x98] sm:$0xff] %v271_v19 }
  0x29   : > { %274 = vst [vmem:[%s1306_s15 + $0xa0] sm:$0xff] %v273_v20 }
  0x2a   : > { %276 = vst [vmem:[%s1306_s15 + $0xa8] sm:$0xff] %v275_v21 }
  0x2b   : > { %278 = vst [vmem:[%s1306_s15 + $0xb0] sm:$0xff] %v277_v22 }
  0x2c   : > { %280 = vst [vmem:[%s1306_s15 + $0xb8] sm:$0xff] %v279_v23 }
  0x2d   : > { %282 = vst [vmem:[%s1306_s15 + $0xc0] sm:$0xff] %v281_v24 }
  0x2e   : > { %284 = vst [vmem:[%s1306_s15 + $0xc8] sm:$0xff] %v283_v25 }
  0x2f   : > { %286 = vst [vmem:[%s1306_s15 + $0xd0] sm:$0xff] %v285_v26 }
  0x30   : > { %288 = vst [vmem:[%s1306_s15 + $0xd8] sm:$0xff] %v287_v27 }
  0x31   : > { %290 = vst [vmem:[%s1306_s15 + $0xe0] sm:$0xff] %v289_v28 }
  0x32   : > { %292 = vst [vmem:[%s1306_s15 + $0xe8] sm:$0xff] %v291_v29 }
  0x33   : > { %294 = vst [vmem:[%s1306_s15 + $0xf0] sm:$0xff] %v293_v30 }
  0x34   : > { %296 = vst [vmem:[%s1306_s15 + $0xf8] sm:$0xff] %v295_v31 }
  0x35   : > { %298 = vst [vmem:[%s1306_s15 + $0x100] sm:$0xff] %v297_v32 }
  0x36   : > { %300 = vst [vmem:[%s1306_s15 + $0x108] sm:$0xff] %v299_v33 }
  0x37   : > { %302 = vst [vmem:[%s1306_s15 + $0x110] sm:$0xff] %v301_v34 }
  0x38   : > { %304 = vst [vmem:[%s1306_s15 + $0x118] sm:$0xff] %v303_v35 }
  0x39 PF: > { %p922_p10 = scmp.ge.s32.totalorder %s1208_s24, 1  ;;  %p318_p11 = scmp.lt.s32.totalorder %s1208_s24, 3 }
  0x3b   : > { %p319_p12 = pnand %p922_p10, %p318_p11 }
  0x3c   : > { %s1380_s16 = sand.u32 (!%p319_p12), 1, %s1200_s22   ;;  %s924_s10 = sshll.u32 (!%p319_p12), %s1267_s25, 3 }
  0x3d   : > { %322 = sbr.rel (%p319_p12) target bundleno = 255 (0xff), region = 59  ;;  %p366_p13 = scmp.lt.s32.totalorder (!%p319_p12), %s924_s10, 15 }
  0x3e   : > { %s1104_s17 = smul.u32 (!%p319_p12), 288, %s1380_s16  ;;  %s923_s15 = sshll.u32 (!%p319_p12), %s1380_s16, 6 }
  0x3f   : > { %s1102_s28 = sshll.u32 (!%p319_p12), %s1267_s25, 6  ;;  %s790_s12 = scalar_lea.sflag (!%p319_p12), [#allocation4], %s1380_s16 }
  0x40   : > { %s1383_s18 = scalar_lea.vmem (!%p319_p12), [#allocation2], %s1104_s17  ;;  %s1504_s17 = scalar_lea.vmem (!%p319_p12), [#allocation3], %s923_s15 }
  0x41   : > { %s808_s25 = sshll.u32 (!%p319_p12), %s1504_s17, 4  ;;  %s1166_s19 = scalar_lea.hbm (!%p319_p12), %s1585_s5, 128  ;;  %s809_s25 = int_to_ptr.vmem [resolvable:$true] %s808_s25 }
  0x42   : > { %v412_v36 = vld [vmem:[%s1383_s18 + $0x100] sm:$0xff]  ;;  %v413_v37 = vld [vmem:[%s1383_s18 + $0x108] sm:$0xff]  ;;  %vm608_vm0 = vcmask 1043456   ;;  %v414_v18 = vld [vmem:[%s1383_s18 + $0x110] sm:$0xff]  ;;  %v1210_v22 = vmov 0   ;;  %vm604_vm1 = vcmask 588800  }
  0x43   : > { %v524_v38 = vunpack.c.l.b16 %v412_v36  ;;  %v525_v39 = vunpack.c.h.b16 %v412_v36  ;;  %v526_v40 = vunpack.c.l.b16 %v413_v37  ;;  %v527_v41 = vunpack.c.h.b16 %v413_v37  ;;  %v1026_v42 = vld [vmem:[%s1383_s18 + $0xc0] sm:$0xf]  ;;  %v1094_v48 = vld [vmem:[%s1383_s18 + $0xc4] sm:$0xf]  ;;  %v1034_v50 = vld [vmem:[%s1383_s18 + $0xc8] sm:$0xf]  ;;  %1145 = vset.pattern.permute.xlu0 %v1210_v22 }
  0x44   : > { %v1098_v43 = vld [vmem:[%s1383_s18 + $0xdc] sm:$0xf0]  ;;  %v1028_v49 = vld [vmem:[%s1383_s18 + $0xe0] sm:$0xf0]  ;;  %v1099_v51 = vld [vmem:[%s1383_s18 + $0xe4] sm:$0xf0]  ;;  %v528_v20 = vunpack.c.l.b16 %v414_v18  ;;  %v529_v21 = vunpack.c.h.b16 %v414_v18 }
  0x45   : > { %v564_v44 = vpack.c.b16 %v524_v38, %v524_v38  ;;  %v565_v45 = vpack.c.b16 %v525_v39, %v525_v39  ;;  %v566_v46 = vpack.c.b16 %v526_v40, %v526_v40  ;;  %v567_v47 = vpack.c.b16 %v527_v41, %v527_v41  ;;  %v1095_v52 = vld [vmem:[%s1383_s18 + $0xcc] sm:$0xf]  ;;  %v994_v60 = vld [vmem:[%s1383_s18 + $0x80] sm:$0xf]  ;;  %v1086_v0 = vld [vmem:[%s1383_s18 + $0x84] sm:$0xf] }
  0x46   : > { %v1036_v53 = vld [vmem:[%s1383_s18 + $0xe8] sm:$0xf0]  ;;  %v1027_v58 = vor.u32 %v1098_v43, %v1026_v42  ;;  %v1031_v59 = vor.u32 %v1094_v48, %v1028_v49  ;;  %v1090_v61 = vld [vmem:[%s1383_s18 + $0x9c] sm:$0xf0]  ;;  %v1035_v62 = vor.u32 %v1099_v51, %v1034_v50  ;;  %v996_v1 = vld [vmem:[%s1383_s18 + $0xa0] sm:$0xf0]  ;;  %v568_v38 = vpack.c.b16 %v528_v20, %v528_v20 }
  0x47   : > { %v610_v54 = vsel %vm608_vm0, %v564_v44, 0  ;;  %v613_v55 = vsel %vm608_vm0, %v565_v45, 0  ;;  %v616_v56 = vsel %vm608_vm0, %v566_v46, 0  ;;  %v619_v57 = vsel %vm608_vm0, %v567_v47, 0  ;;  %v1002_v2 = vld [vmem:[%s1383_s18 + $0x88] sm:$0xf] }
  0x48   : > { %636 = vmatpush.bf16.msra.mxu0 %v610_v54  ;;  %649 = vmatpush.bf16.msra.mxu1 %v613_v55  ;;  %v1039_v63 = vor.u32 %v1095_v52, %v1036_v53  ;;  %v1091_v3 = vld [vmem:[%s1383_s18 + $0xa4] sm:$0xf0]  ;;  %v1087_v4 = vld [vmem:[%s1383_s18 + $0x8c] sm:$0xf]  ;;  %v962_v6 = vld [vmem:[%s1383_s18 + $0x40] sm:$0xf]  ;;  %v995_v7 = vor.u32 %v1090_v61, %v994_v60  ;;  %v999_v8 = vor.u32 %v1086_v0, %v996_v1 }
  0x49   : > { %662 = vmatpush.bf16.msra.mxu2 %v616_v56  ;;  %675 = vmatpush.bf16.msra.mxu3 %v619_v57  ;;  %v1004_v5 = vld [vmem:[%s1383_s18 + $0xa8] sm:$0xf0]  ;;  %v1082_v9 = vld [vmem:[%s1383_s18 + $0x5c] sm:$0xf0]  ;;  %v1078_v10 = vld [vmem:[%s1383_s18 + $0x44] sm:$0xf]  ;;  %v1003_v12 = vor.u32 %v1091_v3, %v1002_v2  ;;  %v569_v39 = vpack.c.b16 %v529_v21, %v529_v21 }
  0x4a   : > { %v964_v11 = vld [vmem:[%s1383_s18 + $0x60] sm:$0xf0]  ;;  %v1007_v13 = vor.u32 %v1087_v4, %v1004_v5  ;;  %v970_v14 = vld [vmem:[%s1383_s18 + $0x48] sm:$0xf]  ;;  %v1079_v16 = vld [vmem:[%s1383_s18 + $0x4c] sm:$0xf]  ;;  %v963_v23 = vor.u32 %v1082_v9, %v962_v6 }
  0x4b   : > { %v1083_v15 = vld [vmem:[%s1383_s18 + $0x64] sm:$0xf0]  ;;  %v972_v17 = vld [vmem:[%s1383_s18 + $0x68] sm:$0xf0]  ;;  %v415_v19 = vld [vmem:[%s1383_s18 + $0x118] sm:$0xff]  ;;  %v967_v24 = vor.u32 %v1078_v10, %v964_v11  ;;  %v622_v50 = vsel %vm608_vm0, %v568_v38, 0 }
  0x4c   : > { %637 = vmatpush.bf16.msra.mxu0 %v1027_v58  ;;  %650 = vmatpush.bf16.msra.mxu1 %v1031_v59  ;;  %v930_v25 = vld [vmem:[%s1383_s18] sm:$0xf]  ;;  %v530_v27 = vunpack.c.l.b16 %v415_v19  ;;  %v531_v28 = vunpack.c.h.b16 %v415_v19  ;;  %v971_v29 = vor.u32 %v1083_v15, %v970_v14  ;;  %v975_v30 = vor.u32 %v1079_v16, %v972_v17  ;;  %v1070_v31 = vld [vmem:[%s1383_s18 + $0x4] sm:$0xf]  ;;  %v938_v33 = vld [vmem:[%s1383_s18 + $0x8] sm:$0xf] }
  0x4d   : > { %663 = vmatpush.bf16.msra.mxu2 %v1035_v62  ;;  %676 = vmatpush.bf16.msra.mxu3 %v1039_v63  ;;  %v1074_v26 = vld [vmem:[%s1383_s18 + $0x1c] sm:$0xf0]  ;;  %v932_v32 = vld [vmem:[%s1383_s18 + $0x20] sm:$0xf0]  ;;  %v1075_v34 = vld [vmem:[%s1383_s18 + $0x24] sm:$0xf0] }
  0x4e   : > { %v1071_v35 = vld [vmem:[%s1383_s18 + $0xc] sm:$0xf]  ;;  %v931_v37 = vor.u32 %v1074_v26, %v930_v25  ;;  %v745_v40 = vld [vmem:[%s1583_s3] sm:$0xff]  ;;  %v935_v41 = vor.u32 %v1070_v31, %v932_v32  ;;  %v570_v42 = vpack.c.b16 %v530_v27, %v530_v27  ;;  %v571_v43 = vpack.c.b16 %v531_v28, %v531_v28  ;;  %v1042_v46 = vld [vmem:[%s1383_s18 + $0xd0] sm:$0xf]  ;;  %s1594_s10 = smov (!%p366_p13, %s924_s10), 15 }
  0x4f   : > { %v940_v36 = vld [vmem:[%s1383_s18 + $0x28] sm:$0xf0]  ;;  %v939_v44 = vor.u32 %v1075_v34, %v938_v33  ;;  %v1100_v47 = vld [vmem:[%s1383_s18 + $0xec] sm:$0xf0]  ;;  %v1096_v48 = vld [vmem:[%s1383_s18 + $0xd4] sm:$0xf]  ;;  %748 = vperm.xlu0 %1145, %v745_v40  }
  0x50   : > { %638 = vmatpush.bf16.msra.mxu0 %v995_v7  ;;  %651 = vmatpush.bf16.msra.mxu1 %v999_v8  ;;  %v943_v45 = vor.u32 %v1071_v35, %v940_v36  ;;  %v1044_v49 = vld [vmem:[%s1383_s18 + $0xf0] sm:$0xf0]  ;;  %v625_v51 = vsel %vm608_vm0, %v569_v39, 0  ;;  %v1050_v52 = vld [vmem:[%s1383_s18 + $0xd8] sm:$0xf]  ;;  %v628_v54 = vsel %vm608_vm0, %v570_v42, 0  ;;  %v1043_v59 = vor.u32 %v1100_v47, %v1042_v46 }
  0x51   : > { %664 = vmatpush.bf16.msra.mxu2 %v1003_v12  ;;  %677 = vmatpush.bf16.msra.mxu3 %v1007_v13  ;;  %v1101_v53 = vld [vmem:[%s1383_s18 + $0xf4] sm:$0xf0]  ;;  %v631_v55 = vsel %vm608_vm0, %v571_v43, 0  ;;  %v1097_v56 = vld [vmem:[%s1383_s18 + $0xdc] sm:$0xf]  ;;  %v1047_v60 = vor.u32 %v1096_v48, %v1044_v49  ;;  %v759_v7 = vld [vmem:[%s1584_s4] sm:$0xff] }
  0x52   : > { %v1052_v57 = vld [vmem:[%s1383_s18 + $0xf8] sm:$0xf0]  ;;  %v1443_v58 = vld [vmem:[%s1580_s0] sm:$0xf]  ;;  %v1010_v61 = vld [vmem:[%s1383_s18 + $0x90] sm:$0xf]  ;;  %v1051_v63 = vor.u32 %v1101_v53, %v1050_v52 }
  0x53   : > { %v1092_v62 = vld [vmem:[%s1383_s18 + $0xac] sm:$0xf0]  ;;  %v1055_v0 = vor.u32 %v1097_v56, %v1052_v57  ;;  %v1088_v1 = vld [vmem:[%s1383_s18 + $0x94] sm:$0xf]  ;;  %v1018_v3 = vld [vmem:[%s1383_s18 + $0x98] sm:$0xf] }
  0x54   : > { %639 = vmatpush.bf16.msra.mxu0 %v963_v23  ;;  %652 = vmatpush.bf16.msra.mxu1 %v967_v24  ;;  %v1012_v2 = vld [vmem:[%s1383_s18 + $0xb0] sm:$0xf0]  ;;  %v1093_v4 = vld [vmem:[%s1383_s18 + $0xb4] sm:$0xf0]  ;;  %v1089_v5 = vld [vmem:[%s1383_s18 + $0x9c] sm:$0xf]  ;;  %v1011_v8 = vor.u32 %v1092_v62, %v1010_v61 }
  0x55   : > { %665 = vmatpush.bf16.msra.mxu2 %v971_v29  ;;  %678 = vmatpush.bf16.msra.mxu3 %v975_v30  ;;  %v1020_v6 = vld [vmem:[%s1383_s18 + $0xb8] sm:$0xf0]  ;;  %v1015_v9 = vor.u32 %v1088_v1, %v1012_v2  ;;  %v978_v10 = vld [vmem:[%s1383_s18 + $0x50] sm:$0xf]  ;;  %v1019_v12 = vor.u32 %v1093_v4, %v1018_v3  ;;  %v1080_v14 = vld [vmem:[%s1383_s18 + $0x54] sm:$0xf] }
  0x56   : > { %v1084_v11 = vld [vmem:[%s1383_s18 + $0x6c] sm:$0xf0]  ;;  %v1023_v13 = vor.u32 %v1089_v5, %v1020_v6  ;;  %v980_v15 = vld [vmem:[%s1383_s18 + $0x70] sm:$0xf0]  ;;  %v986_v16 = vld [vmem:[%s1383_s18 + $0x58] sm:$0xf] }
  0x57   : > { %v1085_v17 = vld [vmem:[%s1383_s18 + $0x74] sm:$0xf0]  ;;  %v1081_v18 = vld [vmem:[%s1383_s18 + $0x5c] sm:$0xf]  ;;  %762 = vperm.xlu0 %1145, %v759_v7   ;;  %v979_v20 = vor.u32 %v1084_v11, %v978_v10  ;;  %v983_v21 = vor.u32 %v1080_v14, %v980_v15  ;;  %v946_v22 = vld [vmem:[%s1383_s18 + $0x10] sm:$0xf] }
  0x58   : > { %640 = vmatpush.bf16.msra.mxu0 %v931_v37  ;;  %653 = vmatpush.bf16.msra.mxu1 %v935_v41  ;;  %v988_v19 = vld [vmem:[%s1383_s18 + $0x78] sm:$0xf0]  ;;  %v1076_v23 = vld [vmem:[%s1383_s18 + $0x2c] sm:$0xf0]  ;;  %v987_v24 = vor.u32 %v1085_v17, %v986_v16  ;;  %v1072_v26 = vld [vmem:[%s1383_s18 + $0x14] sm:$0xf] }
  0x59   : > { %666 = vmatpush.bf16.msra.mxu2 %v939_v44  ;;  %679 = vmatpush.bf16.msra.mxu3 %v943_v45  ;;  %v991_v25 = vor.u32 %v1081_v18, %v988_v19  ;;  %v948_v27 = vld [vmem:[%s1383_s18 + $0x30] sm:$0xf0]  ;;  %v954_v28 = vld [vmem:[%s1383_s18 + $0x18] sm:$0xf]  ;;  %v1073_v30 = vld [vmem:[%s1383_s18 + $0x1c] sm:$0xf]  ;;  %v947_v32 = vor.u32 %v1076_v23, %v946_v22 }
  0x5a   : > { %v1077_v29 = vld [vmem:[%s1383_s18 + $0x34] sm:$0xf0]  ;;  %v956_v31 = vld [vmem:[%s1383_s18 + $0x38] sm:$0xf0]  ;;  %v951_v33 = vor.u32 %v1072_v26, %v948_v27  ;;  %s925_s11 = sshll.u32 %s1594_s10, 3  ;;  %s927_s18 = sshll.u32 %s1594_s10, 2 }
  0x5b   : > { %1056 = vmatmul.msk.bf16.vlgmr.msra.gmra.mxu0 %vm604_vm1, %v1443_v58  ;;  %1057 = vmatmul.msk.bf16.vlgmr.msra.gmra.mxu1 %vm604_vm1, %v1443_v58  ;;  %v955_v34 = vor.u32 %v1077_v29, %v954_v28  ;;  %v959_v35 = vor.u32 %v1073_v30, %v956_v31  ;;  %s1497_s14 = scalar_lea.vmem %s1582_s2, %s925_s11  ;;  %s1518_s26 = scalar_lea.vmem %s1586_s6, %s927_s18 }
  0x5c   : > { %688 = vmatpush.bf16.msrb.mxu0 %v622_v50  ;;  %701 = vmatpush.bf16.msrb.mxu1 %v625_v51  ;;  %v416_v37 = vld [vmem:[%s1497_s14] sm:$0xff]  ;;  %v417_v38 = vld [vmem:[%s1497_s14 + $0x8] sm:$0xff]  ;;  %v418_v46 = vld [vmem:[%s1497_s14 + $0x10] sm:$0xff]  ;;  %s806_s10 = scalar_lea.hbm %s1585_s5, %s1102_s28 }
  0x5d   : > { %714 = vmatpush.bf16.msrb.mxu2 %v628_v54  ;;  %727 = vmatpush.bf16.msrb.mxu3 %v631_v55  ;;  %v419_v47 = vld [vmem:[%s1497_s14 + $0x18] sm:$0xff]  ;;  %v420_v3 = vld [vmem:[%s1497_s14 + $0x20] sm:$0xff]  ;;  %v421_v4 = vld [vmem:[%s1497_s14 + $0x28] sm:$0xff]  ;;  %s810_s11 = sshll.u32 %s806_s10, 4  ;;  %s811_s11 = int_to_ptr.hbm [resolvable:$true] %s810_s11 }
  0x5e   : > { %1058 = vmatmul.msk.bf16.vlgmr.msra.gmra.mxu2 %vm604_vm1, %v1443_v58  ;;  %1059 = vmatmul.msk.bf16.vlgmr.msra.gmra.mxu3 %vm604_vm1, %v1443_v58  ;;  %v422_v14 = vld [vmem:[%s1497_s14 + $0x30] sm:$0xff]  ;;  %v423_v15 = vld [vmem:[%s1497_s14 + $0x38] sm:$0xff]  ;;  %s1160_s13 = sshra.s32 %s811_s11, 4  ;;  %s1161_s13 = int_to_ptr.hbm [resolvable:$true] %s1160_s13 }
  0x5f   : > { %s1162_s14 = scalar_lea.hbm %s1161_s13, 64  ;;  %p1167_p3 = scmp.lt.s32.totalorder %s1161_s13, %s1585_s5 }
  0x60   : > { %689 = vmatpush.bf16.msrb.mxu0 %v1043_v59  ;;  %702 = vmatpush.bf16.msrb.mxu1 %v1047_v60  ;;  %p1163_p0 = scmp.ne.s32.totalorder %s1161_s13, %s1162_s14  ;;  %p1168_p4 = scmp.lt.s32.totalorder %s1166_s19, %s1162_s14 }
  0x61   : > { %715 = vmatpush.bf16.msrb.mxu2 %v1051_v63  ;;  %728 = vmatpush.bf16.msrb.mxu3 %v1055_v0 }
  0x62   : > { %p1164_p1 = pnand %p1163_p0, %p1285_p6  ;;  %p1169_p5 = por %p1168_p4, %p1167_p3 }
  0x64   : > { %690 = vmatpush.bf16.msrb.mxu0 %v1011_v8  ;;  %703 = vmatpush.bf16.msrb.mxu1 %v1015_v9  ;;  %p1165_p2 = pneg %p1164_p1 }
  0x65   : > { %716 = vmatpush.bf16.msrb.mxu2 %v1019_v12  ;;  %729 = vmatpush.bf16.msrb.mxu3 %v1023_v13 }
  0x66   : > { %p1170_p7 = pnand %p1169_p5, %p1165_p2 }
  0x68   : > { %691 = vmatpush.bf16.msrb.mxu0 %v979_v20  ;;  %704 = vmatpush.bf16.msrb.mxu1 %v983_v21 }
  0x69   : > { %717 = vmatpush.bf16.msrb.mxu2 %v987_v24  ;;  %730 = vmatpush.bf16.msrb.mxu3 %v991_v25 }
  0x6c   : > { %692 = vmatpush.bf16.msrb.mxu0 %v947_v32  ;;  %705 = vmatpush.bf16.msrb.mxu1 %v951_v33 }
  0x6d   : > { %718 = vmatpush.bf16.msrb.mxu2 %v955_v34  ;;  %731 = vmatpush.bf16.msrb.mxu3 %v959_v35 }
  0x6f   : > { %1060 = vmatmul.msk.bf16.vlgmr.msrb.gmra.mxu0 %vm604_vm1, %v1443_v58  ;;  %1061 = vmatmul.msk.bf16.vlgmr.msrb.gmra.mxu1 %vm604_vm1, %v1443_v58 }
  0x70   : > { %1062 = vmatmul.msk.bf16.vlgmr.msrb.gmra.mxu2 %vm604_vm1, %v1443_v58  ;;  %1063 = vmatmul.msk.bf16.vlgmr.msrb.gmra.mxu3 %vm604_vm1, %v1443_v58 }
  0xc1   : > { %v1492_v36 = vpop.permute.xlu0 %748 }
  0xc9   : > { %v1502_v43 = vpop.permute.xlu0 %762 }
  0xd8   : > { %v642_v39 = vpop.f32.mrf.mxu0  ;;  %v655_v40 = vpop.f32.mrf.mxu1 }
  0xd9   : > { %v643_v41 = vadd.f32 %v642_v39, %v416_v37  ;;  %v656_v42 = vadd.f32 %v655_v40, %v417_v38 }
  0xdb   : > { %737 = vst [vmem:[%s1504_s17] sm:$0xff] %v643_v41  ;;  %v751_v44 = vmul.f32 %v1492_v36, %v643_v41  ;;  %v752_v45 = vmul.f32 %v1492_v36, %v656_v42 }
  0xdc   : > { %738 = vst [vmem:[%s1504_s17 + $0x8] sm:$0xff] %v656_v42 }
  0xdd   : > { %v765_v48 = vadd.f32 %v1502_v43, %v751_v44  ;;  %v766_v49 = vadd.f32 %v1502_v43, %v752_v45 }
  0xdf   : > { %v773_v52 = vmax.f32 %v765_v48, 0.0  ;;  %v774_v53 = vmax.f32 %v766_v49, 0.0 }
  0xe0   : > { %v644_v56 = vpop.f32.mrf.mxu0  ;;  %v657_v57 = vpop.f32.mrf.mxu1 }
  0xe1   : > { %v668_v50 = vpop.f32.mrf.mxu2  ;;  %v681_v51 = vpop.f32.mrf.mxu3  ;;  %v781_v58 = vpack.c.bf16 %v774_v53, %v773_v52 }
  0xe2   : > { %v669_v54 = vadd.f32 %v668_v50, %v418_v46  ;;  %v682_v55 = vadd.f32 %v681_v51, %v419_v47 }
  0xe3   : > { %785 = vst [vmem:[%s1518_s26] sm:$0xff] %v781_v58 }
  0xe4   : > { %739 = vst [vmem:[%s1504_s17 + $0x10] sm:$0xff] %v669_v54  ;;  %v753_v59 = vmul.f32 %v1492_v36, %v669_v54  ;;  %v754_v60 = vmul.f32 %v1492_v36, %v682_v55 }
  0xe5   : > { %740 = vst [vmem:[%s1504_s17 + $0x18] sm:$0xff] %v682_v55 }
  0xe6   : > { %v767_v61 = vadd.f32 %v1502_v43, %v753_v59  ;;  %v768_v62 = vadd.f32 %v1502_v43, %v754_v60 }
  0xe8   : > { %v775_v63 = vmax.f32 %v767_v61, 0.0  ;;  %v776_v0 = vmax.f32 %v768_v62, 0.0 }
  0xe9   : > { %v670_v1 = vpop.f32.mrf.mxu2  ;;  %v683_v2 = vpop.f32.mrf.mxu3 }
  0xea   : > { %v782_v5 = vpack.c.bf16 %v776_v0, %v775_v63 }
  0xec   : > { %v694_v6 = vpop.f32.mrf.mxu0  ;;  %v707_v7 = vpop.f32.mrf.mxu1  ;;  %786 = vst [vmem:[%s1518_s26 + $0x8] sm:$0xff] %v782_v5 }
  0xed   : > { %v695_v8 = vadd.f32 %v694_v6, %v420_v3  ;;  %v708_v9 = vadd.f32 %v707_v7, %v421_v4 }
  0xef   : > { %741 = vst [vmem:[%s1504_s17 + $0x20] sm:$0xff] %v695_v8  ;;  %v755_v10 = vmul.f32 %v1492_v36, %v695_v8  ;;  %v756_v11 = vmul.f32 %v1492_v36, %v708_v9 }
  0xf0   : > { %742 = vst [vmem:[%s1504_s17 + $0x28] sm:$0xff] %v708_v9 }
  0xf1   : > { %v769_v12 = vadd.f32 %v1502_v43, %v755_v10  ;;  %v770_v13 = vadd.f32 %v1502_v43, %v756_v11 }
  0xf3   : > { %v777_v16 = vmax.f32 %v769_v12, 0.0  ;;  %v778_v17 = vmax.f32 %v770_v13, 0.0  ;;  %v720_v18 = vpop.f32.mrf.mxu2  ;;  %v733_v19 = vpop.f32.mrf.mxu3 }
  0xf4   : > { %v721_v20 = vadd.f32 %v720_v18, %v422_v14  ;;  %v734_v21 = vadd.f32 %v733_v19, %v423_v15  ;;  %v696_v22 = vpop.f32.mrf.mxu0  ;;  %v709_v23 = vpop.f32.mrf.mxu1 }
  0xf5   : > { %v783_v24 = vpack.c.bf16 %v778_v17, %v777_v16 }
  0xf6   : > { %743 = vst [vmem:[%s1504_s17 + $0x30] sm:$0xff] %v721_v20  ;;  %v757_v25 = vmul.f32 %v1492_v36, %v721_v20  ;;  %v758_v26 = vmul.f32 %v1492_v36, %v734_v21 }
  0xf7   : > { %787 = vst [vmem:[%s1518_s26 + $0x10] sm:$0xff] %v783_v24 }
  0xf8   : > { %v771_v27 = vadd.f32 %v1502_v43, %v757_v25  ;;  %744 = vst [vmem:[%s1504_s17 + $0x38] sm:$0xff] %v734_v21  ;;  %v772_v28 = vadd.f32 %v1502_v43, %v758_v26 }
  0xf9   : > { %1173 = shalt.err (!%p1170_p7)
}
  0xfa   : > { %1105 = dma.vmem_to_hbm [thread:$0]  (%p1285_p6), %s809_s25, 1024, %s811_s11, %s790_s12   ;;  %v779_v29 = vmax.f32 %v771_v27, 0.0  ;;  %v780_v30 = vmax.f32 %v772_v28, 0.0 }
  0xfb   : > { %v722_v31 = vpop.f32.mrf.mxu2  ;;  %v735_v32 = vpop.f32.mrf.mxu3 }
  0xfc   : > { %v784_v33 = vpack.c.bf16 %v780_v30, %v779_v29 }
  0xfe   : > { %788 = vst [vmem:[%s1518_s26 + $0x18] sm:$0xff] %v784_v33 }
  0xff PF: > { %s826_s16 = sand.u32 1, %s1196_s21   ;;  %p1108_p10 = pnand %p919_p9, %p1289_p8 }
 0x100   : > { %s827_s17 = scalar_lea.sflag [#allocation4], %s826_s16 }
 0x101   : > { %p1109_p11 = pneg %p1108_p10 }
 0x103   : > { %1191 = dma.done.wait (%p1109_p11), %s827_s17, 1024  }
 0x104   : > { %1193 = vsyncadd (%p1109_p11), %s827_s17, 4294966272  ;;  %p17_p6 = scmp.ge.s32.totalorder %s1271_s27, 4   ;;  %s1589_s21 = smov %s1200_s22 }
 0x105   : > { %s1590_s22 = smov %s1204_s23  ;;  %s1591_s23 = smov %s1283_s30 }
 0x106   : > { %s1592_s24 = smov %s1271_s27  ;;  %19 = sbr.rel (!%p17_p6) target bundleno = 3 (0x3), region = 118 }
 0x10b   :  { %841 = vsyncpa [#allocation4], 1 }
 0x10c   :  { %843 = vsyncpa [#allocation4 + $0x1], 1 }

// kernel: _lambda_.13
= control target key start
LH: loop header
LB: loop body
LE: loop exit
PB: predicated region body
PF: predicated region fallthrough
CT: control target
= control target key end

     0   :  { %s365_s9 = smov 0   ;;  %s367_s10 = smov 0   ;;  %s418_s0 = inlined_call_operand.vmem [shape: bf16[16,8], index: 0, kind: input, shape index: {}]   ;;  %s419_s1 = inlined_call_operand.vmem [shape: bf16[8,512], index: 1, kind: input, shape index: {}]   ;;  %s420_s2 = inlined_call_operand.vmem [shape: f32[16,512], index: 2, kind: output, shape index: {}]  }
   0x1   :  { %s369_s11 = smov 0  }
   0x2 LB: > { %s378_s12 = sadd.s32 4294967295, %s348_s11   ;;  %s380_s13 = sadd.s32 1, %s348_s11   ;;  %s348_s11 = sphi %s369_s11, %s424_s11   ;;  %s344_s10 = sphi %s367_s10, %s423_s10   ;;  %s340_s9 = sphi %s365_s9, %s422_s9  }
   0x3   : > { %s63_s14 = ssub.s32 %s348_s11, %s380_s13  ;;  %s66_s15 = sadd.s32 1, %s344_s10 }
   0x4   : > { %p64_p0 = scmp.eq.s32.totalorder %s63_s14, 0  ;;  %p76_p1 = scmp.ne.s32.totalorder %s344_s10, %s340_s9 }
   0x5   : > { %p77_p2 = scmp.eq.s32.totalorder %s378_s12, 1  ;;  %p285_p3 = scmp.ge.s32.totalorder %s348_s11, 1 }
   0x6   : > { %s388_s16 = scalar_select %p64_p0, %s344_s10, %s66_s15  }
   0x7   : > { %p390_p4 = por %p77_p2, %p76_p1  ;;  %p113_p5 = scmp.lt.s32.totalorder %s348_s11, 3 }
   0x9   : > { %p114_p6 = pnand %p285_p3, %p113_p5 }
   0xa   : > { %s287_s18 = sshll.u32 (!%p114_p6), %s378_s12, 1  ;;  %s131_s25 = sand.u32 (!%p114_p6), 1, %s340_s9  }
   0xb   : > { %117 = sbr.rel (%p114_p6) target bundleno = 172 (0xac), region = 28  ;;  %p135_p7 = scmp.lt.s32.totalorder (!%p114_p6), %s287_s18, 3 }
   0xc   : > { %s286_s26 = sshll.u32 (!%p114_p6), %s131_s25, 5 }
   0xd   : > { %s133_s27 = scalar_lea.vmem (!%p114_p6), [#allocation2], %s286_s26 }
  0x10   : > { %s426_s18 = smov (!%p135_p7, %s287_s18), 3  ;;  %vm159_vm0 = vcmask 1043456   ;;  %v300_v7 = vld [vmem:[%s418_s0] sm:$0xff]  ;;  %vm155_vm1 = vcmask 64512   ;;  %s301_s28 = sshll.u32 (%p390_p4), %s378_s12, 4 }
  0x11   : > { %s288_s19 = sshll.u32 %s426_s18, 2  ;;  %s207_s3 = scalar_lea.vmem (%p390_p4), %s420_s2, %s301_s28 }
  0x12   : > { %s138_s22 = scalar_lea.vmem %s419_s1, %s288_s19 }
  0x13   : > { %v144_v0 = vld [vmem:[%s138_s22] sm:$0xff] }
  0x14   : > { %v151_v1 = vunpack.c.l.b16 %v144_v0  ;;  %v152_v2 = vunpack.c.h.b16 %v144_v0 }
  0x16   : > { %v153_v3 = vpack.c.b16 %v151_v1, %v151_v1  ;;  %v154_v4 = vpack.c.b16 %v152_v2, %v152_v2 }
  0x18   : > { %v161_v5 = vsel %vm159_vm0, %v153_v3, 0  ;;  %v164_v6 = vsel %vm159_vm0, %v154_v4, 0 }
  0x19   : > { %173 = vmatpush.bf16.msra.mxu0 %v161_v5  ;;  %187 = vmatpush.bf16.msra.mxu1 %v164_v6 }
  0x1c   : > { %293 = vmatmul.msk.bf16.vlgmr.msra.gmra.mxu0 %vm155_vm1, %v300_v7  ;;  %294 = vmatmul.msk.bf16.vlgmr.msra.gmra.mxu1 %vm155_vm1, %v300_v7 }
  0x99   : > { %v175_v8 = vpop.f32.mrf.mxu0  ;;  %v189_v9 = vpop.f32.mrf.mxu1 }
  0x9a   : > { %194 = vst [vmem:[%s133_s27] sm:$0xff] %v175_v8 }
  0x9b   : > { %195 = vst [vmem:[%s133_s27 + $0x8] sm:$0xff] %v189_v9 }
  0x9f   : > { %204 = sbr.rel (!%p390_p4) target bundleno = 172 (0xac), region = 32 }
  0xa1   : > { %v177_v10 = vpop.f32.mrf.mxu0  ;;  %v191_v11 = vpop.f32.mrf.mxu1  ;;  %v220_v12 = vld [vmem:[%s133_s27] sm:$0xff] (%p390_p4) }
  0xa2   : > { %196 = vst [vmem:[%s133_s27 + $0x10] sm:$0xff] %v177_v10  ;;  %v222_v13 = vld [vmem:[%s133_s27 + $0x8] sm:$0xff] (%p390_p4) }
  0xa3   : > { %197 = vst [vmem:[%s133_s27 + $0x18] sm:$0xff] %v191_v11 }
  0xa4   : > { %221 = vst [vmem:[%s207_s3] sm:$0xff] %v220_v12 }
  0xa5   : > { %223 = vst [vmem:[%s207_s3 + $0x8] sm:$0xff] %v222_v13 }
  0xa9   : > { %v224_v14 = vld [vmem:[%s133_s27 + $0x10] sm:$0xff] }
  0xaa   : > { %v226_v15 = vld [vmem:[%s133_s27 + $0x18] sm:$0xff]  ;;  %225 = vst [vmem:[%s207_s3 + $0x20] sm:$0xff] %v224_v14 }
  0xab   : > { %227 = vst [vmem:[%s207_s3 + $0x28] sm:$0xff] %v226_v15 }
  0xac PF: > { %p9_p8 = scmp.ge.s32.totalorder %s380_s13, 4   ;;  %s422_s9 = smov %s344_s10 }
  0xad   : > { %s423_s10 = smov %s388_s16  ;;  %s424_s11 = smov %s380_s13 }
  0xae   :  { %11 = sbr.rel (!%p9_p8) target bundleno = 2 (0x2), region = 81 }

// kernel: _lambda_.14
= control target key start
LH: loop header
LB: loop body
LE: loop exit
PB: predicated region body
PF: predicated region fallthrough
CT: control target
= control target key end

     0   :  { %s594_s12 = smov 0   ;;  %s596_s13 = smov 0   ;;  %s686_s0 = inlined_call_operand.vmem [shape: bf16[16,72], index: 0, kind: input, shape index: {}]   ;;  %s687_s1 = inlined_call_operand.vmem [shape: bf16[72,512], index: 1, kind: input, shape index: {}]   ;;  %s688_s2 = inlined_call_operand.vmem [shape: f32[16,1], index: 2, kind: input, shape index: {}]   ;;  %s689_s3 = inlined_call_operand.vmem [shape: bf16[16,512], index: 3, kind: output, shape index: {}]  }
   0x1   :  { %s598_s14 = smov 0  }
   0x2 LB: > { %s459_s15 = sadd.s32 4294967295, %s571_s14   ;;  %s611_s16 = sadd.s32 1, %s571_s14   ;;  %s571_s14 = sphi %s598_s14, %s693_s14   ;;  %s567_s13 = sphi %s596_s13, %s692_s13   ;;  %s563_s12 = sphi %s594_s12, %s691_s12  }
   0x3   : > { %s38_s17 = ssub.s32 %s571_s14, %s611_s16  ;;  %s41_s18 = sadd.s32 1, %s567_s13 }
   0x4   : > { %p39_p0 = scmp.eq.s32.totalorder %s38_s17, 0  ;;  %p48_p1 = scmp.ne.s32.totalorder %s567_s13, %s563_s12 }
   0x5   : > { %p49_p2 = scmp.eq.s32.totalorder %s571_s14, 0  ;;  %p99_p3 = scmp.eq.s32.totalorder %s459_s15, 1 }
   0x6   : > { %s622_s19 = scalar_select %p39_p0, %s567_s13, %s41_s18  }
   0x7   : > { %p50_p4 = por %p49_p2, %p48_p1  ;;  %p624_p5 = por %p99_p3, %p48_p1 }
   0x8   : > { %p462_p6 = scmp.ge.s32.totalorder %s571_s14, 2 }
   0xa   : > { %127 = sbr.rel (%p462_p6) target bundleno = 28 (0x1c), region = 24 }
   0xf   : > { %130 = sbr.rel (!%p50_p4) target bundleno = 28 (0x1c), region = 28  ;;  %s132_s21 = sand.u32 (%p50_p4), 1, %s567_s13  }
  0x10   : > { %s510_s22 = sshll.u32 (%p50_p4), %s571_s14, 3  ;;  %s521_s23 = smul.u32 (%p50_p4), 72, %s132_s21 }
  0x11   : > { %s137_s26 = scalar_lea.vmem (%p50_p4), %s687_s1, %s510_s22 }
  0x12   : > { %v182_v0 = vld [vmem:[%s137_s26] sm:$0xff] (%p50_p4)  ;;  %v184_v1 = vld [vmem:[%s137_s26 + $0x10] sm:$0xff] (%p50_p4)  ;;  %s134_s27 = scalar_lea.vmem (%p50_p4), [#allocation2], %s521_s23 }
  0x13   : > { %v186_v2 = vld [vmem:[%s137_s26 + $0x20] sm:$0xff] (%p50_p4)  ;;  %183 = vst [vmem:[%s134_s27] sm:$0xff] (%p50_p4), %v182_v0  ;;  %v188_v3 = vld [vmem:[%s137_s26 + $0x30] sm:$0xff] (%p50_p4) }
  0x14   : > { %185 = vst [vmem:[%s134_s27 + $0x8] sm:$0xff] %v184_v1  ;;  %v190_v4 = vld [vmem:[%s137_s26 + $0x40] sm:$0xff]  ;;  %v192_v5 = vld [vmem:[%s137_s26 + $0x50] sm:$0xff] }
  0x15   : > { %187 = vst [vmem:[%s134_s27 + $0x10] sm:$0xff] %v186_v2  ;;  %v194_v6 = vld [vmem:[%s137_s26 + $0x60] sm:$0xff]  ;;  %v196_v7 = vld [vmem:[%s137_s26 + $0x70] sm:$0xff] }
  0x16   : > { %189 = vst [vmem:[%s134_s27 + $0x18] sm:$0xff] %v188_v3  ;;  %v198_v8 = vld [vmem:[%s137_s26 + $0x80] sm:$0xff] }
  0x17   : > { %191 = vst [vmem:[%s134_s27 + $0x20] sm:$0xff] %v190_v4 }
  0x18   : > { %193 = vst [vmem:[%s134_s27 + $0x28] sm:$0xff] %v192_v5 }
  0x19   : > { %195 = vst [vmem:[%s134_s27 + $0x30] sm:$0xff] %v194_v6 }
  0x1a   : > { %197 = vst [vmem:[%s134_s27 + $0x38] sm:$0xff] %v196_v7 }
  0x1b   : > { %199 = vst [vmem:[%s134_s27 + $0x40] sm:$0xff] %v198_v8 }
  0x1c PF: > { %p465_p7 = scmp.ge.s32.totalorder %s571_s14, 1  ;;  %p204_p8 = scmp.lt.s32.totalorder %s571_s14, 3 }
  0x1e   : > { %p205_p9 = pnand %p465_p7, %p204_p8 }
  0x1f   : > { %s211_s28 = sand.u32 (!%p205_p9), 1, %s563_s12  }
  0x20   : > { %208 = sbr.rel (%p205_p9) target bundleno = 212 (0xd4), region = 66  ;;  %s466_s10 = sshll.u32 (!%p205_p9), %s211_s28, 4 }
  0x21   : > { %s522_s4 = smul.u32 (!%p205_p9), 72, %s211_s28  ;;  %s232_s11 = scalar_lea.vmem (!%p205_p9), [#allocation3], %s466_s10 }
  0x23   : > { %s642_s5 = scalar_lea.vmem (!%p205_p9), [#allocation2], %s522_s4 }
  0x25   : > { %v247_v9 = vld [vmem:[%s688_s2] sm:$0xff]  ;;  %v573_v10 = vmov 0   ;;  %vm313_vm0 = vcmask 1043456   ;;  %v497_v14 = vld [vmem:[%s642_s5 + $0x30] sm:$0xf]  ;;  %v248_v20 = vld [vmem:[%s688_s2 + $0x8] sm:$0xff] }
  0x26   : > { %548 = vset.pattern.permute.xlu0 %v573_v10  ;;  %v246_v11 = vld [vmem:[%s642_s5 + $0x40] sm:$0xff]  ;;  %v519_v17 = vld [vmem:[%s642_s5 + $0x34] sm:$0xf0]  ;;  %v518_v18 = vld [vmem:[%s642_s5 + $0x34] sm:$0xf]  ;;  %vm309_vm1 = vcmask 588800  }
  0x27   : > { %251 = vperm.xlu0 %548, %v247_v9   ;;  %v289_v12 = vunpack.c.l.b16 %v246_v11  ;;  %v290_v13 = vunpack.c.h.b16 %v246_v11  ;;  %v499_v19 = vld [vmem:[%s642_s5 + $0x38] sm:$0xf0]  ;;  %v498_v23 = vor.u32 %v519_v17, %v497_v14  ;;  %v489_v25 = vld [vmem:[%s642_s5 + $0x20] sm:$0xf]  ;;  %v517_v26 = vld [vmem:[%s642_s5 + $0x24] sm:$0xf0] }
  0x28   : > { %v502_v24 = vor.u32 %v518_v18, %v499_v19  ;;  %v516_v27 = vld [vmem:[%s642_s5 + $0x24] sm:$0xf]  ;;  %v491_v28 = vld [vmem:[%s642_s5 + $0x28] sm:$0xf0]  ;;  %v490_v29 = vor.u32 %v517_v26, %v489_v25  ;;  %v481_v31 = vld [vmem:[%s642_s5 + $0x10] sm:$0xf] }
  0x29   : > { %v299_v15 = vpack.c.b16 %v289_v12, %v289_v12  ;;  %v300_v16 = vpack.c.b16 %v290_v13, %v290_v13  ;;  %v494_v30 = vor.u32 %v516_v27, %v491_v28  ;;  %v515_v32 = vld [vmem:[%s642_s5 + $0x14] sm:$0xf0]  ;;  %v514_v33 = vld [vmem:[%s642_s5 + $0x14] sm:$0xf]  ;;  %v483_v34 = vld [vmem:[%s642_s5 + $0x18] sm:$0xf0] }
  0x2a   : > { %v482_v35 = vor.u32 %v515_v32, %v481_v31  ;;  %v486_v36 = vor.u32 %v514_v33, %v483_v34  ;;  %v473_v37 = vld [vmem:[%s642_s5] sm:$0xf]  ;;  %v513_v38 = vld [vmem:[%s642_s5 + $0x4] sm:$0xf0]  ;;  %v512_v39 = vld [vmem:[%s642_s5 + $0x4] sm:$0xf] }
  0x2b   : > { %v315_v21 = vsel %vm313_vm0, %v299_v15, 0  ;;  %v318_v22 = vsel %vm313_vm0, %v300_v16, 0  ;;  %v475_v40 = vld [vmem:[%s642_s5 + $0x8] sm:$0xf0]  ;;  %v474_v41 = vor.u32 %v513_v38, %v473_v37  ;;  %v511_v43 = vld [vmem:[%s686_s0] sm:$0xff]  ;;  %s520_s12 = sshll.u32 (%p624_p5), %s459_s15, 3 }
  0x2c   : > { %323 = vmatpush.bf16.msra.mxu0 %v315_v21  ;;  %337 = vmatpush.bf16.msra.mxu1 %v318_v22  ;;  %v478_v42 = vor.u32 %v512_v39, %v475_v40  ;;  %s365_s21 = scalar_lea.vmem (%p624_p5), %s689_s3, %s520_s12 }
  0x2f   : > { %256 = vperm.xlu0 %548, %v248_v20  }
  0x30   : > { %324 = vmatpush.bf16.msra.mxu0 %v498_v23  ;;  %338 = vmatpush.bf16.msra.mxu1 %v502_v24 }
  0x34   : > { %325 = vmatpush.bf16.msra.mxu0 %v490_v29  ;;  %339 = vmatpush.bf16.msra.mxu1 %v494_v30 }
  0x38   : > { %326 = vmatpush.bf16.msra.mxu0 %v482_v35  ;;  %340 = vmatpush.bf16.msra.mxu1 %v486_v36 }
  0x3c   : > { %327 = vmatpush.bf16.msra.mxu0 %v474_v41  ;;  %341 = vmatpush.bf16.msra.mxu1 %v478_v42 }
  0x3f   : > { %503 = vmatmul.msk.bf16.vlgmr.msra.gmra.mxu0 %vm309_vm1, %v511_v43  ;;  %504 = vmatmul.msk.bf16.vlgmr.msra.gmra.mxu1 %vm309_vm1, %v511_v43 }
  0x99   : > { %v252_v44 = vpop.permute.xlu0 %251 }
  0xa1   : > { %v257_v52 = vpop.permute.xlu0 %256 }
  0xbc   : > { %v329_v45 = vpop.f32.mrf.mxu0  ;;  %v343_v46 = vpop.f32.mrf.mxu1 }
  0xbd   : > { %v330_v47 = vadd.f32 %v329_v45, %v252_v44  ;;  %v344_v48 = vadd.f32 %v343_v46, %v252_v44 }
  0xbf   : > { %v348_v49 = vmax.f32 %v330_v47, 0.0  ;;  %v349_v50 = vmax.f32 %v344_v48, 0.0 }
  0xc1   : > { %v352_v51 = vpack.c.bf16 %v349_v50, %v348_v49 }
  0xc3   : > { %354 = vst [vmem:[%s232_s11] sm:$0xff] %v352_v51 }
  0xc4   : > { %v331_v53 = vpop.f32.mrf.mxu0  ;;  %v345_v54 = vpop.f32.mrf.mxu1 }
  0xc5   : > { %v332_v55 = vadd.f32 %v331_v53, %v257_v52  ;;  %v346_v56 = vadd.f32 %v345_v54, %v257_v52 }
  0xc7   : > { %v350_v57 = vmax.f32 %v332_v55, 0.0  ;;  %v351_v58 = vmax.f32 %v346_v56, 0.0  ;;  %362 = sbr.rel (!%p624_p5) target bundleno = 212 (0xd4), region = 74 }
  0xc9   : > { %v353_v59 = vpack.c.bf16 %v351_v58, %v350_v57 }
  0xca   : > { %v396_v60 = vld [vmem:[%s232_s11] sm:$0xff] (%p624_p5) }
  0xcb   : > { %355 = vst [vmem:[%s232_s11 + $0x8] sm:$0xff] %v353_v59 }
  0xcc   : > { %397 = vst [vmem:[%s365_s21] sm:$0xff] %v396_v60 }
  0xd2   : > { %v398_v61 = vld [vmem:[%s232_s11 + $0x8] sm:$0xff] }
  0xd3   : > { %399 = vst [vmem:[%s365_s21 + $0x10] sm:$0xff] %v398_v61 }
  0xd4 PF: > { %p10_p10 = scmp.ge.s32.totalorder %s611_s16, 4   ;;  %s691_s12 = smov %s567_s13 }
  0xd5   : > { %s692_s13 = smov %s622_s19  ;;  %s693_s14 = smov %s611_s16 }
  0xd6   :  { %12 = sbr.rel (!%p10_p10) target bundleno = 2 (0x2), region = 143 }

// kernel: _lambda_.15
= control target key start
LH: loop header
LB: loop body
LE: loop exit
PB: predicated region body
PF: predicated region fallthrough
CT: control target
= control target key end

     0   :  { %12 = vsyncpa [#allocation5], 0  ;;  %s1321_s0 = inlined_call_operand.vmem [shape: bf16[16,144], index: 0, kind: input, shape index: {}]   ;;  %s1322_s1 = inlined_call_operand.vmem [shape: bf16[144,512], index: 1, kind: input, shape index: {}]   ;;  %s1323_s2 = inlined_call_operand.vmem [shape: f32[16,512], index: 2, kind: input, shape index: {}]   ;;  %s1324_s3 = inlined_call_operand.vmem [shape: f32[16,1], index: 3, kind: input, shape index: {}]   ;;  %s1325_s4 = inlined_call_operand.vmem [shape: f32[16,1], index: 4, kind: input, shape index: {}]   ;;  %s1326_s5 = inlined_call_operand.hbm [shape: f32[16,512], index: 5, kind: output, shape index: {0}]   ;;  %s1327_s6 = inlined_call_operand.vmem [shape: bf16[16,512], index: 6, kind: output, shape index: {1}]  }
   0x1   :  { %14 = vsyncpa [#allocation5 + $0x1], 0  ;;  %s1092_s21 = smov 0   ;;  %s1094_s22 = smov 0  }
   0x2   :  { %s1096_s23 = smov 0   ;;  %s1098_s24 = smov 0  }
   0x3 LB: > { %s1113_s25 = sadd.s32 4294967295, %s1051_s24   ;;  %s816_s26 = sadd.s32 4294967294, %s1051_s24   ;;  %s1051_s24 = sphi %s1098_s24, %s1334_s24   ;;  %s1047_s23 = sphi %s1096_s23, %s1333_s23   ;;  %s1043_s22 = sphi %s1094_s22, %s1332_s22   ;;  %s1039_s21 = sphi %s1092_s21, %s1331_s21  }
   0x4   : > { %s1117_s27 = sadd.s32 1, %s1051_s24   ;;  %s48_s28 = sadd.s32 1, %s1047_s23 }
   0x5   : > { %s45_s29 = ssub.s32 %s1051_s24, %s1117_s27  ;;  %p55_p0 = scmp.ne.s32.totalorder %s1047_s23, %s1043_s22 }
   0x6   : > { %p46_p1 = scmp.eq.s32.totalorder %s45_s29, 0  ;;  %p56_p2 = scmp.eq.s32.totalorder %s1051_s24, 0 }
   0x7   : > { %p153_p3 = scmp.eq.s32.totalorder %s1113_s25, 1  ;;  %p158_p4 = scmp.ne.s32.totalorder %s1043_s22, %s1039_s21 }
   0x8   : > { %s1129_s30 = scalar_select %p46_p1, %s1047_s23, %s48_s28  }
   0x9   : > { %p1131_p5 = por %p56_p2, %p55_p0  ;;  %p1135_p6 = por %p153_p3, %p55_p0 }
   0xa   : > { %p159_p7 = scmp.eq.s32.totalorder %s816_s26, 1  ;;  %p818_p9 = scmp.ge.s32.totalorder %s1051_s24, 2 }
   0xc   : > { %p1139_p8 = por %p159_p7, %p158_p4  ;;  %210 = sbr.rel (%p818_p9) target bundleno = 47 (0x2f), region = 28 }
  0x11   : > { %213 = sbr.rel (!%p1131_p5) target bundleno = 39 (0x27), region = 32  ;;  %s215_s10 = sand.u32 (%p1131_p5), 1, %s1047_s23  }
  0x12   : > { %s918_s11 = sshll.u32 (%p1131_p5), %s1051_s24, 3  ;;  %s942_s12 = smul.u32 (%p1131_p5), 144, %s215_s10 }
  0x13   : > { %s1153_s15 = scalar_lea.vmem (%p1131_p5), %s1322_s1, %s918_s11 }
  0x14   : > { %v283_v0 = vld [vmem:[%s1153_s15] sm:$0xff] (%p1131_p5)  ;;  %v285_v1 = vld [vmem:[%s1153_s15 + $0x10] sm:$0xff] (%p1131_p5)  ;;  %s1158_s16 = scalar_lea.vmem (%p1131_p5), [#allocation2], %s942_s12 }
  0x15   : > { %v287_v2 = vld [vmem:[%s1153_s15 + $0x20] sm:$0xff] (%p1131_p5)  ;;  %284 = vst [vmem:[%s1158_s16] sm:$0xff] (%p1131_p5), %v283_v0  ;;  %v289_v3 = vld [vmem:[%s1153_s15 + $0x30] sm:$0xff] (%p1131_p5) }
  0x16   : > { %286 = vst [vmem:[%s1158_s16 + $0x8] sm:$0xff] %v285_v1  ;;  %v291_v4 = vld [vmem:[%s1153_s15 + $0x40] sm:$0xff]  ;;  %v293_v5 = vld [vmem:[%s1153_s15 + $0x50] sm:$0xff] }
  0x17   : > { %288 = vst [vmem:[%s1158_s16 + $0x10] sm:$0xff] %v287_v2  ;;  %v295_v6 = vld [vmem:[%s1153_s15 + $0x60] sm:$0xff]  ;;  %v297_v7 = vld [vmem:[%s1153_s15 + $0x70] sm:$0xff] }
  0x18   : > { %290 = vst [vmem:[%s1158_s16 + $0x18] sm:$0xff] %v289_v3  ;;  %v299_v8 = vld [vmem:[%s1153_s15 + $0x80] sm:$0xff]  ;;  %v301_v9 = vld [vmem:[%s1153_s15 + $0x90] sm:$0xff] }
  0x19   : > { %292 = vst [vmem:[%s1158_s16 + $0x20] sm:$0xff] %v291_v4  ;;  %v303_v10 = vld [vmem:[%s1153_s15 + $0xa0] sm:$0xff]  ;;  %v305_v11 = vld [vmem:[%s1153_s15 + $0xb0] sm:$0xff] }
  0x1a   : > { %294 = vst [vmem:[%s1158_s16 + $0x28] sm:$0xff] %v293_v5  ;;  %v307_v12 = vld [vmem:[%s1153_s15 + $0xc0] sm:$0xff]  ;;  %v309_v13 = vld [vmem:[%s1153_s15 + $0xd0] sm:$0xff] }
  0x1b   : > { %296 = vst [vmem:[%s1158_s16 + $0x30] sm:$0xff] %v295_v6  ;;  %v311_v14 = vld [vmem:[%s1153_s15 + $0xe0] sm:$0xff]  ;;  %v313_v15 = vld [vmem:[%s1153_s15 + $0xf0] sm:$0xff] }
  0x1c   : > { %298 = vst [vmem:[%s1158_s16 + $0x38] sm:$0xff] %v297_v7  ;;  %v315_v16 = vld [vmem:[%s1153_s15 + $0x100] sm:$0xff]  ;;  %v317_v17 = vld [vmem:[%s1153_s15 + $0x110] sm:$0xff] }
  0x1d   : > { %300 = vst [vmem:[%s1158_s16 + $0x40] sm:$0xff] %v299_v8 }
  0x1e   : > { %302 = vst [vmem:[%s1158_s16 + $0x48] sm:$0xff] %v301_v9 }
  0x1f   : > { %304 = vst [vmem:[%s1158_s16 + $0x50] sm:$0xff] %v303_v10 }
  0x20   : > { %306 = vst [vmem:[%s1158_s16 + $0x58] sm:$0xff] %v305_v11 }
  0x21   : > { %308 = vst [vmem:[%s1158_s16 + $0x60] sm:$0xff] %v307_v12 }
  0x22   : > { %310 = vst [vmem:[%s1158_s16 + $0x68] sm:$0xff] %v309_v13 }
  0x23   : > { %312 = vst [vmem:[%s1158_s16 + $0x70] sm:$0xff] %v311_v14 }
  0x24   : > { %314 = vst [vmem:[%s1158_s16 + $0x78] sm:$0xff] %v313_v15 }
  0x25   : > { %316 = vst [vmem:[%s1158_s16 + $0x80] sm:$0xff] %v315_v16 }
  0x26   : > { %318 = vst [vmem:[%s1158_s16 + $0x88] sm:$0xff] %v317_v17 }
  0x27 PF: > { %324 = sbr.rel (!%p1131_p5) target bundleno = 47 (0x2f), region = 70  ;;  %s326_s17 = sand.u32 (%p1131_p5), 1, %s1047_s23  }
  0x28   : > { %s919_s18 = sshll.u32 (%p1131_p5), %s1051_s24, 4  ;;  %s821_s19 = sshll.u32 (%p1131_p5), %s326_s17, 5 }
  0x29   : > { %s331_s28 = scalar_lea.vmem (%p1131_p5), %s1323_s2, %s919_s18  ;;  %s328_s29 = scalar_lea.vmem (%p1131_p5), [#allocation3], %s821_s19 }
  0x2a   : > { %v344_v18 = vld [vmem:[%s331_s28] sm:$0xff] (%p1131_p5)  ;;  %v346_v19 = vld [vmem:[%s331_s28 + $0x8] sm:$0xff] (%p1131_p5) }
  0x2b   : > { %v348_v20 = vld [vmem:[%s331_s28 + $0x20] sm:$0xff] (%p1131_p5)  ;;  %345 = vst [vmem:[%s328_s29] sm:$0xff] (%p1131_p5), %v344_v18  ;;  %v350_v21 = vld [vmem:[%s331_s28 + $0x28] sm:$0xff] (%p1131_p5) }
  0x2c   : > { %347 = vst [vmem:[%s328_s29 + $0x8] sm:$0xff] %v346_v19 }
  0x2d   : > { %349 = vst [vmem:[%s328_s29 + $0x10] sm:$0xff] %v348_v20 }
  0x2e   : > { %351 = vst [vmem:[%s328_s29 + $0x18] sm:$0xff] %v350_v21 }
  0x2f PF: > { %p824_p10 = scmp.ge.s32.totalorder %s1051_s24, 1  ;;  %p356_p11 = scmp.lt.s32.totalorder %s1051_s24, 3 }
  0x31   : > { %p357_p12 = pnand %p824_p10, %p356_p11 }
  0x32   : > { %s1203_s7 = sand.u32 (!%p357_p12), 1, %s1043_s22   ;;  %s940_s17 = sshll.u32 (!%p357_p12), %s1113_s25, 4 }
  0x33   : > { %360 = sbr.rel (%p357_p12) target bundleno = 252 (0xfc), region = 93  ;;  %s825_s15 = sshll.u32 (!%p357_p12), %s1203_s7, 5 }
  0x34   : > { %s943_s10 = smul.u32 (!%p357_p12), 144, %s1203_s7  ;;  %s372_s16 = scalar_lea.vmem (!%p357_p12), [#allocation3], %s825_s15 }
  0x35   : > { %s655_s20 = scalar_lea.hbm (!%p357_p12), %s1326_s5, %s940_s17  ;;  %s827_s28 = sshll.u32 (!%p357_p12), %s1203_s7, 4 }
  0x36   : > { %s1206_s11 = scalar_lea.vmem (!%p357_p12), [#allocation2], %s943_s10  ;;  %s658_s29 = sshll.u32 (!%p357_p12), %s655_s20, 4  ;;  %s659_s29 = int_to_ptr.hbm [resolvable:$true] %s658_s29 }
  0x37   : > { %s406_s10 = scalar_lea.vmem (!%p357_p12), [#allocation6], %s827_s28  ;;  %s640_s12 = scalar_lea.sflag (!%p357_p12), [#allocation5], %s1203_s7 }
  0x38   : > { %v894_v22 = vld [vmem:[%s1206_s11 + $0x70] sm:$0xf]  ;;  %v937_v23 = vld [vmem:[%s1206_s11 + $0x74] sm:$0xf0]  ;;  %v936_v24 = vld [vmem:[%s1206_s11 + $0x74] sm:$0xf] }
  0x39   : > { %v895_v25 = vor.u32 %v937_v23, %v894_v22  ;;  %v896_v26 = vld [vmem:[%s1206_s11 + $0x78] sm:$0xf0]  ;;  %v886_v27 = vld [vmem:[%s1206_s11 + $0x60] sm:$0xf]  ;;  %v935_v28 = vld [vmem:[%s1206_s11 + $0x64] sm:$0xf0] }
  0x3a   : > { %v899_v29 = vor.u32 %v936_v24, %v896_v26  ;;  %v934_v30 = vld [vmem:[%s1206_s11 + $0x64] sm:$0xf]  ;;  %v888_v31 = vld [vmem:[%s1206_s11 + $0x68] sm:$0xf0]  ;;  %v887_v32 = vor.u32 %v935_v28, %v886_v27  ;;  %v878_v34 = vld [vmem:[%s1206_s11 + $0x50] sm:$0xf] }
  0x3b   : > { %539 = vmatpush.bf16.msra.mxu0 %v895_v25  ;;  %v891_v33 = vor.u32 %v934_v30, %v888_v31  ;;  %v933_v35 = vld [vmem:[%s1206_s11 + $0x54] sm:$0xf0]  ;;  %v932_v36 = vld [vmem:[%s1206_s11 + $0x54] sm:$0xf]  ;;  %v880_v37 = vld [vmem:[%s1206_s11 + $0x58] sm:$0xf0] }
  0x3c   : > { %567 = vmatpush.bf16.msra.mxu2 %v899_v29  ;;  %v879_v38 = vor.u32 %v933_v35, %v878_v34  ;;  %v870_v39 = vld [vmem:[%s1206_s11 + $0x40] sm:$0xf]  ;;  %v920_v40 = vld [vmem:[%s1321_s0 + $0x4] sm:$0xf]  ;;  %v832_v41 = vld [vmem:[%s1321_s0 + $0x8] sm:$0xf0]  ;;  %v883_v42 = vor.u32 %v932_v36, %v880_v37 }
  0x3d   : > { %v931_v43 = vld [vmem:[%s1206_s11 + $0x44] sm:$0xf0]  ;;  %v938_v44 = vld [vmem:[%s1206_s11 + $0x84] sm:$0xf]  ;;  %v904_v45 = vld [vmem:[%s1206_s11 + $0x88] sm:$0xf0]  ;;  %v835_v49 = vor.u32 %v920_v40, %v832_v41 }
  0x3e   : > { %v930_v46 = vld [vmem:[%s1206_s11 + $0x44] sm:$0xf]  ;;  %v872_v47 = vld [vmem:[%s1206_s11 + $0x48] sm:$0xf0]  ;;  %v907_v48 = vor.u32 %v938_v44, %v904_v45  ;;  %v902_v50 = vld [vmem:[%s1206_s11 + $0x80] sm:$0xf]  ;;  %v871_v51 = vor.u32 %v931_v43, %v870_v39 }
  0x3f   : > { %540 = vmatpush.bf16.msra.mxu0 %v887_v32  ;;  %vm535_vm0 = vcmask 130048   ;;  %v939_v52 = vld [vmem:[%s1206_s11 + $0x84] sm:$0xf0]  ;;  %v875_v53 = vor.u32 %v930_v46, %v872_v47  ;;  %v862_v54 = vld [vmem:[%s1206_s11 + $0x30] sm:$0xf]  ;;  %v1053_v60 = vmov 0  }
  0x40   : > { %568 = vmatpush.bf16.msra.mxu2 %v891_v33  ;;  %588 = vmatpush.bf16.msra.mxu3 %v907_v48  ;;  %v929_v55 = vld [vmem:[%s1206_s11 + $0x34] sm:$0xf0]  ;;  %v903_v56 = vor.u32 %v939_v52, %v902_v50  ;;  %v599_v57 = vld [vmem:[%s1324_s3] sm:$0xff]  ;;  %v864_v59 = vld [vmem:[%s1206_s11 + $0x38] sm:$0xf0]  ;;  %s1003_s13 = sshra.s32 %s659_s29, 4  ;;  %s1004_s13 = int_to_ptr.hbm [resolvable:$true] %s1003_s13 }
  0x41   : > { %v928_v58 = vld [vmem:[%s1206_s11 + $0x34] sm:$0xf]  ;;  %987 = vset.pattern.permute.xlu0 %v1053_v60  ;;  %988 = vset.pattern.permute.xlu1 %v1053_v60  ;;  %v863_v62 = vor.u32 %v929_v55, %v862_v54  ;;  %v854_v0 = vld [vmem:[%s1206_s11 + $0x20] sm:$0xf]  ;;  %v927_v1 = vld [vmem:[%s1206_s11 + $0x24] sm:$0xf0]  ;;  %p1010_p2 = scmp.lt.s32.totalorder %s1004_s13, %s1326_s5 }
  0x42   : > { %v615_v61 = vld [vmem:[%s1325_s4] sm:$0xff]  ;;  %560 = vmatpush.bf16.msra.mxu1 %v903_v56  ;;  %603 = vperm.xlu0 %987, %v599_v57   ;;  %v867_v63 = vor.u32 %v928_v58, %v864_v59  ;;  %v856_v3 = vld [vmem:[%s1206_s11 + $0x28] sm:$0xf0]  ;;  %v855_v4 = vor.u32 %v927_v1, %v854_v0  ;;  %v925_v7 = vld [vmem:[%s1206_s11 + $0x14] sm:$0xf0]  ;;  %s1005_s14 = scalar_lea.hbm %s1004_s13, 32 }
  0x43   : > { %541 = vmatpush.bf16.msra.mxu0 %v879_v38  ;;  %909 = vmatmul.msk.bf16.vlgmr.msra.gmra.mxu3 %vm535_vm0, %v835_v49  ;;  %v926_v2 = vld [vmem:[%s1206_s11 + $0x24] sm:$0xf]  ;;  %v846_v6 = vld [vmem:[%s1206_s11 + $0x10] sm:$0xf]  ;;  %v600_v8 = vld [vmem:[%s1324_s3 + $0x8] sm:$0xff]  ;;  %p1006_p13 = scmp.ne.s32.totalorder %s1004_s13, %s1005_s14  ;;  %s1009_s17 = scalar_lea.hbm %s1326_s5, 64 }
  0x44   : > { %569 = vmatpush.bf16.msra.mxu2 %v883_v42  ;;  %619 = vperm.xlu1 %988, %v615_v61   ;;  %v859_v5 = vor.u32 %v926_v2, %v856_v3  ;;  %v924_v9 = vld [vmem:[%s1206_s11 + $0x14] sm:$0xf]  ;;  %v848_v10 = vld [vmem:[%s1206_s11 + $0x18] sm:$0xf0]  ;;  %v847_v12 = vor.u32 %v925_v7, %v846_v6  ;;  %v838_v14 = vld [vmem:[%s1206_s11] sm:$0xf]  ;;  %p1011_p3 = scmp.lt.s32.totalorder %s1009_s17, %s1005_s14 }
  0x45   : > { %908 = vmatmul.msk.bf16.vlgmr.msra.gmra.mxu1 %vm535_vm0, %v835_v49  ;;  %v616_v11 = vld [vmem:[%s1325_s4 + $0x8] sm:$0xff]  ;;  %v851_v13 = vor.u32 %v924_v9, %v848_v10  ;;  %v922_v16 = vld [vmem:[%s1206_s11 + $0x4] sm:$0xf]  ;;  %v830_v19 = vld [vmem:[%s1321_s0] sm:$0xf]  ;;  %p1007_p0 = pnand %p1006_p13, %p1135_p6 }
  0x46   : > { %v923_v15 = vld [vmem:[%s1206_s11 + $0x4] sm:$0xf0]  ;;  %v840_v17 = vld [vmem:[%s1206_s11 + $0x8] sm:$0xf0]  ;;  %v432_v23 = vld [vmem:[%s372_s16] sm:$0xff]  ;;  %s1271_s11 = scalar_lea.vmem [#allocation4], %s825_s15  ;;  %p1012_p4 = por %p1011_p3, %p1010_p2 }
  0x47   : > { %542 = vmatpush.bf16.msra.mxu0 %v871_v51  ;;  %v839_v18 = vor.u32 %v923_v15, %v838_v14  ;;  %v921_v20 = vld [vmem:[%s1321_s0 + $0x4] sm:$0xf0]  ;;  %v843_v21 = vor.u32 %v922_v16, %v840_v17  ;;  %v434_v31 = vld [vmem:[%s372_s16 + $0x10] sm:$0xff]  ;;  %s656_s26 = sshll.u32 %s1271_s11, 4  ;;  %v435_v43 = vld [vmem:[%s372_s16 + $0x18] sm:$0xff]  ;;  %p1008_p1 = pneg %p1007_p0  ;;  %s1282_s26 = int_to_ptr.vmem [resolvable:$true] %s656_s26 }
  0x48   : > { %570 = vmatpush.bf16.msra.mxu2 %v875_v53  ;;  %v831_v22 = vor.u32 %v921_v20, %v830_v19  ;;  %v433_v29 = vld [vmem:[%s372_s16 + $0x8] sm:$0xff] }
  0x49   : > { %p1013_p5 = pnand %p1012_p4, %p1008_p1 }
  0x4a   : > { %608 = vperm.xlu0 %987, %v600_v8  }
  0x4b   : > { %543 = vmatpush.bf16.msra.mxu0 %v863_v62 }
  0x4c   : > { %571 = vmatpush.bf16.msra.mxu2 %v867_v63  ;;  %624 = vperm.xlu1 %988, %v616_v11  }
  0x4f   : > { %544 = vmatpush.bf16.msra.mxu0 %v855_v4 }
  0x50   : > { %572 = vmatpush.bf16.msra.mxu2 %v859_v5 }
  0x53   : > { %545 = vmatpush.bf16.msra.mxu0 %v847_v12 }
  0x54   : > { %573 = vmatpush.bf16.msra.mxu2 %v851_v13 }
  0x57   : > { %546 = vmatpush.bf16.msra.mxu0 %v839_v18 }
  0x58   : > { %574 = vmatpush.bf16.msra.mxu2 %v843_v21 }
  0x5a   : > { %547 = vmatmul.bf16.vlgmr.msra.gmra.mxu0 %v831_v22 }
  0x5b   : > { %575 = vmatmul.bf16.vlgmr.msra.gmra.mxu2 %v831_v22 }
  0xb4   : > { %v604_v28 = vpop.permute.xlu0 %603 }
  0xb6   : > { %v620_v36 = vpop.permute.xlu1 %619 }
  0xbc   : > { %v609_v46 = vpop.permute.xlu0 %608 }
  0xbe   : > { %v625_v54 = vpop.permute.xlu1 %624 }
  0xc2   : > { %v562_v25 = vpop.f32.mrf.mxu1 }
  0xc6   : > { %v590_v32 = vpop.f32.mrf.mxu3 }
  0xca   : > { %v564_v40 = vpop.f32.mrf.mxu1 }
  0xce   : > { %v592_v51 = vpop.f32.mrf.mxu3 }
  0xd7   : > { %v548_v24 = vpop.f32.mrf.mxu0 }
  0xd8   : > { %v549_v26 = vadd.f32 %v548_v24, %v432_v23 }
  0xda   : > { %v563_v27 = vadd.f32 %v562_v25, %v549_v26 }
  0xdc   : > { %595 = vst [vmem:[%s1271_s11] sm:$0xff] %v563_v27  ;;  %v611_v30 = vmul.f32 %v604_v28, %v563_v27 }
  0xde   : > { %v576_v33 = vpop.f32.mrf.mxu2  ;;  %v627_v38 = vadd.f32 %v620_v36, %v611_v30 }
  0xdf   : > { %v577_v34 = vadd.f32 %v576_v33, %v433_v29  ;;  %v550_v35 = vpop.f32.mrf.mxu0 }
  0xe0   : > { %v551_v37 = vadd.f32 %v550_v35, %v434_v31  ;;  %v631_v44 = vmax.f32 %v627_v38, 0.0 }
  0xe1   : > { %v591_v39 = vadd.f32 %v590_v32, %v577_v34 }
  0xe2   : > { %v565_v41 = vadd.f32 %v564_v40, %v551_v37 }
  0xe3   : > { %596 = vst [vmem:[%s1271_s11 + $0x8] sm:$0xff] %v591_v39  ;;  %v612_v42 = vmul.f32 %v604_v28, %v591_v39 }
  0xe4   : > { %597 = vst [vmem:[%s1271_s11 + $0x10] sm:$0xff] %v565_v41  ;;  %v613_v49 = vmul.f32 %v609_v46, %v565_v41 }
  0xe5   : > { %v628_v45 = vadd.f32 %v620_v36, %v612_v42 }
  0xe6   : > { %v578_v47 = vpop.f32.mrf.mxu2  ;;  %v629_v55 = vadd.f32 %v625_v54, %v613_v49 }
  0xe7   : > { %v632_v48 = vmax.f32 %v628_v45, 0.0  ;;  %v579_v50 = vadd.f32 %v578_v47, %v435_v43 }
  0xe9   : > { %v635_v52 = vpack.c.bf16 %v632_v48, %v631_v44  ;;  %v593_v53 = vadd.f32 %v592_v51, %v579_v50 }
  0xeb   : > { %637 = vst [vmem:[%s406_s10] sm:$0xff] %v635_v52  ;;  %v614_v56 = vmul.f32 %v609_v46, %v593_v53 }
  0xec   : > { %598 = vst [vmem:[%s1271_s11 + $0x18] sm:$0xff] %v593_v53 }
  0xed   : > { %v630_v57 = vadd.f32 %v625_v54, %v614_v56 }
  0xee   : > { %1016 = shalt.err (!%p1013_p5)
}
  0xef   : > { %s1054_s7 = smov 256   ;;  %s1055_s11 = smov 512   ;;  %v633_v58 = vmax.f32 %v629_v55, 0.0  ;;  %v634_v59 = vmax.f32 %v630_v57, 0.0 }
  0xf0   : > { %s1056_s20 = smov 16   ;;  %667 = sbr.rel (!%p1135_p6) target bundleno = 252 (0xfc), region = 109 }
  0xf1   : > { %944 = dma.vmem_to_hbm [thread:$0]  (%p1135_p6), %s1282_s26, 512, %s659_s29, %s640_s12, %s1054_s7, %s1055_s11, %s1056_s20   ;;  %v636_v60 = vpack.c.bf16 %v634_v59, %v633_v58 }
  0xf2   : > { %s941_s28 = sshll.u32 (%p1135_p6), %s1113_s25, 3  ;;  %v701_v61 = vld [vmem:[%s406_s10] sm:$0xff] (%p1135_p6) }
  0xf3   : > { %638 = vst [vmem:[%s406_s10 + $0x8] sm:$0xff] %v636_v60  ;;  %s670_s15 = scalar_lea.vmem (%p1135_p6), %s1327_s6, %s941_s28 }
  0xf4   : > { %702 = vst [vmem:[%s670_s15] sm:$0xff] (%p1135_p6), %v701_v61 }
  0xfa   : > { %v703_v62 = vld [vmem:[%s406_s10 + $0x8] sm:$0xff] }
  0xfb   : > { %704 = vst [vmem:[%s670_s15 + $0x10] sm:$0xff] %v703_v62 }
  0xfc PF: > { %s716_s26 = sand.u32 1, %s1039_s21   ;;  %p947_p7 = pnand %p818_p9, %p1139_p8 }
  0xfd   : > { %s717_s8 = scalar_lea.sflag [#allocation5], %s716_s26 }
  0xfe   : > { %p948_p6 = pneg %p947_p7 }
 0x100   : > { %1034 = dma.done.wait (%p948_p6), %s717_s8, 512  }
 0x101   : > { %1036 = vsyncadd (%p948_p6), %s717_s8, 4294966784  ;;  %p17_p10 = scmp.ge.s32.totalorder %s1117_s27, 4   ;;  %s1331_s21 = smov %s1043_s22 }
 0x102   : > { %s1332_s22 = smov %s1047_s23  ;;  %s1333_s23 = smov %s1129_s30 }
 0x103   : > { %s1334_s24 = smov %s1117_s27  ;;  %19 = sbr.rel (!%p17_p10) target bundleno = 3 (0x3), region = 199 }
 0x108   :  { %730 = vsyncpa [#allocation5], 1 }
 0x109   :  { %732 = vsyncpa [#allocation5 + $0x1], 1 }

// kernel: _lambda_.16
= control target key start
LH: loop header
LB: loop body
LE: loop exit
PB: predicated region body
PF: predicated region fallthrough
CT: control target
= control target key end

     0   :  { %vm34_vm0 = vcmask 130048   ;;  %s122_s1 = inlined_call_operand.vmem [shape: bf16[16,128], index: 1, kind: input, shape index: {}]   ;;  %s123_s0 = inlined_call_operand.vmem [shape: bf16[32,16], index: 0, kind: input, shape index: {}]   ;;  %s124_s2 = inlined_call_operand.vmem [shape: f32[32,128], index: 2, kind: output, shape index: {}]  }
   0x1   :  { %v84_v0 = vld [vmem:[%s122_s1] sm:$0xff]  ;;  %v83_v2 = vld [vmem:[%s123_s0 + $0x8] sm:$0xff] }
   0x2   :  { %v82_v1 = vld [vmem:[%s123_s0] sm:$0xff]  ;;  %48 = vmatpush.bf16.msra.mxu0 %v84_v0  ;;  %85 = vmatpush.bf16.msra.mxu1 %v84_v0 }
   0x5   :  { %80 = vmatmul.msk.bf16.vlgmr.msra.gmra.mxu0 %vm34_vm0, %v82_v1  ;;  %81 = vmatmul.msk.bf16.vlgmr.msra.gmra.mxu1 %vm34_vm0, %v83_v2 }
  0x82   :  { %v50_v3 = vpop.f32.mrf.mxu0  ;;  %v55_v4 = vpop.f32.mrf.mxu1 }
  0x83   :  { %60 = vst [vmem:[%s124_s2] sm:$0xff] %v50_v3 }
  0x84   :  { %62 = vst [vmem:[%s124_s2 + $0x10] sm:$0xff] %v55_v4 }
  0x8a   :  { %v52_v5 = vpop.f32.mrf.mxu0  ;;  %v57_v6 = vpop.f32.mrf.mxu1 }
  0x8b   :  { %61 = vst [vmem:[%s124_s2 + $0x8] sm:$0xff] %v52_v5 }
  0x8c   :  { %63 = vst [vmem:[%s124_s2 + $0x18] sm:$0xff] %v57_v6 }

// kernel: _lambda_.17
= control target key start
LH: loop header
LB: loop body
LE: loop exit
PB: predicated region body
PF: predicated region fallthrough
CT: control target
= control target key end

     0   :  { %v283_v6 = vmov 0   ;;  %vm133_vm0 = vcmask 130048   ;;  %s375_s1 = inlined_call_operand.vmem [shape: bf16[144,128], index: 1, kind: input, shape index: {}]   ;;  %s376_s0 = inlined_call_operand.vmem [shape: bf16[32,144], index: 0, kind: input, shape index: {}]   ;;  %s377_s2 = inlined_call_operand.vmem [shape: f32[32,1], index: 2, kind: input, shape index: {}]   ;;  %s378_s3 = inlined_call_operand.vmem [shape: bf16[32,128], index: 3, kind: output, shape index: {}]  }
   0x1   :  { %v259_v0 = vld [vmem:[%s375_s1 + $0x38] sm:$0xff]  ;;  %v260_v1 = vld [vmem:[%s375_s1 + $0x40] sm:$0xff]  ;;  %v258_v3 = vld [vmem:[%s375_s1 + $0x30] sm:$0xff]  ;;  %282 = vset.pattern.permute.xlu1 %v283_v6  ;;  %281 = vset.pattern.permute.xlu0 %v283_v6 }
   0x2   :  { %v248_v2 = vld [vmem:[%s376_s0 + $0x4] sm:$0xf]  ;;  %140 = vmatpush.bf16.msra.mxu0 %v259_v0  ;;  %272 = vmatpush.bf16.msra.mxu2 %v259_v0  ;;  %v198_v4 = vld [vmem:[%s376_s0 + $0x8] sm:$0xf0]  ;;  %v39_v7 = vld [vmem:[%s377_s2 + $0x10] sm:$0xff] }
   0x3   :  { %166 = vmatpush.bf16.msra.mxu1 %v260_v1  ;;  %v201_v5 = vor.u32 %v248_v2, %v198_v4  ;;  %v257_v8 = vld [vmem:[%s375_s1 + $0x28] sm:$0xff]  ;;  %v37_v9 = vld [vmem:[%s377_s2] sm:$0xff]  ;;  %53 = vperm.xlu1 %282, %v39_v7   ;;  %v40_v11 = vld [vmem:[%s377_s2 + $0x18] sm:$0xff] }
   0x4   :  { %43 = vperm.xlu0 %281, %v37_v9   ;;  %v256_v10 = vld [vmem:[%s375_s1 + $0x20] sm:$0xff]  ;;  %v38_v12 = vld [vmem:[%s377_s2 + $0x8] sm:$0xff]  ;;  %v255_v13 = vld [vmem:[%s375_s1 + $0x18] sm:$0xff] }
   0x5   :  { %v250_v14 = vld [vmem:[%s376_s0 + $0x14] sm:$0xf]  ;;  %v206_v15 = vld [vmem:[%s376_s0 + $0x18] sm:$0xf0]  ;;  %v253_v18 = vld [vmem:[%s375_s1 + $0x8] sm:$0xff] }
   0x6   :  { %141 = vmatpush.bf16.msra.mxu0 %v258_v3  ;;  %273 = vmatpush.bf16.msra.mxu2 %v258_v3  ;;  %v254_v16 = vld [vmem:[%s375_s1 + $0x10] sm:$0xff]  ;;  %v209_v17 = vor.u32 %v250_v14, %v206_v15  ;;  %v252_v19 = vld [vmem:[%s375_s1] sm:$0xff]  ;;  %v249_v21 = vld [vmem:[%s376_s0 + $0x4] sm:$0xf0] }
   0x7   :  { %246 = vmatmul.msk.bf16.vlgmr.msra.gmra.mxu1 %vm133_vm0, %v201_v5  ;;  %v196_v20 = vld [vmem:[%s376_s0] sm:$0xf]  ;;  %v204_v22 = vld [vmem:[%s376_s0 + $0x10] sm:$0xf]  ;;  %v251_v23 = vld [vmem:[%s376_s0 + $0x14] sm:$0xf0] }
   0x8   :  { %v197_v24 = vor.u32 %v249_v21, %v196_v20  ;;  %v205_v25 = vor.u32 %v251_v23, %v204_v22 }
   0xa   :  { %142 = vmatpush.bf16.msra.mxu0 %v257_v8  ;;  %274 = vmatpush.bf16.msra.mxu2 %v257_v8 }
   0xb   :  { %58 = vperm.xlu1 %282, %v40_v11  }
   0xc   :  { %48 = vperm.xlu0 %281, %v38_v12  }
   0xe   :  { %143 = vmatpush.bf16.msra.mxu0 %v256_v10  ;;  %275 = vmatpush.bf16.msra.mxu2 %v256_v10 }
  0x12   :  { %144 = vmatpush.bf16.msra.mxu0 %v255_v13  ;;  %276 = vmatpush.bf16.msra.mxu2 %v255_v13 }
  0x16   :  { %145 = vmatpush.bf16.msra.mxu0 %v254_v16  ;;  %277 = vmatpush.bf16.msra.mxu2 %v254_v16 }
  0x17   :  { %247 = vmatmul.msk.bf16.gmra.mxu1 %vm133_vm0, %v209_v17 }
  0x1a   :  { %146 = vmatpush.bf16.msra.mxu0 %v253_v18  ;;  %278 = vmatpush.bf16.msra.mxu2 %v253_v18 }
  0x1e   :  { %147 = vmatpush.bf16.msra.mxu0 %v252_v19  ;;  %279 = vmatpush.bf16.msra.mxu2 %v252_v19 }
  0x21   :  { %148 = vmatmul.bf16.vlgmr.msra.gmra.mxu0 %v197_v24  ;;  %153 = vmatmul.bf16.vlgmr.msra.gmra.mxu2 %v205_v25 }
  0x75   :  { %v54_v30 = vpop.permute.xlu1 %53 }
  0x76   :  { %v44_v28 = vpop.permute.xlu0 %43 }
  0x7d   :  { %v59_v42 = vpop.permute.xlu1 %58 }
  0x7e   :  { %v49_v34 = vpop.permute.xlu0 %48 }
  0x84   :  { %v168_v26 = vpop.f32.mrf.mxu1 }
  0x8c   :  { %v170_v27 = vpop.f32.mrf.mxu1 }
  0x94   :  { %v173_v32 = vpop.f32.mrf.mxu1 }
  0x9c   :  { %v175_v47 = vpop.f32.mrf.mxu1 }
  0x9e   :  { %v149_v29 = vpop.f32.mrf.mxu0 }
  0x9f   :  { %v150_v31 = vadd.f32 %v149_v29, %v44_v28 }
  0xa1   :  { %v169_v36 = vadd.f32 %v168_v26, %v150_v31 }
  0xa3   :  { %v178_v40 = vmax.f32 %v169_v36, 0.0 }
  0xa4   :  { %v154_v33 = vpop.f32.mrf.mxu2 }
  0xa5   :  { %v155_v38 = vadd.f32 %v154_v33, %v54_v30 }
  0xa6   :  { %v151_v35 = vpop.f32.mrf.mxu0 }
  0xa7   :  { %v152_v37 = vadd.f32 %v151_v35, %v49_v34  ;;  %v174_v44 = vadd.f32 %v173_v32, %v155_v38 }
  0xa9   :  { %v171_v39 = vadd.f32 %v170_v27, %v152_v37  ;;  %v180_v49 = vmax.f32 %v174_v44, 0.0 }
  0xab   :  { %v179_v41 = vmax.f32 %v171_v39, 0.0 }
  0xac   :  { %v156_v43 = vpop.f32.mrf.mxu2 }
  0xad   :  { %v264_v45 = vpack.c.bf16 %v179_v41, %v178_v40  ;;  %v157_v46 = vadd.f32 %v156_v43, %v59_v42 }
  0xaf   :  { %265 = vst [vmem:[%s378_s3] sm:$0xff] %v264_v45   ;;  %v176_v48 = vadd.f32 %v175_v47, %v157_v46 }
  0xb1   :  { %v181_v50 = vmax.f32 %v176_v48, 0.0 }
  0xb3   :  { %v269_v51 = vpack.c.bf16 %v181_v50, %v180_v49 }
  0xb5   :  { %271 = vst [vmem:[%s378_s3 + $0x8] sm:$0xff] %v269_v51  }

// kernel: _lambda_.19
= control target key start
LH: loop header
LB: loop body
LE: loop exit
PB: predicated region body
PF: predicated region fallthrough
CT: control target
= control target key end

     0   :  { %vm78_vm0 = vcmask 517120   ;;  %vm287_vm1 = vcmask 1041409   ;;  %vm289_vm2 = vcmask 1042434   ;;  %vm291_vm3 = vcmask 1043459   ;;  %s626_s0 = inlined_call_operand.vmem [shape: bf16[32,2,64], index: 0, kind: input, shape index: {}]   ;;  %s627_s2 = inlined_call_operand.vmem [shape: f32[10,1], index: 2, kind: input, shape index: {}]   ;;  %s628_s1 = inlined_call_operand.vmem [shape: f32[10,32], index: 1, kind: input, shape index: {}]   ;;  %s629_s3 = inlined_call_operand.vmem [shape: f32[10,2], index: 3, kind: output, shape index: {}]  }
   0x1   :  { %v40_v0 = vld [vmem:[%s626_s0 + $0x1a] sm:$0x1]  ;;  %v38_v1 = vld [vmem:[%s626_s0 + $0x18] sm:$0x1]  ;;  %v31_v2 = vld [vmem:[%s626_s0 + $0x11] sm:$0x1] }
   0x2   :  { %v72_v3 = vunpack.c.l.bf16 %v40_v0  ;;  %v70_v4 = vunpack.c.l.bf16 %v38_v1  ;;  %v63_v5 = vunpack.c.l.bf16 %v31_v2  ;;  %v39_v6 = vld [vmem:[%s626_s0 + $0x19] sm:$0x1]  ;;  %v30_v7 = vld [vmem:[%s626_s0 + $0x10] sm:$0x1]  ;;  %v41_v11 = vld [vmem:[%s626_s0 + $0x1b] sm:$0x1] }
   0x3   :  { %v71_v12 = vunpack.c.l.bf16 %v39_v6  ;;  %v62_v13 = vunpack.c.l.bf16 %v30_v7  ;;  %v73_v14 = vunpack.c.l.bf16 %v41_v11  ;;  %v32_v18 = vld [vmem:[%s626_s0 + $0x12] sm:$0x1]  ;;  %v42_v19 = vld [vmem:[%s626_s0 + $0x1c] sm:$0x1]  ;;  %v22_v20 = vld [vmem:[%s626_s0 + $0x8] sm:$0x1] }
   0x4   :  { %v157_v8 = vsel %vm78_vm0, %v72_v3, 0.0  ;;  %v151_v9 = vsel %vm78_vm0, %v70_v4, 0.0  ;;  %v130_v10 = vsel %vm78_vm0, %v63_v5, 0.0  ;;  %v64_v21 = vunpack.c.l.bf16 %v32_v18  ;;  %v33_v27 = vld [vmem:[%s626_s0 + $0x13] sm:$0x1] }
   0x5   :  { %158 = vadd.xlane.f32.xlu1 %v157_v8  ;;  %152 = vadd.xlane.f32.xlu0 %v151_v9  ;;  %v154_v15 = vsel %vm78_vm0, %v71_v12, 0.0  ;;  %v127_v16 = vsel %vm78_vm0, %v62_v13, 0.0  ;;  %v160_v17 = vsel %vm78_vm0, %v73_v14, 0.0  ;;  %v74_v22 = vunpack.c.l.bf16 %v42_v19  ;;  %v23_v28 = vld [vmem:[%s626_s0 + $0x9] sm:$0x1] }
   0x6   :  { %131 = vadd.xlane.f32.xlu2 %v130_v10  ;;  %v54_v23 = vunpack.c.l.bf16 %v22_v20  ;;  %v133_v24 = vsel %vm78_vm0, %v64_v21, 0.0  ;;  %v43_v29 = vld [vmem:[%s626_s0 + $0x1d] sm:$0x1]  ;;  %v65_v30 = vunpack.c.l.bf16 %v33_v27  ;;  %v55_v31 = vunpack.c.l.bf16 %v23_v28  ;;  %v34_v36 = vld [vmem:[%s626_s0 + $0x14] sm:$0x1] }
   0x7   :  { %v163_v25 = vsel %vm78_vm0, %v74_v22, 0.0  ;;  %v75_v32 = vunpack.c.l.bf16 %v43_v29  ;;  %v24_v37 = vld [vmem:[%s626_s0 + $0xa] sm:$0x1]  ;;  %v44_v38 = vld [vmem:[%s626_s0 + $0x1e] sm:$0x1]  ;;  %v66_v39 = vunpack.c.l.bf16 %v34_v36  ;;  %vm293_vm4 = vcmask 1044484  }
   0x8   :  { %v103_v26 = vsel %vm78_vm0, %v54_v23, 0.0  ;;  %v136_v33 = vsel %vm78_vm0, %v65_v30, 0.0  ;;  %v106_v34 = vsel %vm78_vm0, %v55_v31, 0.0  ;;  %v56_v40 = vunpack.c.l.bf16 %v24_v37  ;;  %v18_v41 = vld [vmem:[%s626_s0 + $0x4] sm:$0x1] }
   0x9   :  { %v166_v35 = vsel %vm78_vm0, %v75_v32, 0.0  ;;  %v76_v42 = vunpack.c.l.bf16 %v44_v38  ;;  %v50_v43 = vunpack.c.l.bf16 %v18_v41  ;;  %v25_v44 = vld [vmem:[%s626_s0 + $0xb] sm:$0x1]  ;;  %v139_v46 = vsel %vm78_vm0, %v66_v39, 0.0  ;;  %v37_v48 = vld [vmem:[%s626_s0 + $0x17] sm:$0x1] }
   0xa   :  { %v109_v47 = vsel %vm78_vm0, %v56_v40, 0.0  ;;  %v27_v49 = vld [vmem:[%s626_s0 + $0xd] sm:$0x1]  ;;  %v15_v51 = vld [vmem:[%s626_s0 + $0x1] sm:$0x1]  ;;  %v69_v53 = vunpack.c.l.bf16 %v37_v48  ;;  %v57_v55 = vunpack.c.l.bf16 %v25_v44  ;;  %vm295_vm5 = vcmask 1045509  }
   0xb   :  { %v458_v45 = vsel %vm78_vm0, %v50_v43, 0.0  ;;  %v169_v50 = vsel %vm78_vm0, %v76_v42, 0.0  ;;  %v14_v52 = vld [vmem:[%s626_s0] sm:$0x1]  ;;  %v59_v54 = vunpack.c.l.bf16 %v27_v49  ;;  %v47_v58 = vunpack.c.l.bf16 %v15_v51  ;;  %v19_v60 = vld [vmem:[%s626_s0 + $0x5] sm:$0x1] }
   0xc   :  { %v148_v56 = vsel %vm78_vm0, %v69_v53, 0.0  ;;  %v46_v59 = vunpack.c.l.bf16 %v14_v52  ;;  %v51_v61 = vunpack.c.l.bf16 %v19_v60  ;;  %v112_v62 = vsel %vm78_vm0, %v57_v55, 0.0  ;;  %v16_v2 = vld [vmem:[%s626_s0 + $0x2] sm:$0x1]  ;;  %v28_v3 = vld [vmem:[%s626_s0 + $0xe] sm:$0x1] }
   0xd   :  { %155 = vadd.xlane.f32.xlu0 %v154_v15  ;;  %128 = vadd.xlane.f32.xlu1 %v127_v16  ;;  %v118_v57 = vsel %vm78_vm0, %v59_v54, 0.0  ;;  %v82_v0 = vsel %vm78_vm0, %v47_v58, 0.0  ;;  %v45_v4 = vld [vmem:[%s626_s0 + $0x1f] sm:$0x1]  ;;  %v35_v5 = vld [vmem:[%s626_s0 + $0x15] sm:$0x1]  ;;  %v60_v6 = vunpack.c.l.bf16 %v28_v3  ;;  %v48_v10 = vunpack.c.l.bf16 %v16_v2 }
   0xe   :  { %161 = vadd.xlane.f32.xlu2 %v160_v17  ;;  %v94_v63 = vsel %vm78_vm0, %v51_v61, 0.0  ;;  %v79_v1 = vsel %vm78_vm0, %v46_v59, 0.0  ;;  %v29_v7 = vld [vmem:[%s626_s0 + $0xf] sm:$0x1]  ;;  %v77_v11 = vunpack.c.l.bf16 %v45_v4  ;;  %v67_v12 = vunpack.c.l.bf16 %v35_v5  ;;  %v20_v14 = vld [vmem:[%s626_s0 + $0x6] sm:$0x1] }
   0xf   :  { %v61_v8 = vunpack.c.l.bf16 %v29_v7  ;;  %v121_v9 = vsel %vm78_vm0, %v60_v6, 0.0  ;;  %v52_v15 = vunpack.c.l.bf16 %v20_v14  ;;  %v85_v17 = vsel %vm78_vm0, %v48_v10, 0.0  ;;  %v36_v20 = vld [vmem:[%s626_s0 + $0x16] sm:$0x1]  ;;  %v26_v21 = vld [vmem:[%s626_s0 + $0xc] sm:$0x1] }
  0x10   :  { %v172_v18 = vsel %vm78_vm0, %v77_v11, 0.0  ;;  %v142_v19 = vsel %vm78_vm0, %v67_v12, 0.0  ;;  %v21_v22 = vld [vmem:[%s626_s0 + $0x7] sm:$0x1]  ;;  %v17_v23 = vld [vmem:[%s626_s0 + $0x3] sm:$0x1] }
  0x11   :  { %v124_v13 = vsel %vm78_vm0, %v61_v8, 0.0  ;;  %v97_v16 = vsel %vm78_vm0, %v52_v15, 0.0  ;;  %v49_v28 = vunpack.c.l.bf16 %v17_v23  ;;  %vm297_vm6 = vcmask 1046534  }
  0x12   :  { %vm299_vm7 = vcmask 1047559   ;;  %v373_v23 = vmov 0   ;;  %vm326_vm8 = vcmask 261120   ;;  %vm356_vm9 = vcmask 15360  }
  0x13   :  { %v88_v31 = vsel %vm78_vm0, %v49_v28, 0.0  ;;  %372 = vset.pattern.permute.xlu0 %v373_v23  ;;  %371 = vset.pattern.permute.xlu2 %v373_v23  ;;  %vm358_vm10 = vcmask 9216  }
  0x15   :  { %134 = vadd.xlane.f32.xlu0 %v133_v24  ;;  %164 = vadd.xlane.f32.xlu1 %v163_v25  ;;  %v53_v24 = vunpack.c.l.bf16 %v21_v22  ;;  %v68_v25 = vunpack.c.l.bf16 %v36_v20  ;;  %v209_v20 = vld [vmem:[%s627_s2] sm:$0xff] }
  0x16   :  { %104 = vadd.xlane.f32.xlu2 %v103_v26  ;;  %v58_v26 = vunpack.c.l.bf16 %v26_v21 }
  0x17   :  { %v100_v27 = vsel %vm78_vm0, %v53_v24, 0.0  ;;  %v145_v29 = vsel %vm78_vm0, %v68_v25, 0.0 }
  0x18   :  { %v115_v30 = vsel %vm78_vm0, %v58_v26, 0.0 }
  0x1d   :  { %137 = vadd.xlane.f32.xlu1 %v136_v33  ;;  %107 = vadd.xlane.f32.xlu0 %v106_v34 }
  0x1e   :  { %167 = vadd.xlane.f32.xlu2 %v166_v35 }
  0x25   :  { %140 = vadd.xlane.f32.xlu1 %v139_v46  ;;  %110 = vadd.xlane.f32.xlu0 %v109_v47  ;;  %v253_v46 = vlaneseq }
  0x26   :  { %170 = vadd.xlane.f32.xlu2 %v169_v50 }
  0x27   :  { %v531_v49 = vand.u32 127, %v253_v46 }
  0x2d   :  { %83 = vadd.xlane.f32.xlu1 %v82_v0  ;;  %80 = vadd.xlane.f32.xlu0 %v79_v1 }
  0x2e   :  { %113 = vadd.xlane.f32.xlu2 %v112_v62 }
  0x35   :  { %173 = vadd.xlane.f32.xlu1 %v172_v18  ;;  %143 = vadd.xlane.f32.xlu0 %v142_v19  ;;  %v210_v19 = vld [vmem:[%s627_s2 + $0x8] sm:$0x3] }
  0x36   :  { %86 = vadd.xlane.f32.xlu2 %v85_v17 }
  0x3d   :  { %146 = vadd.xlane.f32.xlu1 %v145_v29  ;;  %116 = vadd.xlane.f32.xlu0 %v115_v30 }
  0x3e   :  { %89 = vadd.xlane.f32.xlu2 %v88_v31 }
  0x45   :  { %149 = vadd.xlane.f32.xlu1 %v148_v56  ;;  %119 = vadd.xlane.f32.xlu0 %v118_v57 }
  0x46   :  { %92 = vadd.xlane.f32.xlu2 %v458_v45 }
  0x4d   :  { %95 = vadd.xlane.f32.xlu1 %v94_v63  ;;  %122 = vadd.xlane.f32.xlu0 %v121_v9 }
  0x4e   :  { %125 = vadd.xlane.f32.xlu2 %v124_v13 }
  0x55   :  { %98 = vadd.xlane.f32.xlu0 %v97_v16  ;;  %101 = vadd.xlane.f32.xlu1 %v100_v27 }
  0x66   :  { %213 = vperm.xlu2 %371, %v209_v20  }
  0x69   :  { %218 = vperm.xlu0 %372, %v210_v19  }
  0x78   :  { %v159_v32 = vpop.xlane.xlu1 %158  ;;  %v153_v33 = vpop.xlane.xlu0 %152 }
  0x79   :  { %v132_v34 = vpop.xlane.xlu2 %131  ;;  %v199_v50 = vmul.f32 0.015625, %v153_v33  ;;  %v201_v52 = vmul.f32 0.015625, %v159_v32 }
  0x7a   :  { %v192_v14 = vmul.f32 0.015625, %v132_v34 }
  0x7b   :  { %v279_v55 = vperm.slane %v199_v50, %v531_v49  ;;  %v281_v61 = vperm.slane %v201_v52, %v531_v49 }
  0x7c   :  { %v272_v25 = vperm.slane %v192_v14, %v531_v49 }
  0x80   :  { %v156_v35 = vpop.xlane.xlu0 %155  ;;  %v129_v36 = vpop.xlane.xlu1 %128 }
  0x81   :  { %v162_v37 = vpop.xlane.xlu2 %161  ;;  %v200_v48 = vmul.f32 0.015625, %v156_v35  ;;  %v191_v15 = vmul.f32 0.015625, %v129_v36 }
  0x82   :  { %v202_v56 = vmul.f32 0.015625, %v162_v37 }
  0x83   :  { %v280_v51 = vperm.slane %v200_v48, %v531_v49  ;;  %v271_v26 = vperm.slane %v191_v15, %v531_v49 }
  0x84   :  { %v282_v63 = vperm.slane %v202_v56, %v531_v49 }
  0x85   :  { %v315_v59 = vsel %vm287_vm1, %v280_v51, %v279_v55  ;;  %v308_v32 = vsel %vm287_vm1, %v272_v25, %v271_v26 }
  0x86   :  { %v316_v0 = vsel %vm289_vm2, %v281_v61, %v315_v59 }
  0x87   :  { %v317_v6 = vsel %vm291_vm3, %v282_v63, %v316_v0 }
  0x88   :  { %v135_v38 = vpop.xlane.xlu0 %134  ;;  %v165_v39 = vpop.xlane.xlu1 %164 }
  0x89   :  { %v525_v40 = vpop.xlane.xlu2 %104  ;;  %v203_v58 = vmul.f32 0.015625, %v165_v39  ;;  %v193_v16 = vmul.f32 0.015625, %v135_v38 }
  0x8a   :  { %v183_v35 = vmul.f32 0.015625, %v525_v40 }
  0x8b   :  { %v283_v1 = vperm.slane %v203_v58, %v531_v49  ;;  %v273_v28 = vperm.slane %v193_v16, %v531_v49 }
  0x8d   :  { %v318_v9 = vsel %vm293_vm4, %v283_v1, %v317_v6  ;;  %v309_v34 = vsel %vm289_vm2, %v273_v28, %v308_v32 }
  0x90   :  { %v138_v41 = vpop.xlane.xlu1 %137  ;;  %v527_v42 = vpop.xlane.xlu0 %107 }
  0x91   :  { %v168_v43 = vpop.xlane.xlu2 %167  ;;  %v194_v21 = vmul.f32 0.015625, %v138_v41  ;;  %v184_v36 = vmul.f32 0.015625, %v527_v42  ;;  %v263_v42 = vperm.slane %v183_v35, %v531_v49 }
  0x92   :  { %v204_v60 = vmul.f32 0.015625, %v168_v43 }
  0x93   :  { %v274_v30 = vperm.slane %v194_v21, %v531_v49  ;;  %v264_v52 = vperm.slane %v184_v36, %v531_v49 }
  0x94   :  { %v284_v2 = vperm.slane %v204_v60, %v531_v49 }
  0x95   :  { %v310_v41 = vsel %vm291_vm3, %v274_v30, %v309_v34  ;;  %v301_v61 = vsel %vm287_vm1, %v264_v52, %v263_v42  ;;  %v208_v34 = vld [vmem:[%s628_s1 + $0x8] sm:$0x3] }
  0x96   :  { %v319_v11 = vsel %vm295_vm5, %v284_v2, %v318_v9 }
  0x98   :  { %v141_v44 = vpop.xlane.xlu1 %140  ;;  %v529_v45 = vpop.xlane.xlu0 %110 }
  0x99   :  { %v171_v47 = vpop.xlane.xlu2 %170  ;;  %v195_v24 = vmul.f32 0.015625, %v141_v44  ;;  %v185_v43 = vmul.f32 0.015625, %v529_v45 }
  0x9a   :  { %v205_v62 = vmul.f32 0.015625, %v171_v47 }
  0x9b   :  { %v275_v31 = vperm.slane %v195_v24, %v531_v49  ;;  %v265_v45 = vperm.slane %v185_v43, %v531_v49 }
  0x9c   :  { %v285_v3 = vperm.slane %v205_v62, %v531_v49 }
  0x9d   :  { %v311_v47 = vsel %vm293_vm4, %v275_v31, %v310_v41  ;;  %v302_v2 = vsel %vm289_vm2, %v265_v45, %v301_v61 }
  0x9e   :  { %v320_v12 = vsel %vm297_vm6, %v285_v3, %v319_v11 }
  0xa0   :  { %v534_v53 = vpop.xlane.xlu1 %83  ;;  %v536_v54 = vpop.xlane.xlu0 %80 }
  0xa1   :  { %v539_v57 = vpop.xlane.xlu2 %113  ;;  %v175_v62 = vmul.f32 0.015625, %v536_v54 }
  0xa2   :  { %v186_v48 = vmul.f32 0.015625, %v539_v57  ;;  %v176_v57 = vmul.f32 0.015625, %v534_v53 }
  0xa4   :  { %v266_v59 = vperm.slane %v186_v48, %v531_v49  ;;  %v256_v9 = vperm.slane %v176_v57, %v531_v49 }
  0xa6   :  { %v303_v6 = vsel %vm291_vm3, %v266_v59, %v302_v2 }
  0xa8   :  { %v174_v4 = vpop.xlane.xlu1 %173  ;;  %v144_v5 = vpop.xlane.xlu0 %143 }
  0xa9   :  { %v549_v7 = vpop.xlane.xlu2 %86  ;;  %v206_v8 = vmul.f32 0.015625, %v174_v4  ;;  %v196_v27 = vmul.f32 0.015625, %v144_v5 }
  0xaa   :  { %v177_v3 = vmul.f32 0.015625, %v549_v7 }
  0xab   :  { %v286_v10 = vperm.slane %v206_v8, %v531_v49  ;;  %v276_v33 = vperm.slane %v196_v27, %v531_v49 }
  0xac   :  { %v257_v15 = vperm.slane %v177_v3, %v531_v49 }
  0xad   :  { %v321_v13 = vsel %vm299_vm7, %v286_v10, %v320_v12  ;;  %v312_v40 = vsel %vm295_vm5, %v276_v33, %v311_v47  ;;  %v255_v12 = vperm.slane %v175_v62, %v531_v49  ;;  %v207_v33 = vld [vmem:[%s628_s1] sm:$0xff] }
  0xae   :  { %345 = vmatpush.msra.mxu0 %v321_v13  ;;  %366 = vmatpush.msra.mxu1 %v321_v13 }
  0xaf   :  { %v288_v20 = vsel %vm287_vm1, %v256_v9, %v255_v12 }
  0xb0   :  { %v147_v17 = vpop.xlane.xlu1 %146  ;;  %v117_v18 = vpop.xlane.xlu0 %116  ;;  %v290_v24 = vsel %vm289_vm2, %v257_v15, %v288_v20 }
  0xb1   :  { %v90_v22 = vpop.xlane.xlu2 %89  ;;  %v197_v29 = vmul.f32 0.015625, %v147_v17  ;;  %v187_v50 = vmul.f32 0.015625, %v117_v18 }
  0xb2   :  { %v178_v8 = vmul.f32 0.015625, %v90_v22 }
  0xb3   :  { %v277_v37 = vperm.slane %v197_v29, %v531_v49  ;;  %v267_v60 = vperm.slane %v187_v50, %v531_v49 }
  0xb4   :  { %v258_v17 = vperm.slane %v178_v8, %v531_v49 }
  0xb5   :  { %v313_v56 = vsel %vm297_vm6, %v277_v37, %v312_v40  ;;  %v304_v10 = vsel %vm293_vm4, %v267_v60, %v303_v6 }
  0xb6   :  { %v292_v27 = vsel %vm291_vm3, %v258_v17, %v290_v24 }
  0xb8   :  { %v150_v38 = vpop.xlane.xlu1 %149  ;;  %v120_v39 = vpop.xlane.xlu0 %119 }
  0xb9   :  { %v93_v44 = vpop.xlane.xlu2 %92  ;;  %v198_v46 = vmul.f32 0.015625, %v150_v38  ;;  %v188_v55 = vmul.f32 0.015625, %v120_v39 }
  0xba   :  { %v179_v11 = vmul.f32 0.015625, %v93_v44 }
  0xbb   :  { %v278_v51 = vperm.slane %v198_v46, %v531_v49  ;;  %v268_v63 = vperm.slane %v188_v55, %v531_v49 }
  0xbc   :  { %v259_v19 = vperm.slane %v179_v11, %v531_v49 }
  0xbd   :  { %v314_v58 = vsel %vm299_vm7, %v278_v51, %v313_v56  ;;  %v305_v7 = vsel %vm295_vm5, %v268_v63, %v304_v10 }
  0xbe   :  { %346 = vmatpush.msra.mxu0 %v314_v58  ;;  %367 = vmatpush.msra.mxu1 %v314_v58  ;;  %v294_v28 = vsel %vm293_vm4, %v259_v19, %v292_v27 }
  0xc0   :  { %v96_v0 = vpop.xlane.xlu1 %95  ;;  %v123_v1 = vpop.xlane.xlu0 %122 }
  0xc1   :  { %v189_v4 = vmul.f32 0.015625, %v123_v1  ;;  %v126_v5 = vpop.xlane.xlu2 %125  ;;  %v180_v13 = vmul.f32 0.015625, %v96_v0 }
  0xc2   :  { %v190_v53 = vmul.f32 0.015625, %v126_v5 }
  0xc3   :  { %v269_v54 = vperm.slane %v189_v4, %v531_v49  ;;  %v260_v21 = vperm.slane %v180_v13, %v531_v49 }
  0xc4   :  { %v270_v14 = vperm.slane %v190_v53, %v531_v49 }
  0xc5   :  { %v306_v16 = vsel %vm297_vm6, %v269_v54, %v305_v7  ;;  %v296_v31 = vsel %vm295_vm5, %v260_v21, %v294_v28 }
  0xc6   :  { %v307_v18 = vsel %vm299_vm7, %v270_v14, %v306_v16 }
  0xc7   :  { %347 = vmatpush.msra.mxu0 %v307_v18  ;;  %368 = vmatpush.msra.mxu1 %v307_v18 }
  0xc8   :  { %v99_v22 = vpop.xlane.xlu0 %98  ;;  %v102_v23 = vpop.xlane.xlu1 %101 }
  0xc9   :  { %v181_v25 = vmul.f32 0.015625, %v99_v22  ;;  %v182_v26 = vmul.f32 0.015625, %v102_v23 }
  0xcb   :  { %v261_v29 = vperm.slane %v181_v25, %v531_v49  ;;  %v262_v30 = vperm.slane %v182_v26, %v531_v49  ;;  %v214_v49 = vpop.permute.xlu2 %213 }
  0xcd   :  { %v298_v32 = vsel %vm297_vm6, %v261_v29, %v296_v31 }
  0xce   :  { %v300_v35 = vsel %vm299_vm7, %v262_v30, %v298_v32 }
  0xcf   :  { %348 = vmatpush.msra.mxu0 %v300_v35  ;;  %369 = vmatpush.msra.mxu1 %v300_v35 }
  0xd0   :  { %364 = vmatmul.msk.f32.vlgmr.msra.gmra.mxu0 %vm326_vm8, %v207_v33  ;;  %365 = vmatmul.msk.f32.vlgmr.msra.gmra.mxu1 %vm326_vm8, %v208_v34 }
  0xdb   :  { %v219_v36 = vpop.permute.xlu0 %218 }
 0x14d   :  { %v350_v37 = vpop.f32.mrf.mxu0  ;;  %v353_v38 = vpop.f32.mrf.mxu1 }
 0x14e   :  { %v351_v39 = vadd.f32 %v350_v37, %v214_v49  ;;  %v354_v41 = vadd.f32 %v353_v38, %v219_v36 }
 0x150   :  { %357 = vst.msk [vmem:[%s629_s3] sm:$0xff] %vm356_vm9, %v351_v39 }
 0x151   :  { %359 = vst.msk [vmem:[%s629_s3 + $0x8] sm:$0x3] %vm358_vm10, %v354_v41 }

// kernel: _lambda_.18
= control target key start
LH: loop header
LB: loop body
LE: loop exit
PB: predicated region body
PF: predicated region fallthrough
CT: control target
= control target key end

     0   :  { %v542_v5 = vmov 0   ;;  %vm210_vm0 = vcmask 261120   ;;  %s718_s0 = inlined_call_operand.vmem [shape: bf16[32,288], index: 0, kind: input, shape index: {}]   ;;  %s719_s1 = inlined_call_operand.vmem [shape: bf16[288,128], index: 1, kind: input, shape index: {}]   ;;  %s720_s2 = inlined_call_operand.vmem [shape: f32[32,128], index: 2, kind: input, shape index: {}]   ;;  %s721_s3 = inlined_call_operand.vmem [shape: f32[32,1], index: 3, kind: input, shape index: {}]   ;;  %s722_s4 = inlined_call_operand.vmem [shape: f32[32,1], index: 4, kind: input, shape index: {}]   ;;  %s723_s5 = inlined_call_operand.hbm [shape: f32[32,128], index: 5, kind: output, shape index: {0}]   ;;  %s724_s6 = inlined_call_operand.vmem [shape: bf16[32,128], index: 6, kind: output, shape index: {1}]  }
   0x1   :  { %v479_v0 = vld [vmem:[%s719_s1 + $0x38] sm:$0xff]  ;;  %v478_v2 = vld [vmem:[%s719_s1 + $0x30] sm:$0xff]  ;;  %v489_v3 = vld [vmem:[%s719_s1 + $0x88] sm:$0xff]  ;;  %514 = vset.pattern.permute.xlu1 %v542_v5  ;;  %513 = vset.pattern.permute.xlu0 %v542_v5 }
   0x2   :  { %v487_v1 = vld [vmem:[%s719_s1 + $0x78] sm:$0xff]  ;;  %217 = vmatpush.bf16.msra.mxu0 %v479_v0  ;;  %501 = vmatpush.bf16.msra.mxu3 %v479_v0  ;;  %v486_v4 = vld [vmem:[%s719_s1 + $0x70] sm:$0xff]  ;;  %v488_v6 = vld [vmem:[%s719_s1 + $0x80] sm:$0xff] }
   0x3   :  { %236 = vmatpush.bf16.msra.mxu1 %v487_v1  ;;  %261 = vmatpush.bf16.msra.mxu2 %v489_v3  ;;  %v378_v7 = vld [vmem:[%s718_s0 + $0x8] sm:$0xf]  ;;  %v468_v8 = vld [vmem:[%s718_s0 + $0x10] sm:$0xf0]  ;;  %v278_v13 = vld [vmem:[%s721_s3] sm:$0xff] }
   0x4   :  { %515 = vset.pattern.permute.xlu2 %v542_v5  ;;  %v477_v9 = vld [vmem:[%s719_s1 + $0x28] sm:$0xff]  ;;  %v379_v11 = vor.u32 %v468_v8, %v378_v7  ;;  %v280_v12 = vld [vmem:[%s721_s3 + $0x10] sm:$0xff]  ;;  %v476_v14 = vld [vmem:[%s719_s1 + $0x20] sm:$0xff] }
   0x5   :  { %v485_v10 = vld [vmem:[%s719_s1 + $0x68] sm:$0xff] }
   0x6   :  { %218 = vmatpush.bf16.msra.mxu0 %v478_v2  ;;  %502 = vmatpush.bf16.msra.mxu3 %v478_v2 }
   0x7   :  { %237 = vmatpush.bf16.msra.mxu1 %v486_v4  ;;  %262 = vmatpush.bf16.msra.mxu2 %v488_v6 }
   0xa   :  { %219 = vmatpush.bf16.msra.mxu0 %v477_v9  ;;  %503 = vmatpush.bf16.msra.mxu3 %v477_v9 }
   0xb   :  { %12 = vsyncpa [#allocation3], 0  ;;  %238 = vmatpush.bf16.msra.mxu1 %v485_v10  ;;  %v484_v15 = vld [vmem:[%s719_s1 + $0x60] sm:$0xff]  ;;  %464 = vmatmul.msk.bf16.vlgmr.msra.gmra.mxu2 %vm210_vm0, %v379_v11  ;;  %v475_v16 = vld [vmem:[%s719_s1 + $0x18] sm:$0xff]  ;;  %s543_s30 = smov [#allocation2]   ;;  %s352_s10 = sshll.u32 %s723_s5, 4  ;;  %s353_s10 = int_to_ptr.hbm [resolvable:$true] %s352_s10 }
   0xc   :  { %294 = vperm.xlu1 %514, %v280_v12   ;;  %284 = vperm.xlu0 %513, %v278_v13   ;;  %v483_v17 = vld [vmem:[%s719_s1 + $0x58] sm:$0xff]  ;;  %v474_v18 = vld [vmem:[%s719_s1 + $0x10] sm:$0xff]  ;;  %v279_v20 = vld [vmem:[%s721_s3 + $0x8] sm:$0xff]  ;;  %s350_s7 = sshll.u32 %s543_s30, 4  ;;  %s545_s11 = smov 8   ;;  %s351_s7 = int_to_ptr.vmem [resolvable:$true] %s350_s7 }
   0xd   :  { %v281_v19 = vld [vmem:[%s721_s3 + $0x18] sm:$0xff]  ;;  %v482_v21 = vld [vmem:[%s719_s1 + $0x50] sm:$0xff]  ;;  %v306_v22 = vld [vmem:[%s722_s4] sm:$0xff] }
   0xe   :  { %220 = vmatpush.bf16.msra.mxu0 %v476_v14  ;;  %504 = vmatpush.bf16.msra.mxu3 %v476_v14  ;;  %v390_v23 = vld [vmem:[%s718_s0 + $0x20] sm:$0xf]  ;;  %v471_v24 = vld [vmem:[%s718_s0 + $0x28] sm:$0xf0]  ;;  %v309_v31 = vld [vmem:[%s722_s4 + $0x18] sm:$0xff] }
   0xf   :  { %239 = vmatpush.bf16.msra.mxu1 %v484_v15  ;;  %312 = vperm.xlu2 %515, %v306_v22   ;;  %v473_v25 = vld [vmem:[%s719_s1 + $0x8] sm:$0xff]  ;;  %v391_v27 = vor.u32 %v471_v24, %v390_v23  ;;  %v472_v28 = vld [vmem:[%s719_s1] sm:$0xff]  ;;  %v308_v32 = vld [vmem:[%s722_s4 + $0x10] sm:$0xff] }
  0x10   :  { %v481_v26 = vld [vmem:[%s719_s1 + $0x48] sm:$0xff]  ;;  %v370_v29 = vld [vmem:[%s718_s0] sm:$0xf]  ;;  %v382_v33 = vld [vmem:[%s718_s0 + $0x18] sm:$0xf] }
  0x11   :  { %v467_v30 = vld [vmem:[%s718_s0 + $0x8] sm:$0xf0]  ;;  %v470_v34 = vld [vmem:[%s718_s0 + $0x20] sm:$0xf0]  ;;  %v372_v38 = vld [vmem:[%s718_s0 + $0xc] sm:$0xf0] }
  0x12   :  { %221 = vmatpush.bf16.msra.mxu0 %v475_v16  ;;  %505 = vmatpush.bf16.msra.mxu3 %v475_v16  ;;  %v307_v35 = vld [vmem:[%s722_s4 + $0x8] sm:$0xff]  ;;  %v480_v36 = vld [vmem:[%s719_s1 + $0x40] sm:$0xff]  ;;  %v371_v39 = vor.u32 %v467_v30, %v370_v29  ;;  %v383_v40 = vor.u32 %v470_v34, %v382_v33  ;;  %v469_v42 = vld [vmem:[%s718_s0 + $0x1c] sm:$0xf] }
  0x13   :  { %240 = vmatpush.bf16.msra.mxu1 %v483_v17  ;;  %v466_v37 = vld [vmem:[%s718_s0 + $0x4] sm:$0xf]  ;;  %v384_v43 = vld [vmem:[%s718_s0 + $0x24] sm:$0xf0]  ;;  %v70_v60 = vld [vmem:[%s720_s2 + $0x10] sm:$0xff] }
  0x14   :  { %299 = vperm.xlu1 %514, %v281_v19   ;;  %289 = vperm.xlu0 %513, %v279_v20   ;;  %v375_v41 = vor.u32 %v466_v37, %v372_v38  ;;  %v387_v44 = vor.u32 %v469_v42, %v384_v43  ;;  %v68_v46 = vld [vmem:[%s720_s2] sm:$0xff]  ;;  %v69_v54 = vld [vmem:[%s720_s2 + $0x8] sm:$0xff]  ;;  %v71_v14 = vld [vmem:[%s720_s2 + $0x18] sm:$0xff]  ;;  %s544_s2 = smov 128  }
  0x16   :  { %222 = vmatpush.bf16.msra.mxu0 %v474_v18  ;;  %506 = vmatpush.bf16.msra.mxu3 %v474_v18 }
  0x17   :  { %241 = vmatpush.bf16.msra.mxu1 %v482_v21  ;;  %317 = vperm.xlu2 %515, %v307_v35  }
  0x1a   :  { %223 = vmatpush.bf16.msra.mxu0 %v473_v25  ;;  %507 = vmatpush.bf16.msra.mxu3 %v473_v25 }
  0x1b   :  { %242 = vmatpush.bf16.msra.mxu1 %v481_v26  ;;  %465 = vmatmul.msk.bf16.gmra.mxu2 %vm210_vm0, %v391_v27 }
  0x1c   :  { %327 = vperm.xlu1 %514, %v309_v31   ;;  %322 = vperm.xlu0 %513, %v308_v32  }
  0x1e   :  { %224 = vmatpush.bf16.msra.mxu0 %v472_v28  ;;  %508 = vmatpush.bf16.msra.mxu3 %v472_v28 }
  0x1f   :  { %243 = vmatpush.bf16.msra.mxu1 %v480_v36 }
  0x21   :  { %225 = vmatmul.bf16.vlgmr.msra.gmra.mxu0 %v371_v39  ;;  %230 = vmatmul.bf16.vlgmr.msra.gmra.mxu3 %v383_v40 }
  0x22   :  { %244 = vmatmul.bf16.vlgmr.msra.gmra.mxu1 %v375_v41 }
  0x32   :  { %249 = vmatmul.bf16.gmra.mxu1 %v387_v44 }
  0x69   :  { %v313_v52 = vpop.permute.xlu2 %312 }
  0x71   :  { %v318_v3 = vpop.permute.xlu2 %317 }
  0x7e   :  { %v285_v51 = vpop.permute.xlu0 %284  ;;  %v295_v59 = vpop.permute.xlu1 %294 }
  0x86   :  { %v290_v1 = vpop.permute.xlu0 %289  ;;  %v300_v13 = vpop.permute.xlu1 %299 }
  0x8e   :  { %v264_v45 = vpop.f32.mrf.mxu2  ;;  %v323_v23 = vpop.permute.xlu0 %322 }
  0x8f   :  { %v328_v26 = vpop.permute.xlu1 %327 }
  0x96   :  { %v266_v55 = vpop.f32.mrf.mxu2 }
  0x9e   :  { %v226_v47 = vpop.f32.mrf.mxu0  ;;  %v269_v6 = vpop.f32.mrf.mxu2 }
  0x9f   :  { %v227_v48 = vadd.f32 %v226_v47, %v68_v46  ;;  %v245_v49 = vpop.f32.mrf.mxu1 }
  0xa1   :  { %v246_v50 = vadd.f32 %v245_v49, %v227_v48 }
  0xa3   :  { %v265_v53 = vadd.f32 %v264_v45, %v246_v50 }
  0xa4   :  { %v231_v61 = vpop.f32.mrf.mxu3 }
  0xa5   :  { %274 = vst [vmem:[#allocation2] sm:$0xff] %v265_v53  ;;  %v302_v62 = vmul.f32 %v285_v51, %v265_v53  ;;  %v232_v2 = vadd.f32 %v231_v61, %v70_v60 }
  0xa6   :  { %v228_v56 = vpop.f32.mrf.mxu0  ;;  %v271_v21 = vpop.f32.mrf.mxu2 }
  0xa7   :  { %v229_v57 = vadd.f32 %v228_v56, %v69_v54  ;;  %v247_v58 = vpop.f32.mrf.mxu1  ;;  %v330_v4 = vadd.f32 %v313_v52, %v302_v62 }
  0xa9   :  { %v248_v63 = vadd.f32 %v247_v58, %v229_v57  ;;  %v334_v10 = vmax.f32 %v330_v4, 0.0 }
  0xab   :  { %v267_v0 = vadd.f32 %v266_v55, %v248_v63 }
  0xac   :  { %v233_v15 = vpop.f32.mrf.mxu3 }
  0xad   :  { %275 = vst [vmem:[#allocation2 + $0x8] sm:$0xff] %v267_v0  ;;  %v303_v5 = vmul.f32 %v290_v1, %v267_v0  ;;  %v234_v17 = vadd.f32 %v233_v15, %v71_v14 }
  0xaf   :  { %v331_v7 = vadd.f32 %v318_v3, %v303_v5  ;;  %v250_v8 = vpop.f32.mrf.mxu1 }
  0xb0   :  { %v251_v9 = vadd.f32 %v250_v8, %v232_v2 }
  0xb1   :  { %v335_v11 = vmax.f32 %v331_v7, 0.0 }
  0xb2   :  { %v270_v12 = vadd.f32 %v269_v6, %v251_v9 }
  0xb3   :  { %v493_v16 = vpack.c.bf16 %v335_v11, %v334_v10 }
  0xb4   :  { %276 = vst [vmem:[#allocation2 + $0x10] sm:$0xff] %v270_v12  ;;  %v304_v19 = vmul.f32 %v295_v59, %v270_v12 }
  0xb5   :  { %494 = vst [vmem:[%s724_s6] sm:$0xff] %v493_v16  }
  0xb6   :  { %v332_v24 = vadd.f32 %v323_v23, %v304_v19 }
  0xb7   :  { %v252_v18 = vpop.f32.mrf.mxu1 }
  0xb8   :  { %v253_v20 = vadd.f32 %v252_v18, %v234_v17  ;;  %v336_v28 = vmax.f32 %v332_v24, 0.0 }
  0xba   :  { %v272_v22 = vadd.f32 %v271_v21, %v253_v20 }
  0xbc   :  { %277 = vst [vmem:[#allocation2 + $0x18] sm:$0xff] %v272_v22  ;;  %v305_v25 = vmul.f32 %v300_v13, %v272_v22 }
  0xbd   :  { %358 = dma.vmem_to_hbm [thread:$0]  %s351_s7, 512, %s353_s10, [#allocation3], %s544_s2, %s544_s2, %s545_s11  }
  0xbe   :  { %v333_v27 = vadd.f32 %v328_v26, %v305_v25 }
  0xc0   :  { %v337_v29 = vmax.f32 %v333_v27, 0.0 }
  0xc2   :  { %v498_v30 = vpack.c.bf16 %v337_v29, %v336_v28 }
  0xc4   :  { %500 = vst [vmem:[%s724_s6 + $0x8] sm:$0xff] %v498_v30  }
  0xc5   :  { %540 = dma.done.wait [#allocation3], 512  }
  0xc6   :  { %541 = vsyncadd [#allocation3], 4294966784 }
  0xc7   :  { %367 = vsyncpa [#allocation3], 1 }

</bundles_post_ra>
